<compile_context>
chip_gen: v7x
topology: tpu7x:2x2x1
jax: 0.10.0
libtpu: 0.0.40
codegen_flags: <defaults>
</compile_context>

<pallas_src>
import functools

import jax
import jax.numpy as jnp
from jax.experimental import pallas as pl
from jax.experimental.pallas import tpu as pltpu


def _round_up(x, m):
    return (x + m - 1) // m * m


def _cdiv(a, b):
    return -(-a // b)


# ----------------------------------------------------------------------------
# Pallas GEMM kernel: fused bias + per-column partial BatchNorm statistics
# ----------------------------------------------------------------------------
def _gemm_bias_stats_kernel(a_ref, b_ref, s_ref, o_ref, sum_ref, ssq_ref):
    y = jnp.dot(a_ref[...], b_ref[...], preferred_element_type=jnp.float32)
    y = y + s_ref[...]                       # (1, Op) bias broadcast over rows
    o_ref[...] = y                           # lane-dense (tm, Op) unmasked store
    csum = jnp.sum(y, axis=0)                # per-column partial sums (XLU)
    cssq = jnp.sum(y * y, axis=0)
    sum_ref[...] = jnp.broadcast_to(csum[None, None, :], sum_ref.shape)
    ssq_ref[...] = jnp.broadcast_to(cssq[None, None, :], ssq_ref.shape)


def pallas_matmul(a, b, shift=None, tm=512):
    """a:(M,K) @ b:(K,O) -> (y:(M,O) f32, col_sum:(O,), col_sumsq:(O,)).

    bf16 operands (f32 MXU accumulation), full-extent K/O blocks (weights fetched once),
    O padded to a multiple of 128 for lane-dense stores, bias fused, per-tile BN partial
    stats emitted as extra outputs, and >=2 parallel M steps when M allows (v7x dual-TC).
    """
    M, K = a.shape
    K2, O = b.shape
    assert K == K2
    a = a.astype(jnp.bfloat16)
    b = b.astype(jnp.bfloat16)

    Op = _round_up(O, 128)
    if Op != O:
        b = jnp.pad(b, ((0, 0), (0, Op - O)))
    shift_p = jnp.zeros((1, Op), jnp.float32)
    if shift is not None:
        shift_p = shift_p.at[0, :O].set(jnp.asarray(shift, jnp.float32))

    if M >= 256:                               # >=2 grid steps, tiles kept >=128 rows
        tm_eff = min(tm, max(128, _round_up(_cdiv(M, 2), 16)))
    else:
        tm_eff = _round_up(M, 16)              # tiny layer -> single step
    Mp = _round_up(M, tm_eff)
    if Mp != M:
        a = jnp.pad(a, ((0, Mp - M), (0, 0)))
    G = Mp // tm_eff

    cost = pl.CostEstimate(
        flops=2 * Mp * Op * K,
        transcendentals=0,
        bytes_accessed=(Mp * K + K * Op) * 2 + (Mp * Op + Op + 2 * G * 8 * Op) * 4)

    y, psum, pssq = pl.pallas_call(
        _gemm_bias_stats_kernel,
        out_shape=(jax.ShapeDtypeStruct((Mp, Op), jnp.float32),
                   jax.ShapeDtypeStruct((G, 8, Op), jnp.float32),
                   jax.ShapeDtypeStruct((G, 8, Op), jnp.float32)),
        grid=(G,),
        in_specs=[pl.BlockSpec((tm_eff, K), lambda i: (i, 0)),
                  pl.BlockSpec((K, Op), lambda i: (0, 0)),     # constant -> fetched once
                  pl.BlockSpec((1, Op), lambda i: (0, 0))],
        out_specs=(pl.BlockSpec((tm_eff, Op), lambda i: (i, 0)),
                   pl.BlockSpec((1, 8, Op), lambda i: (i, 0, 0)),
                   pl.BlockSpec((1, 8, Op), lambda i: (i, 0, 0))),
        compiler_params=pltpu.CompilerParams(dimension_semantics=("parallel",)),
        cost_estimate=cost,
    )(a, b, shift_p)

    y = y[:M, :O]
    col_sum = jnp.sum(psum[:, 0, :O], axis=0)      # reduce tiny per-step partials in XLA
    col_ssq = jnp.sum(pssq[:, 0, :O], axis=0)
    return y, col_sum, col_ssq


# ----------------------------------------------------------------------------
# Pallas kernel for the projective combination (ProjectiveGenerator.forward)
# ----------------------------------------------------------------------------
def _projective_kernel(x_ref, t_ref, o_ref):
    # x: (1, 3, Rt, 128), t: (1, 12, Rt, 128) -> o: (1, 3, Rt, 128); dense per-channel tiles.
    x0 = x_ref[:, 0:1, :, :]
    x1 = x_ref[:, 1:2, :, :]
    x2 = x_ref[:, 2:3, :, :]
    for c in range(3):
        o_ref[:, c:c + 1, :, :] = (
            x0 * t_ref[:, 4 * c + 0:4 * c + 1, :, :]
            + x1 * t_ref[:, 4 * c + 1:4 * c + 2, :, :]
            + x2 * t_ref[:, 4 * c + 2:4 * c + 3, :, :]
            + t_ref[:, 4 * c + 3:4 * c + 4, :, :])


def projective_combine(x_nchw, t_nchw, max_rows=256):
    """x:(N,3,H,W); transform:(N,12,H,W) -> Lab:(N,3,H,W). HW tiled as (rows, 128)."""
    N, _, H, W = x_nchw.shape
    HW = H * W
    LANE = 128
    R = _cdiv(HW, LANE)
    n_tiles = _cdiv(R, max_rows)               # fixed ~1.5MB transform block per step
    Rt = _round_up(_cdiv(R, n_tiles), 8)
    Rp = Rt * n_tiles
    pad = Rp * LANE - HW

    def prep(a, C):
        a = a.reshape(N, C, HW).astype(jnp.float32)
        if pad:
            a = jnp.pad(a, ((0, 0), (0, 0), (0, pad)))
        return a.reshape(N, C, Rp, LANE)

    x4 = prep(x_nchw, 3)
    t4 = prep(t_nchw, 12)
    out = pl.pallas_call(
        _projective_kernel,
        out_shape=jax.ShapeDtypeStruct((N, 3, Rp, LANE), jnp.float32),
        grid=(N, n_tiles),
        in_specs=[pl.BlockSpec((1, 3, Rt, LANE), lambda n, r: (n, 0, r, 0)),
                  pl.BlockSpec((1, 12, Rt, LANE), lambda n, r: (n, 0, r, 0))],
        out_specs=pl.BlockSpec((1, 3, Rt, LANE), lambda n, r: (n, 0, r, 0)),
        compiler_params=pltpu.CompilerParams(
            dimension_semantics=("parallel", "parallel")),
    )(x4, t4)
    return out.reshape(N, 3, Rp * LANE)[:, :, :HW].reshape(N, 3, H, W)


# ----------------------------------------------------------------------------
# JAX glue (NHWC): im2col conv, stacked-phase conv-transpose, fused-stats BN, relu
# ----------------------------------------------------------------------------
def conv2d_nhwc(x, w, bias=None, stride=1, pad=None):
    """Valid correlation conv with optional reflect pad.  x:(N,H,W,C); w:(O,C,KH,KW)."""
    x = x.astype(jnp.bfloat16)                 # cast BEFORE pad / im2col (halves HBM bytes)
    if pad is not None:                        # pad = ((top,bottom),(left,right))
        x = jnp.pad(x, ((0, 0), pad[0], pad[1], (0, 0)), mode="reflect")
    N, H, W, C = x.shape
    O, C2, KH, KW = w.shape
    assert C == C2
    OH = (H - KH) // stride + 1
    OW = (W - KW) // stride + 1
    cols = []
    for i in range(KH):
        for j in range(KW):
            cols.append(x[:, i:i + (OH - 1) * stride + 1:stride,
                          j:j + (OW - 1) * stride + 1:stride, :])
    patches = jnp.concatenate(cols, axis=-1)               # (N, OH, OW, KH*KW*C) bf16
    a = patches.reshape(N * OH * OW, KH * KW * C)
    wmat = jnp.transpose(w, (2, 3, 1, 0)).reshape(KH * KW * C, O).astype(jnp.bfloat16)
    y, csum, cssq = pallas_matmul(a, wmat, shift=bias)      # Pallas hot path
    return y.reshape(N, OH, OW, O), csum, cssq, N * OH * OW


def conv_transpose2d_nhwc(x, w):
    """ConvTranspose2d(k=4, s=2, p=1, bias=False) as ONE stacked (9*I, 4*O) GEMM.

    The four 2x2 output phases share a single 3x3 im2col of the 1-zero-padded input;
    each phase's 2x2 taps are embedded (zeros elsewhere) into a column block of the
    stacked weight.  Output is interleaved by one reshape (no strided scatters).
    x:(N,H,W,I); w:(I,O,4,4) (PyTorch layout) -> (N,2H,2W,O) + BN partial stats.
    """
    N, H, W, I = x.shape
    I2, O, KH, KW = w.shape
    assert I == I2 and KH == 4 and KW == 4
    x = x.astype(jnp.bfloat16)
    xp = jnp.pad(x, ((0, 0), (1, 1), (1, 1), (0, 0)))
    cols = []
    for dy in range(3):
        for dx in range(3):
            cols.append(xp[:, dy:dy + H, dx:dx + W, :])
    patches = jnp.concatenate(cols, axis=-1)               # (N, H, W, 9*I)
    a = patches.reshape(N * H * W, 9 * I)

    taps = {0: (3, 1), 1: (2, 0)}        # output parity -> kernel tap index per window row
    wb = w.astype(jnp.bfloat16)
    wmat = jnp.zeros((3, 3, I, 4 * O), jnp.bfloat16)
    for pi, (py, px) in enumerate(((0, 0), (0, 1), (1, 0), (1, 1))):
        for ty in range(2):
            for tx in range(2):
                wtap = wb[:, :, taps[py][ty], taps[px][tx]]     # (I, O)
                wmat = wmat.at[py + ty, px + tx, :, pi * O:(pi + 1) * O].set(wtap)
    wmat = wmat.reshape(9 * I, 4 * O)

    y, csum, cssq = pallas_matmul(a, wmat)                  # (N*H*W, 4*O)
    y = y.reshape(N, H, W, 2, 2, O)
    y = jnp.transpose(y, (0, 1, 3, 2, 4, 5)).reshape(N, 2 * H, 2 * W, O)
    csum = csum.reshape(4, O).sum(axis=0)
    cssq = cssq.reshape(4, O).sum(axis=0)
    return y, csum, cssq, N * (2 * H) * (2 * W)


def bn_act_from_stats(y, gamma, beta, csum, cssq, count, relu=True, eps=1e-5):
    """Training-mode BatchNorm2d using per-channel sums fused in the GEMM epilogue."""
    mean = csum / count
    var = jnp.maximum(cssq / count - mean * mean, 0.0)
    scale = gamma * jax.lax.rsqrt(var + eps)
    out = y * scale + (beta - mean * scale)
    if relu:
        out = jnp.maximum(out, 0.0)
    return out


# ----------------------------------------------------------------------------
# Parameters (deterministic synthetic init, PyTorch shapes)
# ----------------------------------------------------------------------------
def build_params(key, input_nc, ngf, n_blocks):
    keys = iter(jax.random.split(key, 8 + 2 * n_blocks))

    def conv_w(o, i, k):
        return jax.random.normal(next(keys), (o, i, k, k), jnp.float32) * 0.02

    def convt_w(i, o, k):
        return jax.random.normal(next(keys), (i, o, k, k), jnp.float32) * 0.02

    def bn(c):
        return (jnp.ones((c,), jnp.float32), jnp.zeros((c,), jnp.float32))

    p = {}
    p["c0_w"], p["c0_bn"] = conv_w(ngf, input_nc, 7), bn(ngf)
    p["d1_w"], p["d1_bn"] = conv_w(ngf * 2, ngf, 3), bn(ngf * 2)
    p["d2_w"], p["d2_bn"] = conv_w(ngf * 4, ngf * 2, 3), bn(ngf * 4)
    for b in range(n_blocks):
        p[f"rb{b}_w1"], p[f"rb{b}_bn1"] = conv_w(ngf * 4, ngf * 4, 3), bn(ngf * 4)
        p[f"rb{b}_w2"], p[f"rb{b}_bn2"] = conv_w(ngf * 4, ngf * 4, 3), bn(ngf * 4)
    p["u1_w"], p["u1_bn"] = convt_w(ngf * 4, ngf * 2, 4), bn(ngf * 2)
    p["u2_w"], p["u2_bn"] = convt_w(ngf * 2, ngf, 4), bn(ngf)
    p["cf_w"] = conv_w(12, ngf, 7)
    p["cf_b"] = jax.random.normal(next(keys), (12,), jnp.float32) * 0.02
    return p


# ----------------------------------------------------------------------------
# Forward passes
# ----------------------------------------------------------------------------
def resnet_generator_forward(params, x_nchw, n_blocks):
    h = jnp.transpose(x_nchw, (0, 2, 3, 1))                        # NHWC end-to-end
    # initial 7x7 conv (ReflectionPad2d(3))
    y, s, ss, c = conv2d_nhwc(h, params["c0_w"], pad=((3, 3), (3, 3)))
    h = bn_act_from_stats(y, *params["c0_bn"], s, ss, c, relu=True)
    # downsample 1: ReflectionPad2d((1,0,1,0)) + stride-2 3x3 valid conv
    y, s, ss, c = conv2d_nhwc(h, params["d1_w"], stride=2, pad=((1, 0), (1, 0)))
    h = bn_act_from_stats(y, *params["d1_bn"], s, ss, c, relu=True)
    # downsample 2
    y, s, ss, c = conv2d_nhwc(h, params["d2_w"], stride=2, pad=((1, 0), (1, 0)))
    h = bn_act_from_stats(y, *params["d2_bn"], s, ss, c, relu=True)
    # resnet blocks (padding_type='reflect', use_dropout=False)
    for b in range(n_blocks):
        y, s, ss, c = conv2d_nhwc(h, params[f"rb{b}_w1"], pad=((1, 1), (1, 1)))
        r = bn_act_from_stats(y, *params[f"rb{b}_bn1"], s, ss, c, relu=True)
        y, s, ss, c = conv2d_nhwc(r, params[f"rb{b}_w2"], pad=((1, 1), (1, 1)))
        r = bn_act_from_stats(y, *params[f"rb{b}_bn2"], s, ss, c, relu=False)
        h = h + r
    # upsample 1 & 2 (ConvTranspose2d k=4 s=2 p=1 via one stacked 4-phase GEMM each)
    y, s, ss, c = conv_transpose2d_nhwc(h, params["u1_w"])
    h = bn_act_from_stats(y, *params["u1_bn"], s, ss, c, relu=True)
    y, s, ss, c = conv_transpose2d_nhwc(h, params["u2_w"])
    h = bn_act_from_stats(y, *params["u2_bn"], s, ss, c, relu=True)
    # final 7x7 conv to 12 channels (bias fused in the GEMM epilogue, no BN)
    y, _, _, _ = conv2d_nhwc(h, params["cf_w"], bias=params["cf_b"],
                             pad=((3, 3), (3, 3)))
    return y                                                       # (N, H, W, 12)


def projective_generator_forward(params, x, n_blocks):
    t_nhwc = resnet_generator_forward(params, x, n_blocks)         # (N, H, W, 12)
    # TODO(synk): fuse this relayout into the final conv's output writeback
    #             (transposed out_spec) to drop one full read+write of the 12-ch map.
    transform = jnp.transpose(t_nhwc, (0, 3, 1, 2))                # (N, 12, H, W)
    return projective_combine(x, transform)                        # (N, 3, H, W)


# ----------------------------------------------------------------------------
if __name__ == "__main__":
    INPUT_NC = 3        # projective combine requires 3 input channels
    NGF = 16            # small ngf for a quick synthetic run
    N_BLOCKS = 3        # small number of resnet blocks
    N, H, W = 2, 16, 16

    key = jax.random.PRNGKey(0)
    k_params, k_x = jax.random.split(key)
    params = build_params(k_params, INPUT_NC, NGF, N_BLOCKS)
    x = jax.random.normal(k_x, (N, INPUT_NC, H, W), jnp.float32)

    fwd = jax.jit(functools.partial(projective_generator_forward,
                                    n_blocks=N_BLOCKS))
    lab = fwd(params, x)
    jax.block_until_ready(lab)

    assert lab.shape == (N, 3, H, W), lab.shape
    assert bool(jnp.all(jnp.isfinite(lab)))
    print("KERNEL_OK")
</pallas_src>

<mosaic_0001>
module attributes {stable_mosaic.version = 11 : i64} {
  func.func @_gemm_bias_stats_kernel(%arg0: i32, %arg1: memref<256x147xbf16, #tpu.memory_space<vmem>>, %arg2: memref<147x128xbf16, #tpu.memory_space<vmem>>, %arg3: memref<1x128xf32, #tpu.memory_space<vmem>>, %arg4: memref<256x128xf32, #tpu.memory_space<vmem>>, %arg5: memref<1x8x128xf32, #tpu.memory_space<vmem>>, %arg6: memref<1x8x128xf32, #tpu.memory_space<vmem>>) attributes {dimension_semantics = [#tpu.dimension_semantics<parallel>], iteration_bounds = array<i64: 2>, scalar_prefetch = 0 : i64, scratch_operands = 0 : i64, tpu.core_type = #tpu.core_type<tc>, window_params = [{transform_indices = @transform_0, window_bounds = array<i64: 256, 147>}, {pipeline_mode = #tpu.pipeline_mode<synchronous>, transform_indices = @transform_1, window_bounds = array<i64: 147, 128>}, {pipeline_mode = #tpu.pipeline_mode<synchronous>, transform_indices = @transform_2, window_bounds = array<i64: 1, 128>}, {transform_indices = @transform_3, window_bounds = array<i64: 256, 128>}, {transform_indices = @transform_4, window_bounds = array<i64: 1, 8, 128>}, {transform_indices = @transform_5, window_bounds = array<i64: 1, 8, 128>}]} {
    %c0 = arith.constant 0 : index
    %c0_0 = arith.constant 0 : index
    %0 = vector.load %arg1[%c0, %c0_0] : memref<256x147xbf16, #tpu.memory_space<vmem>>, vector<256x147xbf16>
    %c0_1 = arith.constant 0 : index
    %c0_2 = arith.constant 0 : index
    %1 = vector.load %arg2[%c0_1, %c0_2] : memref<147x128xbf16, #tpu.memory_space<vmem>>, vector<147x128xbf16>
    %cst = arith.constant dense<0.000000e+00> : vector<256x128xf32>
    %2 = tpu.matmul %0, %1, %cst {dimension_numbers = #tpu.dot_dimension_numbers<[1], [0], [0], [1], [0, 0, 1, 1], [], []>} : vector<256x147xbf16>, vector<147x128xbf16>, vector<256x128xf32> -> vector<256x128xf32>
    %c0_3 = arith.constant 0 : index
    %c0_4 = arith.constant 0 : index
    %3 = vector.load %arg3[%c0_3, %c0_4] : memref<1x128xf32, #tpu.memory_space<vmem>>, vector<1x128xf32>
    %4 = vector.broadcast %3 : vector<1x128xf32> to vector<256x128xf32>
    %5 = arith.addf %2, %4 : vector<256x128xf32>
    %c0_5 = arith.constant 0 : index
    %c0_6 = arith.constant 0 : index
    %6 = vector.load %arg4[%c0_5, %c0_6] : memref<256x128xf32, #tpu.memory_space<vmem>>, vector<256x128xf32>
    tpu.vector_store %arg4[%c0_5, %c0_6], %5 {strides = array<i32>} : memref<256x128xf32, #tpu.memory_space<vmem>>, vector<256x128xf32>,
    %cst_7 = arith.constant dense<0.000000e+00> : vector<128xf32>
    %7 = vector.multi_reduction <add>, %5, %cst_7 [0] : vector<256x128xf32> to vector<128xf32>
    %8 = arith.mulf %5, %5 : vector<256x128xf32>
    %cst_8 = arith.constant dense<0.000000e+00> : vector<128xf32>
    %9 = vector.multi_reduction <add>, %8, %cst_8 [0] : vector<256x128xf32> to vector<128xf32>
    %10 = vector.shape_cast %7 : vector<128xf32> to vector<1x1x128xf32>
    %11 = vector.shape_cast %10 : vector<1x1x128xf32> to vector<1x1x128xf32>
    %12 = vector.broadcast %11 : vector<1x1x128xf32> to vector<1x8x128xf32>
    %c0_9 = arith.constant 0 : index
    %c0_10 = arith.constant 0 : index
    %c0_11 = arith.constant 0 : index
    %13 = vector.load %arg5[%c0_9, %c0_10, %c0_11] : memref<1x8x128xf32, #tpu.memory_space<vmem>>, vector<1x8x128xf32>
    tpu.vector_store %arg5[%c0_9, %c0_10, %c0_11], %12 {strides = array<i32>} : memref<1x8x128xf32, #tpu.memory_space<vmem>>, vector<1x8x128xf32>,
    %14 = vector.shape_cast %9 : vector<128xf32> to vector<1x1x128xf32>
    %15 = vector.shape_cast %14 : vector<1x1x128xf32> to vector<1x1x128xf32>
    %16 = vector.broadcast %15 : vector<1x1x128xf32> to vector<1x8x128xf32>
    %c0_12 = arith.constant 0 : index
    %c0_13 = arith.constant 0 : index
    %c0_14 = arith.constant 0 : index
    %17 = vector.load %arg6[%c0_12, %c0_13, %c0_14] : memref<1x8x128xf32, #tpu.memory_space<vmem>>, vector<1x8x128xf32>
    tpu.vector_store %arg6[%c0_12, %c0_13, %c0_14], %16 {strides = array<i32>} : memref<1x8x128xf32, #tpu.memory_space<vmem>>, vector<1x8x128xf32>,
    return
  }
  func.func @transform_0(%arg0: i32) -> (i32, i32) {
    %c0_i32 = arith.constant 0 : i32
    %c0_i32_0 = arith.constant 0 : i32
    return %arg0, %c0_i32 : i32, i32
  }
  func.func @transform_1(%arg0: i32) -> (i32, i32) {
    %c0_i32 = arith.constant 0 : i32
    %c0_i32_0 = arith.constant 0 : i32
    %c0_i32_1 = arith.constant 0 : i32
    return %c0_i32, %c0_i32_0 : i32, i32
  }
  func.func @transform_2(%arg0: i32) -> (i32, i32) {
    %c0_i32 = arith.constant 0 : i32
    %c0_i32_0 = arith.constant 0 : i32
    %c0_i32_1 = arith.constant 0 : i32
    return %c0_i32, %c0_i32_0 : i32, i32
  }
  func.func @transform_3(%arg0: i32) -> (i32, i32) {
    %c0_i32 = arith.constant 0 : i32
    %c0_i32_0 = arith.constant 0 : i32
    return %arg0, %c0_i32 : i32, i32
  }
  func.func @transform_4(%arg0: i32) -> (i32, i32, i32) {
    %c0_i32 = arith.constant 0 : i32
    %c0_i32_0 = arith.constant 0 : i32
    %c0_i32_1 = arith.constant 0 : i32
    return %arg0, %c0_i32, %c0_i32_0 : i32, i32, i32
  }
  func.func @transform_5(%arg0: i32) -> (i32, i32, i32) {
    %c0_i32 = arith.constant 0 : i32
    %c0_i32_0 = arith.constant 0 : i32
    %c0_i32_1 = arith.constant 0 : i32
    return %arg0, %c0_i32, %c0_i32_0 : i32, i32, i32
  }
}

module attributes {stable_mosaic.version = 11 : i64} {
  func.func @_gemm_bias_stats_kernel(%arg0: i32, %arg1: memref<128x144xbf16, #tpu.memory_space<vmem>>, %arg2: memref<144x128xbf16, #tpu.memory_space<vmem>>, %arg3: memref<1x128xf32, #tpu.memory_space<vmem>>, %arg4: memref<128x128xf32, #tpu.memory_space<vmem>>, %arg5: memref<1x8x128xf32, #tpu.memory_space<vmem>>, %arg6: memref<1x8x128xf32, #tpu.memory_space<vmem>>) attributes {dimension_semantics = [#tpu.dimension_semantics<parallel>], iteration_bounds = array<i64: 1>, scalar_prefetch = 0 : i64, scratch_operands = 0 : i64, tpu.core_type = #tpu.core_type<tc>, window_params = [{transform_indices = @transform_0, window_bounds = array<i64: 128, 144>}, {pipeline_mode = #tpu.pipeline_mode<synchronous>, transform_indices = @transform_1, window_bounds = array<i64: 144, 128>}, {pipeline_mode = #tpu.pipeline_mode<synchronous>, transform_indices = @transform_2, window_bounds = array<i64: 1, 128>}, {transform_indices = @transform_3, window_bounds = array<i64: 128, 128>}, {transform_indices = @transform_4, window_bounds = array<i64: 1, 8, 128>}, {transform_indices = @transform_5, window_bounds = array<i64: 1, 8, 128>}]} {
    %c0 = arith.constant 0 : index
    %c0_0 = arith.constant 0 : index
    %0 = vector.load %arg1[%c0, %c0_0] : memref<128x144xbf16, #tpu.memory_space<vmem>>, vector<128x144xbf16>
    %c0_1 = arith.constant 0 : index
    %c0_2 = arith.constant 0 : index
    %1 = vector.load %arg2[%c0_1, %c0_2] : memref<144x128xbf16, #tpu.memory_space<vmem>>, vector<144x128xbf16>
    %cst = arith.constant dense<0.000000e+00> : vector<128x128xf32>
    %2 = tpu.matmul %0, %1, %cst {dimension_numbers = #tpu.dot_dimension_numbers<[1], [0], [0], [1], [0, 0, 1, 1], [], []>} : vector<128x144xbf16>, vector<144x128xbf16>, vector<128x128xf32> -> vector<128x128xf32>
    %c0_3 = arith.constant 0 : index
    %c0_4 = arith.constant 0 : index
    %3 = vector.load %arg3[%c0_3, %c0_4] : memref<1x128xf32, #tpu.memory_space<vmem>>, vector<1x128xf32>
    %4 = vector.broadcast %3 : vector<1x128xf32> to vector<128x128xf32>
    %5 = arith.addf %2, %4 : vector<128x128xf32>
    %c0_5 = arith.constant 0 : index
    %c0_6 = arith.constant 0 : index
    %6 = vector.load %arg4[%c0_5, %c0_6] : memref<128x128xf32, #tpu.memory_space<vmem>>, vector<128x128xf32>
    tpu.vector_store %arg4[%c0_5, %c0_6], %5 {strides = array<i32>} : memref<128x128xf32, #tpu.memory_space<vmem>>, vector<128x128xf32>,
    %cst_7 = arith.constant dense<0.000000e+00> : vector<128xf32>
    %7 = vector.multi_reduction <add>, %5, %cst_7 [0] : vector<128x128xf32> to vector<128xf32>
    %8 = arith.mulf %5, %5 : vector<128x128xf32>
    %cst_8 = arith.constant dense<0.000000e+00> : vector<128xf32>
    %9 = vector.multi_reduction <add>, %8, %cst_8 [0] : vector<128x128xf32> to vector<128xf32>
    %10 = vector.shape_cast %7 : vector<128xf32> to vector<1x1x128xf32>
    %11 = vector.shape_cast %10 : vector<1x1x128xf32> to vector<1x1x128xf32>
    %12 = vector.broadcast %11 : vector<1x1x128xf32> to vector<1x8x128xf32>
    %c0_9 = arith.constant 0 : index
    %c0_10 = arith.constant 0 : index
    %c0_11 = arith.constant 0 : index
    %13 = vector.load %arg5[%c0_9, %c0_10, %c0_11] : memref<1x8x128xf32, #tpu.memory_space<vmem>>, vector<1x8x128xf32>
    tpu.vector_store %arg5[%c0_9, %c0_10, %c0_11], %12 {strides = array<i32>} : memref<1x8x128xf32, #tpu.memory_space<vmem>>, vector<1x8x128xf32>,
    %14 = vector.shape_cast %9 : vector<128xf32> to vector<1x1x128xf32>
    %15 = vector.shape_cast %14 : vector<1x1x128xf32> to vector<1x1x128xf32>
    %16 = vector.broadcast %15 : vector<1x1x128xf32> to vector<1x8x128xf32>
    %c0_12 = arith.constant 0 : index
    %c0_13 = arith.constant 0 : index
    %c0_14 = arith.constant 0 : index
    %17 = vector.load %arg6[%c0_12, %c0_13, %c0_14] : memref<1x8x128xf32, #tpu.memory_space<vmem>>, vector<1x8x128xf32>
    tpu.vector_store %arg6[%c0_12, %c0_13, %c0_14], %16 {strides = array<i32>} : memref<1x8x128xf32, #tpu.memory_space<vmem>>, vector<1x8x128xf32>,
    return
  }
  func.func @transform_0(%arg0: i32) -> (i32, i32) {
    %c0_i32 = arith.constant 0 : i32
    %c0_i32_0 = arith.constant 0 : i32
    return %arg0, %c0_i32 : i32, i32
  }
  func.func @transform_1(%arg0: i32) -> (i32, i32) {
    %c0_i32 = arith.constant 0 : i32
    %c0_i32_0 = arith.constant 0 : i32
    %c0_i32_1 = arith.constant 0 : i32
    return %c0_i32, %c0_i32_0 : i32, i32
  }
  func.func @transform_2(%arg0: i32) -> (i32, i32) {
    %c0_i32 = arith.constant 0 : i32
    %c0_i32_0 = arith.constant 0 : i32
    %c0_i32_1 = arith.constant 0 : i32
    return %c0_i32, %c0_i32_0 : i32, i32
  }
  func.func @transform_3(%arg0: i32) -> (i32, i32) {
    %c0_i32 = arith.constant 0 : i32
    %c0_i32_0 = arith.constant 0 : i32
    return %arg0, %c0_i32 : i32, i32
  }
  func.func @transform_4(%arg0: i32) -> (i32, i32, i32) {
    %c0_i32 = arith.constant 0 : i32
    %c0_i32_0 = arith.constant 0 : i32
    %c0_i32_1 = arith.constant 0 : i32
    return %arg0, %c0_i32, %c0_i32_0 : i32, i32, i32
  }
  func.func @transform_5(%arg0: i32) -> (i32, i32, i32) {
    %c0_i32 = arith.constant 0 : i32
    %c0_i32_0 = arith.constant 0 : i32
    %c0_i32_1 = arith.constant 0 : i32
    return %arg0, %c0_i32, %c0_i32_0 : i32, i32, i32
  }
}

module attributes {stable_mosaic.version = 11 : i64} {
  func.func @_gemm_bias_stats_kernel(%arg0: i32, %arg1: memref<32x288xbf16, #tpu.memory_space<vmem>>, %arg2: memref<288x128xbf16, #tpu.memory_space<vmem>>, %arg3: memref<1x128xf32, #tpu.memory_space<vmem>>, %arg4: memref<32x128xf32, #tpu.memory_space<vmem>>, %arg5: memref<1x8x128xf32, #tpu.memory_space<vmem>>, %arg6: memref<1x8x128xf32, #tpu.memory_space<vmem>>) attributes {dimension_semantics = [#tpu.dimension_semantics<parallel>], iteration_bounds = array<i64: 1>, scalar_prefetch = 0 : i64, scratch_operands = 0 : i64, tpu.core_type = #tpu.core_type<tc>, window_params = [{transform_indices = @transform_0, window_bounds = array<i64: 32, 288>}, {pipeline_mode = #tpu.pipeline_mode<synchronous>, transform_indices = @transform_1, window_bounds = array<i64: 288, 128>}, {pipeline_mode = #tpu.pipeline_mode<synchronous>, transform_indices = @transform_2, window_bounds = array<i64: 1, 128>}, {transform_indices = @transform_3, window_bounds = array<i64: 32, 128>}, {transform_indices = @transform_4, window_bounds = array<i64: 1, 8, 128>}, {transform_indices = @transform_5, window_bounds = array<i64: 1, 8, 128>}]} {
    %c0 = arith.constant 0 : index
    %c0_0 = arith.constant 0 : index
    %0 = vector.load %arg1[%c0, %c0_0] : memref<32x288xbf16, #tpu.memory_space<vmem>>, vector<32x288xbf16>
    %c0_1 = arith.constant 0 : index
    %c0_2 = arith.constant 0 : index
    %1 = vector.load %arg2[%c0_1, %c0_2] : memref<288x128xbf16, #tpu.memory_space<vmem>>, vector<288x128xbf16>
    %cst = arith.constant dense<0.000000e+00> : vector<32x128xf32>
    %2 = tpu.matmul %0, %1, %cst {dimension_numbers = #tpu.dot_dimension_numbers<[1], [0], [0], [1], [0, 0, 1, 1], [], []>} : vector<32x288xbf16>, vector<288x128xbf16>, vector<32x128xf32> -> vector<32x128xf32>
    %c0_3 = arith.constant 0 : index
    %c0_4 = arith.constant 0 : index
    %3 = vector.load %arg3[%c0_3, %c0_4] : memref<1x128xf32, #tpu.memory_space<vmem>>, vector<1x128xf32>
    %4 = vector.broadcast %3 : vector<1x128xf32> to vector<32x128xf32>
    %5 = arith.addf %2, %4 : vector<32x128xf32>
    %c0_5 = arith.constant 0 : index
    %c0_6 = arith.constant 0 : index
    %6 = vector.load %arg4[%c0_5, %c0_6] : memref<32x128xf32, #tpu.memory_space<vmem>>, vector<32x128xf32>
    tpu.vector_store %arg4[%c0_5, %c0_6], %5 {strides = array<i32>} : memref<32x128xf32, #tpu.memory_space<vmem>>, vector<32x128xf32>,
    %cst_7 = arith.constant dense<0.000000e+00> : vector<128xf32>
    %7 = vector.multi_reduction <add>, %5, %cst_7 [0] : vector<32x128xf32> to vector<128xf32>
    %8 = arith.mulf %5, %5 : vector<32x128xf32>
    %cst_8 = arith.constant dense<0.000000e+00> : vector<128xf32>
    %9 = vector.multi_reduction <add>, %8, %cst_8 [0] : vector<32x128xf32> to vector<128xf32>
    %10 = vector.shape_cast %7 : vector<128xf32> to vector<1x1x128xf32>
    %11 = vector.shape_cast %10 : vector<1x1x128xf32> to vector<1x1x128xf32>
    %12 = vector.broadcast %11 : vector<1x1x128xf32> to vector<1x8x128xf32>
    %c0_9 = arith.constant 0 : index
    %c0_10 = arith.constant 0 : index
    %c0_11 = arith.constant 0 : index
    %13 = vector.load %arg5[%c0_9, %c0_10, %c0_11] : memref<1x8x128xf32, #tpu.memory_space<vmem>>, vector<1x8x128xf32>
    tpu.vector_store %arg5[%c0_9, %c0_10, %c0_11], %12 {strides = array<i32>} : memref<1x8x128xf32, #tpu.memory_space<vmem>>, vector<1x8x128xf32>,
    %14 = vector.shape_cast %9 : vector<128xf32> to vector<1x1x128xf32>
    %15 = vector.shape_cast %14 : vector<1x1x128xf32> to vector<1x1x128xf32>
    %16 = vector.broadcast %15 : vector<1x1x128xf32> to vector<1x8x128xf32>
    %c0_12 = arith.constant 0 : index
    %c0_13 = arith.constant 0 : index
    %c0_14 = arith.constant 0 : index
    %17 = vector.load %arg6[%c0_12, %c0_13, %c0_14] : memref<1x8x128xf32, #tpu.memory_space<vmem>>, vector<1x8x128xf32>
    tpu.vector_store %arg6[%c0_12, %c0_13, %c0_14], %16 {strides = array<i32>} : memref<1x8x128xf32, #tpu.memory_space<vmem>>, vector<1x8x128xf32>,
    return
  }
  func.func @transform_0(%arg0: i32) -> (i32, i32) {
    %c0_i32 = arith.constant 0 : i32
    %c0_i32_0 = arith.constant 0 : i32
    return %arg0, %c0_i32 : i32, i32
  }
  func.func @transform_1(%arg0: i32) -> (i32, i32) {
    %c0_i32 = arith.constant 0 : i32
    %c0_i32_0 = arith.constant 0 : i32
    %c0_i32_1 = arith.constant 0 : i32
    return %c0_i32, %c0_i32_0 : i32, i32
  }
  func.func @transform_2(%arg0: i32) -> (i32, i32) {
    %c0_i32 = arith.constant 0 : i32
    %c0_i32_0 = arith.constant 0 : i32
    %c0_i32_1 = arith.constant 0 : i32
    return %c0_i32, %c0_i32_0 : i32, i32
  }
  func.func @transform_3(%arg0: i32) -> (i32, i32) {
    %c0_i32 = arith.constant 0 : i32
    %c0_i32_0 = arith.constant 0 : i32
    return %arg0, %c0_i32 : i32, i32
  }
  func.func @transform_4(%arg0: i32) -> (i32, i32, i32) {
    %c0_i32 = arith.constant 0 : i32
    %c0_i32_0 = arith.constant 0 : i32
    %c0_i32_1 = arith.constant 0 : i32
    return %arg0, %c0_i32, %c0_i32_0 : i32, i32, i32
  }
  func.func @transform_5(%arg0: i32) -> (i32, i32, i32) {
    %c0_i32 = arith.constant 0 : i32
    %c0_i32_0 = arith.constant 0 : i32
    %c0_i32_1 = arith.constant 0 : i32
    return %arg0, %c0_i32, %c0_i32_0 : i32, i32, i32
  }
}

module attributes {stable_mosaic.version = 11 : i64} {
  func.func @_gemm_bias_stats_kernel(%arg0: i32, %arg1: memref<32x576xbf16, #tpu.memory_space<vmem>>, %arg2: memref<576x128xbf16, #tpu.memory_space<vmem>>, %arg3: memref<1x128xf32, #tpu.memory_space<vmem>>, %arg4: memref<32x128xf32, #tpu.memory_space<vmem>>, %arg5: memref<1x8x128xf32, #tpu.memory_space<vmem>>, %arg6: memref<1x8x128xf32, #tpu.memory_space<vmem>>) attributes {dimension_semantics = [#tpu.dimension_semantics<parallel>], iteration_bounds = array<i64: 1>, scalar_prefetch = 0 : i64, scratch_operands = 0 : i64, tpu.core_type = #tpu.core_type<tc>, window_params = [{transform_indices = @transform_0, window_bounds = array<i64: 32, 576>}, {pipeline_mode = #tpu.pipeline_mode<synchronous>, transform_indices = @transform_1, window_bounds = array<i64: 576, 128>}, {pipeline_mode = #tpu.pipeline_mode<synchronous>, transform_indices = @transform_2, window_bounds = array<i64: 1, 128>}, {transform_indices = @transform_3, window_bounds = array<i64: 32, 128>}, {transform_indices = @transform_4, window_bounds = array<i64: 1, 8, 128>}, {transform_indices = @transform_5, window_bounds = array<i64: 1, 8, 128>}]} {
    %c0 = arith.constant 0 : index
    %c0_0 = arith.constant 0 : index
    %0 = vector.load %arg1[%c0, %c0_0] : memref<32x576xbf16, #tpu.memory_space<vmem>>, vector<32x576xbf16>
    %c0_1 = arith.constant 0 : index
    %c0_2 = arith.constant 0 : index
    %1 = vector.load %arg2[%c0_1, %c0_2] : memref<576x128xbf16, #tpu.memory_space<vmem>>, vector<576x128xbf16>
    %cst = arith.constant dense<0.000000e+00> : vector<32x128xf32>
    %2 = tpu.matmul %0, %1, %cst {dimension_numbers = #tpu.dot_dimension_numbers<[1], [0], [0], [1], [0, 0, 1, 1], [], []>} : vector<32x576xbf16>, vector<576x128xbf16>, vector<32x128xf32> -> vector<32x128xf32>
    %c0_3 = arith.constant 0 : index
    %c0_4 = arith.constant 0 : index
    %3 = vector.load %arg3[%c0_3, %c0_4] : memref<1x128xf32, #tpu.memory_space<vmem>>, vector<1x128xf32>
    %4 = vector.broadcast %3 : vector<1x128xf32> to vector<32x128xf32>
    %5 = arith.addf %2, %4 : vector<32x128xf32>
    %c0_5 = arith.constant 0 : index
    %c0_6 = arith.constant 0 : index
    %6 = vector.load %arg4[%c0_5, %c0_6] : memref<32x128xf32, #tpu.memory_space<vmem>>, vector<32x128xf32>
    tpu.vector_store %arg4[%c0_5, %c0_6], %5 {strides = array<i32>} : memref<32x128xf32, #tpu.memory_space<vmem>>, vector<32x128xf32>,
    %cst_7 = arith.constant dense<0.000000e+00> : vector<128xf32>
    %7 = vector.multi_reduction <add>, %5, %cst_7 [0] : vector<32x128xf32> to vector<128xf32>
    %8 = arith.mulf %5, %5 : vector<32x128xf32>
    %cst_8 = arith.constant dense<0.000000e+00> : vector<128xf32>
    %9 = vector.multi_reduction <add>, %8, %cst_8 [0] : vector<32x128xf32> to vector<128xf32>
    %10 = vector.shape_cast %7 : vector<128xf32> to vector<1x1x128xf32>
    %11 = vector.shape_cast %10 : vector<1x1x128xf32> to vector<1x1x128xf32>
    %12 = vector.broadcast %11 : vector<1x1x128xf32> to vector<1x8x128xf32>
    %c0_9 = arith.constant 0 : index
    %c0_10 = arith.constant 0 : index
    %c0_11 = arith.constant 0 : index
    %13 = vector.load %arg5[%c0_9, %c0_10, %c0_11] : memref<1x8x128xf32, #tpu.memory_space<vmem>>, vector<1x8x128xf32>
    tpu.vector_store %arg5[%c0_9, %c0_10, %c0_11], %12 {strides = array<i32>} : memref<1x8x128xf32, #tpu.memory_space<vmem>>, vector<1x8x128xf32>,
    %14 = vector.shape_cast %9 : vector<128xf32> to vector<1x1x128xf32>
    %15 = vector.shape_cast %14 : vector<1x1x128xf32> to vector<1x1x128xf32>
    %16 = vector.broadcast %15 : vector<1x1x128xf32> to vector<1x8x128xf32>
    %c0_12 = arith.constant 0 : index
    %c0_13 = arith.constant 0 : index
    %c0_14 = arith.constant 0 : index
    %17 = vector.load %arg6[%c0_12, %c0_13, %c0_14] : memref<1x8x128xf32, #tpu.memory_space<vmem>>, vector<1x8x128xf32>
    tpu.vector_store %arg6[%c0_12, %c0_13, %c0_14], %16 {strides = array<i32>} : memref<1x8x128xf32, #tpu.memory_space<vmem>>, vector<1x8x128xf32>,
    return
  }
  func.func @transform_0(%arg0: i32) -> (i32, i32) {
    %c0_i32 = arith.constant 0 : i32
    %c0_i32_0 = arith.constant 0 : i32
    return %arg0, %c0_i32 : i32, i32
  }
  func.func @transform_1(%arg0: i32) -> (i32, i32) {
    %c0_i32 = arith.constant 0 : i32
    %c0_i32_0 = arith.constant 0 : i32
    %c0_i32_1 = arith.constant 0 : i32
    return %c0_i32, %c0_i32_0 : i32, i32
  }
  func.func @transform_2(%arg0: i32) -> (i32, i32) {
    %c0_i32 = arith.constant 0 : i32
    %c0_i32_0 = arith.constant 0 : i32
    %c0_i32_1 = arith.constant 0 : i32
    return %c0_i32, %c0_i32_0 : i32, i32
  }
  func.func @transform_3(%arg0: i32) -> (i32, i32) {
    %c0_i32 = arith.constant 0 : i32
    %c0_i32_0 = arith.constant 0 : i32
    return %arg0, %c0_i32 : i32, i32
  }
  func.func @transform_4(%arg0: i32) -> (i32, i32, i32) {
    %c0_i32 = arith.constant 0 : i32
    %c0_i32_0 = arith.constant 0 : i32
    %c0_i32_1 = arith.constant 0 : i32
    return %arg0, %c0_i32, %c0_i32_0 : i32, i32, i32
  }
  func.func @transform_5(%arg0: i32) -> (i32, i32, i32) {
    %c0_i32 = arith.constant 0 : i32
    %c0_i32_0 = arith.constant 0 : i32
    %c0_i32_1 = arith.constant 0 : i32
    return %arg0, %c0_i32, %c0_i32_0 : i32, i32, i32
  }
}

module attributes {stable_mosaic.version = 11 : i64} {
  func.func @_gemm_bias_stats_kernel(%arg0: i32, %arg1: memref<128x288xbf16, #tpu.memory_space<vmem>>, %arg2: memref<288x128xbf16, #tpu.memory_space<vmem>>, %arg3: memref<1x128xf32, #tpu.memory_space<vmem>>, %arg4: memref<128x128xf32, #tpu.memory_space<vmem>>, %arg5: memref<1x8x128xf32, #tpu.memory_space<vmem>>, %arg6: memref<1x8x128xf32, #tpu.memory_space<vmem>>) attributes {dimension_semantics = [#tpu.dimension_semantics<parallel>], iteration_bounds = array<i64: 1>, scalar_prefetch = 0 : i64, scratch_operands = 0 : i64, tpu.core_type = #tpu.core_type<tc>, window_params = [{transform_indices = @transform_0, window_bounds = array<i64: 128, 288>}, {pipeline_mode = #tpu.pipeline_mode<synchronous>, transform_indices = @transform_1, window_bounds = array<i64: 288, 128>}, {pipeline_mode = #tpu.pipeline_mode<synchronous>, transform_indices = @transform_2, window_bounds = array<i64: 1, 128>}, {transform_indices = @transform_3, window_bounds = array<i64: 128, 128>}, {transform_indices = @transform_4, window_bounds = array<i64: 1, 8, 128>}, {transform_indices = @transform_5, window_bounds = array<i64: 1, 8, 128>}]} {
    %c0 = arith.constant 0 : index
    %c0_0 = arith.constant 0 : index
    %0 = vector.load %arg1[%c0, %c0_0] : memref<128x288xbf16, #tpu.memory_space<vmem>>, vector<128x288xbf16>
    %c0_1 = arith.constant 0 : index
    %c0_2 = arith.constant 0 : index
    %1 = vector.load %arg2[%c0_1, %c0_2] : memref<288x128xbf16, #tpu.memory_space<vmem>>, vector<288x128xbf16>
    %cst = arith.constant dense<0.000000e+00> : vector<128x128xf32>
    %2 = tpu.matmul %0, %1, %cst {dimension_numbers = #tpu.dot_dimension_numbers<[1], [0], [0], [1], [0, 0, 1, 1], [], []>} : vector<128x288xbf16>, vector<288x128xbf16>, vector<128x128xf32> -> vector<128x128xf32>
    %c0_3 = arith.constant 0 : index
    %c0_4 = arith.constant 0 : index
    %3 = vector.load %arg3[%c0_3, %c0_4] : memref<1x128xf32, #tpu.memory_space<vmem>>, vector<1x128xf32>
    %4 = vector.broadcast %3 : vector<1x128xf32> to vector<128x128xf32>
    %5 = arith.addf %2, %4 : vector<128x128xf32>
    %c0_5 = arith.constant 0 : index
    %c0_6 = arith.constant 0 : index
    %6 = vector.load %arg4[%c0_5, %c0_6] : memref<128x128xf32, #tpu.memory_space<vmem>>, vector<128x128xf32>
    tpu.vector_store %arg4[%c0_5, %c0_6], %5 {strides = array<i32>} : memref<128x128xf32, #tpu.memory_space<vmem>>, vector<128x128xf32>,
    %cst_7 = arith.constant dense<0.000000e+00> : vector<128xf32>
    %7 = vector.multi_reduction <add>, %5, %cst_7 [0] : vector<128x128xf32> to vector<128xf32>
    %8 = arith.mulf %5, %5 : vector<128x128xf32>
    %cst_8 = arith.constant dense<0.000000e+00> : vector<128xf32>
    %9 = vector.multi_reduction <add>, %8, %cst_8 [0] : vector<128x128xf32> to vector<128xf32>
    %10 = vector.shape_cast %7 : vector<128xf32> to vector<1x1x128xf32>
    %11 = vector.shape_cast %10 : vector<1x1x128xf32> to vector<1x1x128xf32>
    %12 = vector.broadcast %11 : vector<1x1x128xf32> to vector<1x8x128xf32>
    %c0_9 = arith.constant 0 : index
    %c0_10 = arith.constant 0 : index
    %c0_11 = arith.constant 0 : index
    %13 = vector.load %arg5[%c0_9, %c0_10, %c0_11] : memref<1x8x128xf32, #tpu.memory_space<vmem>>, vector<1x8x128xf32>
    tpu.vector_store %arg5[%c0_9, %c0_10, %c0_11], %12 {strides = array<i32>} : memref<1x8x128xf32, #tpu.memory_space<vmem>>, vector<1x8x128xf32>,
    %14 = vector.shape_cast %9 : vector<128xf32> to vector<1x1x128xf32>
    %15 = vector.shape_cast %14 : vector<1x1x128xf32> to vector<1x1x128xf32>
    %16 = vector.broadcast %15 : vector<1x1x128xf32> to vector<1x8x128xf32>
    %c0_12 = arith.constant 0 : index
    %c0_13 = arith.constant 0 : index
    %c0_14 = arith.constant 0 : index
    %17 = vector.load %arg6[%c0_12, %c0_13, %c0_14] : memref<1x8x128xf32, #tpu.memory_space<vmem>>, vector<1x8x128xf32>
    tpu.vector_store %arg6[%c0_12, %c0_13, %c0_14], %16 {strides = array<i32>} : memref<1x8x128xf32, #tpu.memory_space<vmem>>, vector<1x8x128xf32>,
    return
  }
  func.func @transform_0(%arg0: i32) -> (i32, i32) {
    %c0_i32 = arith.constant 0 : i32
    %c0_i32_0 = arith.constant 0 : i32
    return %arg0, %c0_i32 : i32, i32
  }
  func.func @transform_1(%arg0: i32) -> (i32, i32) {
    %c0_i32 = arith.constant 0 : i32
    %c0_i32_0 = arith.constant 0 : i32
    %c0_i32_1 = arith.constant 0 : i32
    return %c0_i32, %c0_i32_0 : i32, i32
  }
  func.func @transform_2(%arg0: i32) -> (i32, i32) {
    %c0_i32 = arith.constant 0 : i32
    %c0_i32_0 = arith.constant 0 : i32
    %c0_i32_1 = arith.constant 0 : i32
    return %c0_i32, %c0_i32_0 : i32, i32
  }
  func.func @transform_3(%arg0: i32) -> (i32, i32) {
    %c0_i32 = arith.constant 0 : i32
    %c0_i32_0 = arith.constant 0 : i32
    return %arg0, %c0_i32 : i32, i32
  }
  func.func @transform_4(%arg0: i32) -> (i32, i32, i32) {
    %c0_i32 = arith.constant 0 : i32
    %c0_i32_0 = arith.constant 0 : i32
    %c0_i32_1 = arith.constant 0 : i32
    return %arg0, %c0_i32, %c0_i32_0 : i32, i32, i32
  }
  func.func @transform_5(%arg0: i32) -> (i32, i32, i32) {
    %c0_i32 = arith.constant 0 : i32
    %c0_i32_0 = arith.constant 0 : i32
    %c0_i32_1 = arith.constant 0 : i32
    return %arg0, %c0_i32, %c0_i32_0 : i32, i32, i32
  }
}

module attributes {stable_mosaic.version = 11 : i64} {
  func.func @_gemm_bias_stats_kernel(%arg0: i32, %arg1: memref<256x784xbf16, #tpu.memory_space<vmem>>, %arg2: memref<784x128xbf16, #tpu.memory_space<vmem>>, %arg3: memref<1x128xf32, #tpu.memory_space<vmem>>, %arg4: memref<256x128xf32, #tpu.memory_space<vmem>>, %arg5: memref<1x8x128xf32, #tpu.memory_space<vmem>>, %arg6: memref<1x8x128xf32, #tpu.memory_space<vmem>>) attributes {dimension_semantics = [#tpu.dimension_semantics<parallel>], iteration_bounds = array<i64: 2>, scalar_prefetch = 0 : i64, scratch_operands = 0 : i64, tpu.core_type = #tpu.core_type<tc>, window_params = [{transform_indices = @transform_0, window_bounds = array<i64: 256, 784>}, {pipeline_mode = #tpu.pipeline_mode<synchronous>, transform_indices = @transform_1, window_bounds = array<i64: 784, 128>}, {pipeline_mode = #tpu.pipeline_mode<synchronous>, transform_indices = @transform_2, window_bounds = array<i64: 1, 128>}, {transform_indices = @transform_3, window_bounds = array<i64: 256, 128>}, {transform_indices = @transform_4, window_bounds = array<i64: 1, 8, 128>}, {transform_indices = @transform_5, window_bounds = array<i64: 1, 8, 128>}]} {
    %c0 = arith.constant 0 : index
    %c0_0 = arith.constant 0 : index
    %0 = vector.load %arg1[%c0, %c0_0] : memref<256x784xbf16, #tpu.memory_space<vmem>>, vector<256x784xbf16>
    %c0_1 = arith.constant 0 : index
    %c0_2 = arith.constant 0 : index
    %1 = vector.load %arg2[%c0_1, %c0_2] : memref<784x128xbf16, #tpu.memory_space<vmem>>, vector<784x128xbf16>
    %cst = arith.constant dense<0.000000e+00> : vector<256x128xf32>
    %2 = tpu.matmul %0, %1, %cst {dimension_numbers = #tpu.dot_dimension_numbers<[1], [0], [0], [1], [0, 0, 1, 1], [], []>} : vector<256x784xbf16>, vector<784x128xbf16>, vector<256x128xf32> -> vector<256x128xf32>
    %c0_3 = arith.constant 0 : index
    %c0_4 = arith.constant 0 : index
    %3 = vector.load %arg3[%c0_3, %c0_4] : memref<1x128xf32, #tpu.memory_space<vmem>>, vector<1x128xf32>
    %4 = vector.broadcast %3 : vector<1x128xf32> to vector<256x128xf32>
    %5 = arith.addf %2, %4 : vector<256x128xf32>
    %c0_5 = arith.constant 0 : index
    %c0_6 = arith.constant 0 : index
    %6 = vector.load %arg4[%c0_5, %c0_6] : memref<256x128xf32, #tpu.memory_space<vmem>>, vector<256x128xf32>
    tpu.vector_store %arg4[%c0_5, %c0_6], %5 {strides = array<i32>} : memref<256x128xf32, #tpu.memory_space<vmem>>, vector<256x128xf32>,
    %cst_7 = arith.constant dense<0.000000e+00> : vector<128xf32>
    %7 = vector.multi_reduction <add>, %5, %cst_7 [0] : vector<256x128xf32> to vector<128xf32>
    %8 = arith.mulf %5, %5 : vector<256x128xf32>
    %cst_8 = arith.constant dense<0.000000e+00> : vector<128xf32>
    %9 = vector.multi_reduction <add>, %8, %cst_8 [0] : vector<256x128xf32> to vector<128xf32>
    %10 = vector.shape_cast %7 : vector<128xf32> to vector<1x1x128xf32>
    %11 = vector.shape_cast %10 : vector<1x1x128xf32> to vector<1x1x128xf32>
    %12 = vector.broadcast %11 : vector<1x1x128xf32> to vector<1x8x128xf32>
    %c0_9 = arith.constant 0 : index
    %c0_10 = arith.constant 0 : index
    %c0_11 = arith.constant 0 : index
    %13 = vector.load %arg5[%c0_9, %c0_10, %c0_11] : memref<1x8x128xf32, #tpu.memory_space<vmem>>, vector<1x8x128xf32>
    tpu.vector_store %arg5[%c0_9, %c0_10, %c0_11], %12 {strides = array<i32>} : memref<1x8x128xf32, #tpu.memory_space<vmem>>, vector<1x8x128xf32>,
    %14 = vector.shape_cast %9 : vector<128xf32> to vector<1x1x128xf32>
    %15 = vector.shape_cast %14 : vector<1x1x128xf32> to vector<1x1x128xf32>
    %16 = vector.broadcast %15 : vector<1x1x128xf32> to vector<1x8x128xf32>
    %c0_12 = arith.constant 0 : index
    %c0_13 = arith.constant 0 : index
    %c0_14 = arith.constant 0 : index
    %17 = vector.load %arg6[%c0_12, %c0_13, %c0_14] : memref<1x8x128xf32, #tpu.memory_space<vmem>>, vector<1x8x128xf32>
    tpu.vector_store %arg6[%c0_12, %c0_13, %c0_14], %16 {strides = array<i32>} : memref<1x8x128xf32, #tpu.memory_space<vmem>>, vector<1x8x128xf32>,
    return
  }
  func.func @transform_0(%arg0: i32) -> (i32, i32) {
    %c0_i32 = arith.constant 0 : i32
    %c0_i32_0 = arith.constant 0 : i32
    return %arg0, %c0_i32 : i32, i32
  }
  func.func @transform_1(%arg0: i32) -> (i32, i32) {
    %c0_i32 = arith.constant 0 : i32
    %c0_i32_0 = arith.constant 0 : i32
    %c0_i32_1 = arith.constant 0 : i32
    return %c0_i32, %c0_i32_0 : i32, i32
  }
  func.func @transform_2(%arg0: i32) -> (i32, i32) {
    %c0_i32 = arith.constant 0 : i32
    %c0_i32_0 = arith.constant 0 : i32
    %c0_i32_1 = arith.constant 0 : i32
    return %c0_i32, %c0_i32_0 : i32, i32
  }
  func.func @transform_3(%arg0: i32) -> (i32, i32) {
    %c0_i32 = arith.constant 0 : i32
    %c0_i32_0 = arith.constant 0 : i32
    return %arg0, %c0_i32 : i32, i32
  }
  func.func @transform_4(%arg0: i32) -> (i32, i32, i32) {
    %c0_i32 = arith.constant 0 : i32
    %c0_i32_0 = arith.constant 0 : i32
    %c0_i32_1 = arith.constant 0 : i32
    return %arg0, %c0_i32, %c0_i32_0 : i32, i32, i32
  }
  func.func @transform_5(%arg0: i32) -> (i32, i32, i32) {
    %c0_i32 = arith.constant 0 : i32
    %c0_i32_0 = arith.constant 0 : i32
    %c0_i32_1 = arith.constant 0 : i32
    return %arg0, %c0_i32, %c0_i32_0 : i32, i32, i32
  }
}

module attributes {stable_mosaic.version = 11 : i64} {
  func.func @_projective_kernel(%arg0: i32, %arg1: i32, %arg2: memref<1x3x8x128xf32, #tpu.memory_space<vmem>>, %arg3: memref<1x12x8x128xf32, #tpu.memory_space<vmem>>, %arg4: memref<1x3x8x128xf32, #tpu.memory_space<vmem>>) attributes {dimension_semantics = [#tpu.dimension_semantics<parallel>, #tpu.dimension_semantics<parallel>], iteration_bounds = array<i64: 2, 1>, scalar_prefetch = 0 : i64, scratch_operands = 0 : i64, tpu.core_type = #tpu.core_type<tc>, window_params = [{transform_indices = @transform_0, window_bounds = array<i64: 1, 3, 8, 128>}, {transform_indices = @transform_1, window_bounds = array<i64: 1, 12, 8, 128>}, {transform_indices = @transform_2, window_bounds = array<i64: 1, 3, 8, 128>}]} {
    %c0 = arith.constant 0 : index
    %c0_0 = arith.constant 0 : index
    %c0_1 = arith.constant 0 : index
    %c0_2 = arith.constant 0 : index
    %0 = vector.load %arg2[%c0, %c0_0, %c0_1, %c0_2] : memref<1x3x8x128xf32, #tpu.memory_space<vmem>>, vector<1x1x8x128xf32>
    %c0_3 = arith.constant 0 : index
    %c1 = arith.constant 1 : index
    %c0_4 = arith.constant 0 : index
    %c0_5 = arith.constant 0 : index
    %1 = vector.load %arg2[%c0_3, %c1, %c0_4, %c0_5] : memref<1x3x8x128xf32, #tpu.memory_space<vmem>>, vector<1x1x8x128xf32>
    %c0_6 = arith.constant 0 : index
    %c2 = arith.constant 2 : index
    %c0_7 = arith.constant 0 : index
    %c0_8 = arith.constant 0 : index
    %2 = vector.load %arg2[%c0_6, %c2, %c0_7, %c0_8] : memref<1x3x8x128xf32, #tpu.memory_space<vmem>>, vector<1x1x8x128xf32>
    %c0_9 = arith.constant 0 : index
    %c0_10 = arith.constant 0 : index
    %c0_11 = arith.constant 0 : index
    %c0_12 = arith.constant 0 : index
    %3 = vector.load %arg3[%c0_9, %c0_10, %c0_11, %c0_12] : memref<1x12x8x128xf32, #tpu.memory_space<vmem>>, vector<1x1x8x128xf32>
    %4 = arith.mulf %0, %3 : vector<1x1x8x128xf32>
    %c0_13 = arith.constant 0 : index
    %c1_14 = arith.constant 1 : index
    %c0_15 = arith.constant 0 : index
    %c0_16 = arith.constant 0 : index
    %5 = vector.load %arg3[%c0_13, %c1_14, %c0_15, %c0_16] : memref<1x12x8x128xf32, #tpu.memory_space<vmem>>, vector<1x1x8x128xf32>
    %6 = arith.mulf %1, %5 : vector<1x1x8x128xf32>
    %7 = arith.addf %4, %6 : vector<1x1x8x128xf32>
    %c0_17 = arith.constant 0 : index
    %c2_18 = arith.constant 2 : index
    %c0_19 = arith.constant 0 : index
    %c0_20 = arith.constant 0 : index
    %8 = vector.load %arg3[%c0_17, %c2_18, %c0_19, %c0_20] : memref<1x12x8x128xf32, #tpu.memory_space<vmem>>, vector<1x1x8x128xf32>
    %9 = arith.mulf %2, %8 : vector<1x1x8x128xf32>
    %10 = arith.addf %7, %9 : vector<1x1x8x128xf32>
    %c0_21 = arith.constant 0 : index
    %c3 = arith.constant 3 : index
    %c0_22 = arith.constant 0 : index
    %c0_23 = arith.constant 0 : index
    %11 = vector.load %arg3[%c0_21, %c3, %c0_22, %c0_23] : memref<1x12x8x128xf32, #tpu.memory_space<vmem>>, vector<1x1x8x128xf32>
    %12 = arith.addf %10, %11 : vector<1x1x8x128xf32>
    %c0_24 = arith.constant 0 : index
    %c0_25 = arith.constant 0 : index
    %c0_26 = arith.constant 0 : index
    %c0_27 = arith.constant 0 : index
    %13 = vector.load %arg4[%c0_24, %c0_25, %c0_26, %c0_27] : memref<1x3x8x128xf32, #tpu.memory_space<vmem>>, vector<1x1x8x128xf32>
    tpu.vector_store %arg4[%c0_24, %c0_25, %c0_26, %c0_27], %12 {strides = array<i32>} : memref<1x3x8x128xf32, #tpu.memory_space<vmem>>, vector<1x1x8x128xf32>,
    %c0_28 = arith.constant 0 : index
    %c4 = arith.constant 4 : index
    %c0_29 = arith.constant 0 : index
    %c0_30 = arith.constant 0 : index
    %14 = vector.load %arg3[%c0_28, %c4, %c0_29, %c0_30] : memref<1x12x8x128xf32, #tpu.memory_space<vmem>>, vector<1x1x8x128xf32>
    %15 = arith.mulf %0, %14 : vector<1x1x8x128xf32>
    %c0_31 = arith.constant 0 : index
    %c5 = arith.constant 5 : index
    %c0_32 = arith.constant 0 : index
    %c0_33 = arith.constant 0 : index
    %16 = vector.load %arg3[%c0_31, %c5, %c0_32, %c0_33] : memref<1x12x8x128xf32, #tpu.memory_space<vmem>>, vector<1x1x8x128xf32>
    %17 = arith.mulf %1, %16 : vector<1x1x8x128xf32>
    %18 = arith.addf %15, %17 : vector<1x1x8x128xf32>
    %c0_34 = arith.constant 0 : index
    %c6 = arith.constant 6 : index
    %c0_35 = arith.constant 0 : index
    %c0_36 = arith.constant 0 : index
    %19 = vector.load %arg3[%c0_34, %c6, %c0_35, %c0_36] : memref<1x12x8x128xf32, #tpu.memory_space<vmem>>, vector<1x1x8x128xf32>
    %20 = arith.mulf %2, %19 : vector<1x1x8x128xf32>
    %21 = arith.addf %18, %20 : vector<1x1x8x128xf32>
    %c0_37 = arith.constant 0 : index
    %c7 = arith.constant 7 : index
    %c0_38 = arith.constant 0 : index
    %c0_39 = arith.constant 0 : index
    %22 = vector.load %arg3[%c0_37, %c7, %c0_38, %c0_39] : memref<1x12x8x128xf32, #tpu.memory_space<vmem>>, vector<1x1x8x128xf32>
    %23 = arith.addf %21, %22 : vector<1x1x8x128xf32>
    %c0_40 = arith.constant 0 : index
    %c1_41 = arith.constant 1 : index
    %c0_42 = arith.constant 0 : index
    %c0_43 = arith.constant 0 : index
    %24 = vector.load %arg4[%c0_40, %c1_41, %c0_42, %c0_43] : memref<1x3x8x128xf32, #tpu.memory_space<vmem>>, vector<1x1x8x128xf32>
    tpu.vector_store %arg4[%c0_40, %c1_41, %c0_42, %c0_43], %23 {strides = array<i32>} : memref<1x3x8x128xf32, #tpu.memory_space<vmem>>, vector<1x1x8x128xf32>,
    %c0_44 = arith.constant 0 : index
    %c8 = arith.constant 8 : index
    %c0_45 = arith.constant 0 : index
    %c0_46 = arith.constant 0 : index
    %25 = vector.load %arg3[%c0_44, %c8, %c0_45, %c0_46] : memref<1x12x8x128xf32, #tpu.memory_space<vmem>>, vector<1x1x8x128xf32>
    %26 = arith.mulf %0, %25 : vector<1x1x8x128xf32>
    %c0_47 = arith.constant 0 : index
    %c9 = arith.constant 9 : index
    %c0_48 = arith.constant 0 : index
    %c0_49 = arith.constant 0 : index
    %27 = vector.load %arg3[%c0_47, %c9, %c0_48, %c0_49] : memref<1x12x8x128xf32, #tpu.memory_space<vmem>>, vector<1x1x8x128xf32>
    %28 = arith.mulf %1, %27 : vector<1x1x8x128xf32>
    %29 = arith.addf %26, %28 : vector<1x1x8x128xf32>
    %c0_50 = arith.constant 0 : index
    %c10 = arith.constant 10 : index
    %c0_51 = arith.constant 0 : index
    %c0_52 = arith.constant 0 : index
    %30 = vector.load %arg3[%c0_50, %c10, %c0_51, %c0_52] : memref<1x12x8x128xf32, #tpu.memory_space<vmem>>, vector<1x1x8x128xf32>
    %31 = arith.mulf %2, %30 : vector<1x1x8x128xf32>
    %32 = arith.addf %29, %31 : vector<1x1x8x128xf32>
    %c0_53 = arith.constant 0 : index
    %c11 = arith.constant 11 : index
    %c0_54 = arith.constant 0 : index
    %c0_55 = arith.constant 0 : index
    %33 = vector.load %arg3[%c0_53, %c11, %c0_54, %c0_55] : memref<1x12x8x128xf32, #tpu.memory_space<vmem>>, vector<1x1x8x128xf32>
    %34 = arith.addf %32, %33 : vector<1x1x8x128xf32>
    %c0_56 = arith.constant 0 : index
    %c2_57 = arith.constant 2 : index
    %c0_58 = arith.constant 0 : index
    %c0_59 = arith.constant 0 : index
    %35 = vector.load %arg4[%c0_56, %c2_57, %c0_58, %c0_59] : memref<1x3x8x128xf32, #tpu.memory_space<vmem>>, vector<1x1x8x128xf32>
    tpu.vector_store %arg4[%c0_56, %c2_57, %c0_58, %c0_59], %34 {strides = array<i32>} : memref<1x3x8x128xf32, #tpu.memory_space<vmem>>, vector<1x1x8x128xf32>,
    return
  }
  func.func @transform_0(%arg0: i32, %arg1: i32) -> (i32, i32, i32, i32) {
    %c0_i32 = arith.constant 0 : i32
    %c0_i32_0 = arith.constant 0 : i32
    %c0_i32_1 = arith.constant 0 : i32
    return %arg0, %c0_i32, %arg1, %c0_i32_0 : i32, i32, i32, i32
  }
  func.func @transform_1(%arg0: i32, %arg1: i32) -> (i32, i32, i32, i32) {
    %c0_i32 = arith.constant 0 : i32
    %c0_i32_0 = arith.constant 0 : i32
    %c0_i32_1 = arith.constant 0 : i32
    return %arg0, %c0_i32, %arg1, %c0_i32_0 : i32, i32, i32, i32
  }
  func.func @transform_2(%arg0: i32, %arg1: i32) -> (i32, i32, i32, i32) {
    %c0_i32 = arith.constant 0 : i32
    %c0_i32_0 = arith.constant 0 : i32
    %c0_i32_1 = arith.constant 0 : i32
    return %arg0, %c0_i32, %arg1, %c0_i32_0 : i32, i32, i32, i32
  }
}

</mosaic_0001>

<bundles_post_ra>
// kernel: projective_generator_forward.13
= control target key start
LH: loop header
LB: loop body
LE: loop exit
PB: predicated region body
PF: predicated region fallthrough
CT: control target
= control target key end

     0   :  { %s1189_s18 = smov 0   ;;  %s1459_s0 = inlined_call_operand.vmem [shape: bf16[512,147], index: 0, kind: input, shape index: {}]   ;;  %s1460_s1 = inlined_call_operand.vmem [shape: bf16[147,128], index: 1, kind: input, shape index: {}]   ;;  %s1461_s2 = inlined_call_operand.vmem [shape: f32[1,128], index: 2, kind: input, shape index: {}]   ;;  %s1462_s3 = inlined_call_operand.vmem [shape: f32[512,128], index: 3, kind: output, shape index: {0}]   ;;  %s1463_s4 = inlined_call_operand.vmem [shape: f32[2,8,128], index: 4, kind: output, shape index: {1}]   ;;  %s1464_s5 = inlined_call_operand.vmem [shape: f32[2,8,128], index: 5, kind: output, shape index: {2}]  }
   0x1 LB: > { %s1195_s19 = sadd.s32 4294967295, %s1155_s18   ;;  %p991_p0 = scmp.ge.s32.totalorder %s1155_s18, 1  ;;  %s1155_s18 = sphi %s1189_s18, %s16_s18  }
   0x2   : > { %p194_p1 = scmp.lt.s32.totalorder %s1155_s18, 3 }
   0x4   : > { %p195_p2 = pnand %p991_p0, %p194_p1 }
   0x5   : > { %v1091_v0 = vld [vmem:[%s1460_s1] sm:$0xff] (!%p195_p2)   ;;  %v1157_v1 = vmov (!%p195_p2), 0   ;;  %v1092_v2 = vld [vmem:[%s1460_s1 + $0x8] sm:$0xff] (!%p195_p2)   ;;  %v1093_v3 = vld [vmem:[%s1460_s1 + $0x10] sm:$0xff] (!%p195_p2)   ;;  %s992_s26 = sshll.u32 (!%p195_p2), %s1195_s19, 5  ;;  %vm512_vm0 = vcmask (!%p195_p2), 154624  }
   0x6   : > { %198 = sbr.rel (%p195_p2) target bundleno = 367 (0x16f), region = 32  ;;  %568 = vmatprep.subr.bf16.mxu0 (!%p195_p2), %v1157_v1  ;;  %1061 = vmatprep.subr.bf16.mxu1 (!%p195_p2), %v1157_v1  ;;  %p232_p3 = scmp.lt.s32.totalorder (!%p195_p2), %s992_s26, 63  ;;  %v1094_v4 = vld [vmem:[%s1460_s1 + $0x18] sm:$0xff] (!%p195_p2)   ;;  %v1095_v5 = vld [vmem:[%s1460_s1 + $0x20] sm:$0xff] (!%p195_p2)   ;;  %v1096_v7 = vld [vmem:[%s1460_s1 + $0x28] sm:$0xff] (!%p195_p2)   ;;  %vm561_vm1 = vcmask (!%p195_p2), 1040384  }
   0x7   : > { %569 = vmatpush1.bf16.msra.mxu0 (!%p195_p2), %v1091_v0  ;;  %1071 = vmatpush1.bf16.msra.mxu1 (!%p195_p2), %v1091_v0  ;;  %v1097_v9 = vld [vmem:[%s1460_s1 + $0x30] sm:$0xff] (!%p195_p2)   ;;  %v1098_v10 = vld [vmem:[%s1460_s1 + $0x38] sm:$0xff] (!%p195_p2)   ;;  %vm562_vm2 = vcmask (!%p195_p2), 1041408   ;;  %v1158_v11 = vmov (!%p195_p2), 65535   ;;  %v1099_v13 = vld [vmem:[%s1460_s1 + $0x40] sm:$0xff] (!%p195_p2)   ;;  %p244_p4 = scmp.lt.s32.totalorder (!%p195_p2), %s1195_s19, 1 }
   0x8   : > { %570 = vmatprep.subr.bf16.mxu0 (!%p195_p2), %v1157_v1  ;;  %1062 = vmatprep.subr.bf16.mxu1 (!%p195_p2), %v1157_v1  ;;  %v563_v12 = vsel (!%p195_p2), %vm561_vm1, 4294967295, %v1158_v11  ;;  %v1100_v14 = vld [vmem:[%s1460_s1 + $0x48] ss:$0 sps:$4 sm:$0x33] (!%p195_p2)   ;;  %v1291_v47 = vld [vmem:[%s1461_s2] ss:$0 sm:$0xff] (!%p195_p2) }
   0x9   : > { %v564_v15 = vsel (!%p195_p2), %vm562_vm2, %v563_v12, 0 }
   0xa   : > { %v566_v16 = vand.u32 (!%p195_p2), %v1100_v14, %v564_v15 }
   0xb   : > { %571 = vmatpush1.bf16.msra.mxu0 (!%p195_p2), %v1092_v2  ;;  %1072 = vmatpush1.bf16.msra.mxu1 (!%p195_p2), %v1092_v2 }
   0xc   : > { %572 = vmatprep.subr.bf16.mxu0 (!%p195_p2), %v1157_v1  ;;  %1063 = vmatprep.subr.bf16.mxu1 (!%p195_p2), %v1157_v1 }
   0xd   : > { %s1466_s26 = smov (!%p232_p3, %s992_s26), 63  ;;  %s1468_s19 = smov (!%p244_p4, %s1195_s19), 1 }
   0xe   : > { %s1060_s29 = sshll.u32 %s1466_s26, 3  ;;  %s997_s26 = sshll.u32 %s1468_s19, 3 }
   0xf   : > { %573 = vmatpush1.bf16.msra.mxu0 %v1093_v3  ;;  %1073 = vmatpush1.bf16.msra.mxu1 %v1093_v3  ;;  %s1220_s7 = scalar_lea.vmem %s1459_s0, %s1060_s29  ;;  %s1298_s27 = scalar_lea.vmem %s1462_s3, %s1060_s29 }
  0x10   : > { %574 = vmatprep.subr.bf16.mxu0 %v1157_v1  ;;  %1064 = vmatprep.subr.bf16.mxu1 %v1157_v1  ;;  %v1103_v6 = vld [vmem:[%s1220_s7 + $0x4] ss:$8 sps:$4 sm:$0xff]   ;;  %v1101_v17 = vld [vmem:[%s1220_s7] ss:$8 sps:$4 sm:$0xff]   ;;  %v1104_v19 = vld [vmem:[%s1220_s7 + $0x14] ss:$8 sps:$4 sm:$0xff]   ;;  %s247_s30 = scalar_lea.vmem %s1463_s4, %s997_s26  ;;  %s251_s8 = scalar_lea.vmem %s1464_s5, %s997_s26 }
  0x11   : > { %1042 = vmatprep.mubr.msk.bf16.mxu0 %vm512_vm0, %v1103_v6  ;;  %v1115_v8 = vld [vmem:[%s1220_s7 + $0x84] ss:$8 sps:$4 sm:$0xff]   ;;  %v1113_v18 = vld [vmem:[%s1220_s7 + $0x80] ss:$8 sps:$4 sm:$0xff]   ;;  %v1119_v20 = vld [vmem:[%s1220_s7 + $0x94] ss:$8 sps:$4 sm:$0xff]  }
  0x12   : > { %1050 = vmatprep.mubr.msk.bf16.mxu1 %vm512_vm0, %v1115_v8  ;;  %v1106_v21 = vld [vmem:[%s1220_s7 + $0x10] ss:$8 sps:$4 sm:$0xff]   ;;  %v1107_v23 = vld [vmem:[%s1220_s7 + $0x24] ss:$8 sps:$4 sm:$0xff]   ;;  %v1109_v25 = vld [vmem:[%s1220_s7 + $0x20] ss:$8 sps:$4 sm:$0xff]  }
  0x13   : > { %575 = vmatpush1.bf16.msra.mxu0 %v1094_v4  ;;  %1074 = vmatpush1.bf16.msra.mxu1 %v1094_v4  ;;  %v1121_v22 = vld [vmem:[%s1220_s7 + $0x90] ss:$8 sps:$4 sm:$0xff]   ;;  %v1125_v24 = vld [vmem:[%s1220_s7 + $0xa4] ss:$8 sps:$4 sm:$0xff]   ;;  %v1127_v26 = vld [vmem:[%s1220_s7 + $0xa0] ss:$8 sps:$4 sm:$0xff]  }
  0x14   : > { %576 = vmatprep.subr.bf16.mxu0 %v1157_v1  ;;  %1065 = vmatprep.subr.bf16.mxu1 %v1157_v1  ;;  %v1110_v27 = vld [vmem:[%s1220_s7 + $0x34] ss:$8 sps:$4 sm:$0xff]   ;;  %v1112_v29 = vld [vmem:[%s1220_s7 + $0x30] ss:$8 sps:$4 sm:$0xff]   ;;  %v1116_v31 = vld [vmem:[%s1220_s7 + $0x44] ss:$8 sps:$4 sm:$0xff]  }
  0x15   : > { %v1131_v28 = vld [vmem:[%s1220_s7 + $0xb4] ss:$8 sps:$4 sm:$0xff]   ;;  %v1133_v30 = vld [vmem:[%s1220_s7 + $0xb0] ss:$8 sps:$4 sm:$0xff]   ;;  %v1137_v32 = vld [vmem:[%s1220_s7 + $0xc4] ss:$8 sps:$4 sm:$0xff]  }
  0x16   : > { %v1118_v33 = vld [vmem:[%s1220_s7 + $0x40] ss:$8 sps:$4 sm:$0xff]   ;;  %v1122_v35 = vld [vmem:[%s1220_s7 + $0x54] ss:$8 sps:$4 sm:$0xff]   ;;  %v1124_v37 = vld [vmem:[%s1220_s7 + $0x50] ss:$8 sps:$4 sm:$0xff]  }
  0x17   : > { %577 = vmatpush1.bf16.msra.mxu0 %v1095_v5  ;;  %1075 = vmatpush1.bf16.msra.mxu1 %v1095_v5  ;;  %v1139_v34 = vld [vmem:[%s1220_s7 + $0xc0] ss:$8 sps:$4 sm:$0xff]   ;;  %v1140_v36 = vld [vmem:[%s1220_s7 + $0xd4] ss:$8 sps:$4 sm:$0xff]   ;;  %v1142_v38 = vld [vmem:[%s1220_s7 + $0xd0] ss:$8 sps:$4 sm:$0xff]  }
  0x18   : > { %578 = vmatprep.subr.bf16.mxu0 %v1157_v1  ;;  %1066 = vmatprep.subr.bf16.mxu1 %v1157_v1  ;;  %v1128_v39 = vld [vmem:[%s1220_s7 + $0x64] ss:$8 sps:$4 sm:$0xff]   ;;  %v1130_v41 = vld [vmem:[%s1220_s7 + $0x60] ss:$8 sps:$4 sm:$0xff]   ;;  %v1134_v43 = vld [vmem:[%s1220_s7 + $0x74] ss:$8 sps:$4 sm:$0xff]  }
  0x19   : > { %v1143_v40 = vld [vmem:[%s1220_s7 + $0xe4] ss:$8 sps:$4 sm:$0xff]   ;;  %v1145_v42 = vld [vmem:[%s1220_s7 + $0xe0] ss:$8 sps:$4 sm:$0xff]   ;;  %v1146_v44 = vld [vmem:[%s1220_s7 + $0xf4] ss:$8 sps:$4 sm:$0xff]  }
  0x1a   : > { %v1136_v45 = vld [vmem:[%s1220_s7 + $0x70] ss:$8 sps:$4 sm:$0xff]  }
  0x1b   : > { %579 = vmatpush1.bf16.msra.mxu0 %v1096_v7  ;;  %1076 = vmatpush1.bf16.msra.mxu1 %v1096_v7  ;;  %v1148_v46 = vld [vmem:[%s1220_s7 + $0xf0] ss:$8 sps:$4 sm:$0xff]  }
  0x1c   : > { %580 = vmatprep.subr.bf16.mxu0 %v1157_v1  ;;  %1067 = vmatprep.subr.bf16.mxu1 %v1157_v1 }
  0x1f   : > { %581 = vmatpush1.bf16.msra.mxu0 %v1097_v9  ;;  %1077 = vmatpush1.bf16.msra.mxu1 %v1097_v9 }
  0x20   : > { %582 = vmatprep.subr.bf16.mxu0 %v1157_v1  ;;  %1068 = vmatprep.subr.bf16.mxu1 %v1157_v1 }
  0x23   : > { %583 = vmatpush1.bf16.msra.mxu0 %v1098_v10  ;;  %1078 = vmatpush1.bf16.msra.mxu1 %v1098_v10 }
  0x24   : > { %584 = vmatprep.subr.bf16.mxu0 %v1157_v1  ;;  %1069 = vmatprep.subr.bf16.mxu1 %v1157_v1 }
  0x27   : > { %585 = vmatpush1.bf16.msra.mxu0 %v1099_v13  ;;  %1079 = vmatpush1.bf16.msra.mxu1 %v1099_v13 }
  0x28   : > { %586 = vmatprep.subr.bf16.mxu0 %v1157_v1  ;;  %1070 = vmatprep.subr.bf16.mxu1 %v1157_v1 }
  0x2b   : > { %587 = vmatpush1.bf16.msra.mxu0 %v566_v16  ;;  %1080 = vmatpush1.bf16.msra.mxu1 %v566_v16 }
  0x2e   : > { %601 = vmatmul.mubr.bf16.vlgmr.msra.gmra.mrb[0].mxu0 %v1101_v17  ;;  %665 = vmatmul.mubr.bf16.vlgmr.msra.gmra.mrb[0].mxu1 %v1113_v18 }
  0x2f   : > { %1043 = vmatprep.mubr.msk.bf16.mxu0 %vm512_vm0, %v1104_v19  ;;  %1051 = vmatprep.mubr.msk.bf16.mxu1 %vm512_vm0, %v1119_v20 }
  0x36   : > { %609 = vmatmul.mubr.bf16.gmra.mrb[4].mxu0 %v1106_v21  ;;  %673 = vmatmul.mubr.bf16.gmra.mrb[4].mxu1 %v1121_v22 }
  0x37   : > { %1044 = vmatprep.mubr.msk.bf16.mxu0 %vm512_vm0, %v1107_v23  ;;  %1052 = vmatprep.mubr.msk.bf16.mxu1 %vm512_vm0, %v1125_v24 }
  0x3e   : > { %617 = vmatmul.mubr.bf16.gmra.mrb[8].mxu0 %v1109_v25  ;;  %681 = vmatmul.mubr.bf16.gmra.mrb[8].mxu1 %v1127_v26 }
  0x3f   : > { %1045 = vmatprep.mubr.msk.bf16.mxu0 %vm512_vm0, %v1110_v27  ;;  %1053 = vmatprep.mubr.msk.bf16.mxu1 %vm512_vm0, %v1131_v28 }
  0x46   : > { %625 = vmatmul.mubr.bf16.gmra.mrb[12].mxu0 %v1112_v29  ;;  %689 = vmatmul.mubr.bf16.gmra.mrb[12].mxu1 %v1133_v30 }
  0x47   : > { %1046 = vmatprep.mubr.msk.bf16.mxu0 %vm512_vm0, %v1116_v31  ;;  %1054 = vmatprep.mubr.msk.bf16.mxu1 %vm512_vm0, %v1137_v32 }
  0x4e   : > { %633 = vmatmul.mubr.bf16.gmra.mrb[16].mxu0 %v1118_v33  ;;  %697 = vmatmul.mubr.bf16.gmra.mrb[16].mxu1 %v1139_v34 }
  0x4f   : > { %1047 = vmatprep.mubr.msk.bf16.mxu0 %vm512_vm0, %v1122_v35  ;;  %1055 = vmatprep.mubr.msk.bf16.mxu1 %vm512_vm0, %v1140_v36 }
  0x56   : > { %641 = vmatmul.mubr.bf16.gmra.mrb[20].mxu0 %v1124_v37  ;;  %705 = vmatmul.mubr.bf16.gmra.mrb[20].mxu1 %v1142_v38 }
  0x57   : > { %1048 = vmatprep.mubr.msk.bf16.mxu0 %vm512_vm0, %v1128_v39  ;;  %1056 = vmatprep.mubr.msk.bf16.mxu1 %vm512_vm0, %v1143_v40 }
  0x5e   : > { %649 = vmatmul.mubr.bf16.gmra.mrb[24].mxu0 %v1130_v41  ;;  %713 = vmatmul.mubr.bf16.gmra.mrb[24].mxu1 %v1145_v42 }
  0x5f   : > { %1049 = vmatprep.mubr.msk.bf16.mxu0 %vm512_vm0, %v1134_v43  ;;  %1057 = vmatprep.mubr.msk.bf16.mxu1 %vm512_vm0, %v1146_v44 }
  0x66   : > { %657 = vmatmul.mubr.bf16.gmra.mrb[28].mxu0 %v1136_v45  ;;  %721 = vmatmul.mubr.bf16.gmra.mrb[28].mxu1 %v1148_v46 }
 0x101   : > { %v602_v48 = vpop.f32.mrb[0].mxu0  ;;  %v666_v49 = vpop.f32.mrb[0].mxu1 }
 0x102   : > { %v603_v50 = vadd.f32 %v1291_v47, %v602_v48  ;;  %v604_v51 = vpop.f32.mrb[1].mxu0  ;;  %v1302_v52 = vadd.f32 %v1291_v47, %v666_v49  ;;  %v668_v53 = vpop.f32.mrb[1].mxu1 }
 0x103   : > { %v605_v54 = vpop.f32.mrb[2].mxu0  ;;  %v669_v55 = vpop.f32.mrb[2].mxu1 }
 0x104   : > { %729 = vst [vmem:[%s1298_s27] sm:$0xff] %v603_v50  ;;  %v606_v56 = vadd.f32 %v1291_v47, %v605_v54  ;;  %v607_v57 = vpop.f32.mrb[3].mxu0  ;;  %745 = vst [vmem:[%s1298_s27 + $0x80] sm:$0xff] %v1302_v52  ;;  %v1309_v58 = vadd.f32 %v1291_v47, %v669_v55  ;;  %v671_v59 = vpop.f32.mrb[3].mxu1  ;;  %v798_v60 = vmul.f32 %v603_v50, %v603_v50 }
 0x106   : > { %730 = vst [vmem:[%s1298_s27 + $0x8] sm:$0xff] %v606_v56  ;;  %v761_v61 = vadd.f32 %v606_v56, %v603_v50  ;;  %v799_v62 = vmul.f32 %v606_v56, %v606_v56  ;;  %746 = vst [vmem:[%s1298_s27 + $0x88] sm:$0xff] %v1309_v58 }
 0x108   : > { %v830_v63 = vadd.f32 %v799_v62, %v798_v60 }
 0x109   : > { %v610_v0 = vpop.f32.mrb[4].mxu0  ;;  %v674_v1 = vpop.f32.mrb[4].mxu1 }
 0x10a   : > { %v611_v2 = vadd.f32 %v1291_v47, %v610_v0  ;;  %v612_v3 = vpop.f32.mrb[5].mxu0  ;;  %v1316_v4 = vadd.f32 %v1291_v47, %v674_v1  ;;  %v676_v5 = vpop.f32.mrb[5].mxu1 }
 0x10b   : > { %v613_v6 = vpop.f32.mrb[6].mxu0  ;;  %v677_v7 = vpop.f32.mrb[6].mxu1 }
 0x10c   : > { %731 = vst [vmem:[%s1298_s27 + $0x10] sm:$0xff] %v611_v2  ;;  %v762_v8 = vadd.f32 %v761_v61, %v611_v2  ;;  %v800_v9 = vmul.f32 %v611_v2, %v611_v2  ;;  %v614_v10 = vadd.f32 %v1291_v47, %v613_v6  ;;  %v615_v11 = vpop.f32.mrb[7].mxu0  ;;  %747 = vst [vmem:[%s1298_s27 + $0x90] sm:$0xff] %v1316_v4  ;;  %v679_v12 = vpop.f32.mrb[7].mxu1 }
 0x10d   : > { %v1323_v13 = vadd.f32 %v1291_v47, %v677_v7 }
 0x10e   : > { %v831_v14 = vadd.f32 %v830_v63, %v800_v9  ;;  %732 = vst [vmem:[%s1298_s27 + $0x18] sm:$0xff] %v614_v10  ;;  %v763_v15 = vadd.f32 %v762_v8, %v614_v10  ;;  %v801_v16 = vmul.f32 %v614_v10, %v614_v10 }
 0x10f   : > { %748 = vst [vmem:[%s1298_s27 + $0x98] sm:$0xff] %v1323_v13 }
 0x110   : > { %v832_v17 = vadd.f32 %v831_v14, %v801_v16 }
 0x111   : > { %v618_v18 = vpop.f32.mrb[8].mxu0  ;;  %v682_v19 = vpop.f32.mrb[8].mxu1 }
 0x112   : > { %v619_v20 = vadd.f32 %v1291_v47, %v618_v18  ;;  %v620_v21 = vpop.f32.mrb[9].mxu0  ;;  %v1330_v22 = vadd.f32 %v1291_v47, %v682_v19  ;;  %v684_v23 = vpop.f32.mrb[9].mxu1 }
 0x113   : > { %v621_v24 = vpop.f32.mrb[10].mxu0  ;;  %v685_v25 = vpop.f32.mrb[10].mxu1 }
 0x114   : > { %733 = vst [vmem:[%s1298_s27 + $0x20] sm:$0xff] %v619_v20  ;;  %v764_v26 = vadd.f32 %v763_v15, %v619_v20  ;;  %v802_v27 = vmul.f32 %v619_v20, %v619_v20  ;;  %v622_v28 = vadd.f32 %v1291_v47, %v621_v24  ;;  %v623_v29 = vpop.f32.mrb[11].mxu0  ;;  %749 = vst [vmem:[%s1298_s27 + $0xa0] sm:$0xff] %v1330_v22  ;;  %v687_v30 = vpop.f32.mrb[11].mxu1 }
 0x115   : > { %v1337_v31 = vadd.f32 %v1291_v47, %v685_v25 }
 0x116   : > { %v833_v32 = vadd.f32 %v832_v17, %v802_v27  ;;  %734 = vst [vmem:[%s1298_s27 + $0x28] sm:$0xff] %v622_v28  ;;  %v765_v33 = vadd.f32 %v764_v26, %v622_v28  ;;  %v803_v34 = vmul.f32 %v622_v28, %v622_v28 }
 0x117   : > { %750 = vst [vmem:[%s1298_s27 + $0xa8] sm:$0xff] %v1337_v31 }
 0x118   : > { %v834_v35 = vadd.f32 %v833_v32, %v803_v34 }
 0x119   : > { %v626_v36 = vpop.f32.mrb[12].mxu0  ;;  %v690_v37 = vpop.f32.mrb[12].mxu1 }
 0x11a   : > { %v627_v38 = vadd.f32 %v1291_v47, %v626_v36  ;;  %v628_v39 = vpop.f32.mrb[13].mxu0  ;;  %v1344_v40 = vadd.f32 %v1291_v47, %v690_v37  ;;  %v692_v41 = vpop.f32.mrb[13].mxu1 }
 0x11b   : > { %v629_v42 = vpop.f32.mrb[14].mxu0  ;;  %v693_v43 = vpop.f32.mrb[14].mxu1 }
 0x11c   : > { %735 = vst [vmem:[%s1298_s27 + $0x30] sm:$0xff] %v627_v38  ;;  %v766_v44 = vadd.f32 %v765_v33, %v627_v38  ;;  %v804_v45 = vmul.f32 %v627_v38, %v627_v38  ;;  %v630_v46 = vadd.f32 %v1291_v47, %v629_v42  ;;  %v631_v48 = vpop.f32.mrb[15].mxu0  ;;  %751 = vst [vmem:[%s1298_s27 + $0xb0] sm:$0xff] %v1344_v40  ;;  %v695_v49 = vpop.f32.mrb[15].mxu1 }
 0x11d   : > { %v1351_v50 = vadd.f32 %v1291_v47, %v693_v43 }
 0x11e   : > { %v835_v51 = vadd.f32 %v834_v35, %v804_v45  ;;  %736 = vst [vmem:[%s1298_s27 + $0x38] sm:$0xff] %v630_v46  ;;  %v767_v53 = vadd.f32 %v766_v44, %v630_v46  ;;  %v805_v54 = vmul.f32 %v630_v46, %v630_v46 }
 0x11f   : > { %752 = vst [vmem:[%s1298_s27 + $0xb8] sm:$0xff] %v1351_v50 }
 0x120   : > { %v836_v55 = vadd.f32 %v835_v51, %v805_v54 }
 0x121   : > { %v634_v56 = vpop.f32.mrb[16].mxu0  ;;  %v698_v57 = vpop.f32.mrb[16].mxu1 }
 0x122   : > { %v635_v59 = vadd.f32 %v1291_v47, %v634_v56  ;;  %v636_v60 = vpop.f32.mrb[17].mxu0  ;;  %v1358_v61 = vadd.f32 %v1291_v47, %v698_v57  ;;  %v700_v62 = vpop.f32.mrb[17].mxu1 }
 0x123   : > { %v637_v63 = vpop.f32.mrb[18].mxu0  ;;  %v701_v0 = vpop.f32.mrb[18].mxu1 }
 0x124   : > { %737 = vst [vmem:[%s1298_s27 + $0x40] sm:$0xff] %v635_v59  ;;  %v768_v1 = vadd.f32 %v767_v53, %v635_v59  ;;  %v806_v2 = vmul.f32 %v635_v59, %v635_v59  ;;  %v638_v3 = vadd.f32 %v1291_v47, %v637_v63  ;;  %v639_v5 = vpop.f32.mrb[19].mxu0  ;;  %753 = vst [vmem:[%s1298_s27 + $0xc0] sm:$0xff] %v1358_v61  ;;  %v703_v6 = vpop.f32.mrb[19].mxu1 }
 0x125   : > { %v1365_v7 = vadd.f32 %v1291_v47, %v701_v0 }
 0x126   : > { %v837_v8 = vadd.f32 %v836_v55, %v806_v2  ;;  %738 = vst [vmem:[%s1298_s27 + $0x48] sm:$0xff] %v638_v3  ;;  %v769_v9 = vadd.f32 %v768_v1, %v638_v3  ;;  %v807_v10 = vmul.f32 %v638_v3, %v638_v3 }
 0x127   : > { %754 = vst [vmem:[%s1298_s27 + $0xc8] sm:$0xff] %v1365_v7 }
 0x128   : > { %v838_v11 = vadd.f32 %v837_v8, %v807_v10 }
 0x129   : > { %v642_v12 = vpop.f32.mrb[20].mxu0  ;;  %v706_v14 = vpop.f32.mrb[20].mxu1 }
 0x12a   : > { %v643_v15 = vadd.f32 %v1291_v47, %v642_v12  ;;  %v644_v16 = vpop.f32.mrb[21].mxu0  ;;  %v1372_v17 = vadd.f32 %v1291_v47, %v706_v14  ;;  %v708_v18 = vpop.f32.mrb[21].mxu1  ;;  %v814_v12 = vmul.f32 %v1302_v52, %v1302_v52 }
 0x12b   : > { %v645_v19 = vpop.f32.mrb[22].mxu0  ;;  %v709_v20 = vpop.f32.mrb[22].mxu1  ;;  %v815_v16 = vmul.f32 %v1309_v58, %v1309_v58 }
 0x12c   : > { %739 = vst [vmem:[%s1298_s27 + $0x50] sm:$0xff] %v643_v15  ;;  %v770_v21 = vadd.f32 %v769_v9, %v643_v15  ;;  %v808_v23 = vmul.f32 %v643_v15, %v643_v15  ;;  %v646_v24 = vadd.f32 %v1291_v47, %v645_v19  ;;  %v647_v25 = vpop.f32.mrb[23].mxu0  ;;  %755 = vst [vmem:[%s1298_s27 + $0xd0] sm:$0xff] %v1372_v17  ;;  %v711_v26 = vpop.f32.mrb[23].mxu1 }
 0x12d   : > { %v1379_v27 = vadd.f32 %v1291_v47, %v709_v20 }
 0x12e   : > { %v839_v28 = vadd.f32 %v838_v11, %v808_v23  ;;  %740 = vst [vmem:[%s1298_s27 + $0x58] sm:$0xff] %v646_v24  ;;  %v771_v29 = vadd.f32 %v770_v21, %v646_v24  ;;  %v809_v30 = vmul.f32 %v646_v24, %v646_v24  ;;  %v817_v23 = vmul.f32 %v1323_v13, %v1323_v13 }
 0x12f   : > { %756 = vst [vmem:[%s1298_s27 + $0xd8] sm:$0xff] %v1379_v27 }
 0x130   : > { %v840_v32 = vadd.f32 %v839_v28, %v809_v30 }
 0x131   : > { %v650_v33 = vpop.f32.mrb[24].mxu0  ;;  %v714_v34 = vpop.f32.mrb[24].mxu1 }
 0x132   : > { %v651_v35 = vadd.f32 %v1291_v47, %v650_v33  ;;  %v652_v36 = vpop.f32.mrb[25].mxu0  ;;  %v1386_v37 = vadd.f32 %v1291_v47, %v714_v34  ;;  %v716_v38 = vpop.f32.mrb[25].mxu1 }
 0x133   : > { %v653_v39 = vpop.f32.mrb[26].mxu0  ;;  %v717_v41 = vpop.f32.mrb[26].mxu1  ;;  %v822_v36 = vmul.f32 %v1358_v61, %v1358_v61 }
 0x134   : > { %741 = vst [vmem:[%s1298_s27 + $0x60] sm:$0xff] %v651_v35  ;;  %v772_v42 = vadd.f32 %v771_v29, %v651_v35  ;;  %v810_v43 = vmul.f32 %v651_v35, %v651_v35  ;;  %v654_v44 = vadd.f32 %v1291_v47, %v653_v39  ;;  %v655_v45 = vpop.f32.mrb[27].mxu0  ;;  %757 = vst [vmem:[%s1298_s27 + $0xe0] sm:$0xff] %v1386_v37  ;;  %v719_v46 = vpop.f32.mrb[27].mxu1 }
 0x135   : > { %v1393_v48 = vadd.f32 %v1291_v47, %v717_v41  ;;  %v823_v41 = vmul.f32 %v1365_v7, %v1365_v7 }
 0x136   : > { %v841_v49 = vadd.f32 %v840_v32, %v810_v43  ;;  %742 = vst [vmem:[%s1298_s27 + $0x68] sm:$0xff] %v654_v44  ;;  %v773_v51 = vadd.f32 %v772_v42, %v654_v44  ;;  %v811_v53 = vmul.f32 %v654_v44, %v654_v44 }
 0x137   : > { %758 = vst [vmem:[%s1298_s27 + $0xe8] sm:$0xff] %v1393_v48 }
 0x138   : > { %v842_v54 = vadd.f32 %v841_v49, %v811_v53  ;;  %v827_v53 = vmul.f32 %v1393_v48, %v1393_v48 }
 0x139   : > { %v658_v55 = vpop.f32.mrb[28].mxu0  ;;  %v722_v56 = vpop.f32.mrb[28].mxu1 }
 0x13a   : > { %v659_v57 = vadd.f32 %v1291_v47, %v658_v55  ;;  %v660_v59 = vpop.f32.mrb[29].mxu0  ;;  %v723_v60 = vadd.f32 %v1291_v47, %v722_v56  ;;  %v724_v62 = vpop.f32.mrb[29].mxu1 }
 0x13b   : > { %v661_v63 = vpop.f32.mrb[30].mxu0  ;;  %v725_v0 = vpop.f32.mrb[30].mxu1 }
 0x13c   : > { %743 = vst [vmem:[%s1298_s27 + $0x70] sm:$0xff] %v659_v57  ;;  %v774_v1 = vadd.f32 %v773_v51, %v659_v57  ;;  %v812_v2 = vmul.f32 %v659_v57, %v659_v57  ;;  %v662_v3 = vadd.f32 %v1291_v47, %v661_v63  ;;  %v663_v5 = vpop.f32.mrb[31].mxu0  ;;  %759 = vst [vmem:[%s1298_s27 + $0xf0] sm:$0xff] %v723_v60  ;;  %v727_v6 = vpop.f32.mrb[31].mxu1 }
 0x13d   : > { %v726_v8 = vadd.f32 %v1291_v47, %v725_v0  ;;  %v816_v47 = vmul.f32 %v1316_v4, %v1316_v4 }
 0x13e   : > { %v843_v9 = vadd.f32 %v842_v54, %v812_v2  ;;  %744 = vst [vmem:[%s1298_s27 + $0x78] sm:$0xff] %v662_v3  ;;  %v775_v10 = vadd.f32 %v774_v1, %v662_v3  ;;  %v813_v11 = vmul.f32 %v662_v3, %v662_v3 }
 0x13f   : > { %760 = vst [vmem:[%s1298_s27 + $0xf8] sm:$0xff] %v726_v8 }
 0x140   : > { %v776_v14 = vadd.f32 %v775_v10, %v1302_v52  ;;  %v844_v15 = vadd.f32 %v843_v9, %v813_v11  ;;  %v818_v52 = vmul.f32 %v1330_v22, %v1330_v22 }
 0x142   : > { %v777_v18 = vadd.f32 %v776_v14, %v1309_v58  ;;  %v845_v19 = vadd.f32 %v844_v15, %v814_v12  ;;  %v819_v58 = vmul.f32 %v1337_v31, %v1337_v31 }
 0x144   : > { %v778_v20 = vadd.f32 %v777_v18, %v1316_v4  ;;  %v846_v21 = vadd.f32 %v845_v19, %v815_v16  ;;  %v820_v4 = vmul.f32 %v1344_v40, %v1344_v40 }
 0x146   : > { %v779_v24 = vadd.f32 %v778_v20, %v1323_v13  ;;  %v847_v25 = vadd.f32 %v846_v21, %v816_v47  ;;  %v821_v13 = vmul.f32 %v1351_v50, %v1351_v50 }
 0x148   : > { %v848_v26 = vadd.f32 %v847_v25, %v817_v23  ;;  %v780_v28 = vadd.f32 %v779_v24, %v1330_v22 }
 0x14a   : > { %v781_v29 = vadd.f32 %v780_v28, %v1337_v31  ;;  %v849_v30 = vadd.f32 %v848_v26, %v818_v52 }
 0x14c   : > { %v782_v32 = vadd.f32 %v781_v29, %v1344_v40  ;;  %v850_v33 = vadd.f32 %v849_v30, %v819_v58 }
 0x14e   : > { %v783_v34 = vadd.f32 %v782_v32, %v1351_v50  ;;  %v851_v35 = vadd.f32 %v850_v33, %v820_v4  ;;  %v824_v50 = vmul.f32 %v1372_v17, %v1372_v17 }
 0x150   : > { %v784_v22 = vadd.f32 %v783_v34, %v1358_v61  ;;  %v852_v38 = vadd.f32 %v851_v35, %v821_v13  ;;  %v825_v61 = vmul.f32 %v1379_v27, %v1379_v27 }
 0x152   : > { %v853_v31 = vadd.f32 %v852_v38, %v822_v36  ;;  %v785_v39 = vadd.f32 %v784_v22, %v1365_v7  ;;  %v826_v7 = vmul.f32 %v1386_v37, %v1386_v37 }
 0x154   : > { %v854_v40 = vadd.f32 %v853_v31, %v823_v41  ;;  %v786_v42 = vadd.f32 %v785_v39, %v1372_v17  ;;  %v828_v17 = vmul.f32 %v723_v60, %v723_v60 }
 0x156   : > { %v855_v43 = vadd.f32 %v854_v40, %v824_v50  ;;  %v787_v44 = vadd.f32 %v786_v42, %v1379_v27  ;;  %v829_v27 = vmul.f32 %v726_v8, %v726_v8 }
 0x158   : > { %v856_v45 = vadd.f32 %v855_v43, %v825_v61  ;;  %v788_v46 = vadd.f32 %v787_v44, %v1386_v37 }
 0x15a   : > { %v857_v49 = vadd.f32 %v856_v45, %v826_v7  ;;  %v789_v51 = vadd.f32 %v788_v46, %v1393_v48 }
 0x15c   : > { %v858_v54 = vadd.f32 %v857_v49, %v827_v53  ;;  %v790_v55 = vadd.f32 %v789_v51, %v723_v60 }
 0x15e   : > { %v859_v56 = vadd.f32 %v858_v54, %v828_v17  ;;  %v791_v57 = vadd.f32 %v790_v55, %v726_v8 }
 0x160   : > { %v792_v59 = vrot.slane %v791_v57, 4  ;;  %v860_v62 = vadd.f32 %v859_v56, %v829_v27 }
 0x162   : > { %v793_v63 = vadd.f32 %v792_v59, %v791_v57  ;;  %v861_v0 = vrot.slane %v860_v62, 4 }
 0x164   : > { %v794_v1 = vrot.slane %v793_v63, 2  ;;  %v862_v37 = vadd.f32 %v861_v0, %v860_v62 }
 0x166   : > { %v795_v2 = vadd.f32 %v794_v1, %v793_v63  ;;  %v863_v3 = vrot.slane %v862_v37, 2 }
 0x168   : > { %v796_v5 = vrot.slane %v795_v2, 1  ;;  %v864_v6 = vadd.f32 %v863_v3, %v862_v37 }
 0x16a   : > { %v797_v48 = vadd.f32 %v796_v5, %v795_v2  ;;  %v865_v60 = vrot.slane %v864_v6, 1 }
 0x16c   : > { %v866_v8 = vadd.f32 %v865_v60, %v864_v6  ;;  %867 = vst [vmem:[%s247_s30] sm:$0xff] %v797_v48 }
 0x16e   : > { %868 = vst [vmem:[%s251_s8] sm:$0xff] %v866_v8 }
 0x16f PF: > { %s16_s18 = sadd.s32 1, %s1155_s18  }
 0x170   : > { %p13_p5 = scmp.ge.s32.totalorder %s16_s18, 4  }
 0x172   :  { %15 = sbr.rel (!%p13_p5) target bundleno = 1 (0x1), region = 86 }

// kernel: projective_generator_forward.14
= control target key start
LH: loop header
LB: loop body
LE: loop exit
PB: predicated region body
PF: predicated region fallthrough
CT: control target
= control target key end

     0   :  { %v481_v0 = vmov 0   ;;  %vm185_vm0 = vcmask 130048   ;;  %s688_s1 = inlined_call_operand.vmem [shape: bf16[144,128], index: 1, kind: input, shape index: {}]   ;;  %s689_s0 = inlined_call_operand.vmem [shape: bf16[128,144], index: 0, kind: input, shape index: {}]   ;;  %s690_s2 = inlined_call_operand.vmem [shape: f32[1,128], index: 2, kind: input, shape index: {}]   ;;  %s691_s3 = inlined_call_operand.vmem [shape: f32[128,128], index: 3, kind: output, shape index: {0}]   ;;  %s692_s4 = inlined_call_operand.vmem [shape: f32[1,8,128], index: 4, kind: output, shape index: {1}]   ;;  %s693_s5 = inlined_call_operand.vmem [shape: f32[1,8,128], index: 5, kind: output, shape index: {2}]  }
   0x1   :  { %210 = vmatprep.subr.bf16.mxu0 %v481_v0  ;;  %v448_v1 = vld [vmem:[%s688_s1] sm:$0xff]   ;;  %429 = vmatprep.subr.bf16.mxu1 %v481_v0  ;;  %v449_v2 = vld [vmem:[%s688_s1 + $0x8] sm:$0xff]   ;;  %v450_v3 = vld [vmem:[%s688_s1 + $0x10] sm:$0xff]  }
   0x2   :  { %211 = vmatpush1.bf16.msra.mxu0 %v448_v1  ;;  %438 = vmatpush1.bf16.msra.mxu1 %v448_v1  ;;  %v451_v4 = vld [vmem:[%s688_s1 + $0x18] sm:$0xff]   ;;  %v459_v5 = vld [vmem:[%s689_s0 + $0x4] ss:$8 sps:$4 sm:$0xff]   ;;  %v454_v9 = vld [vmem:[%s688_s1 + $0x30] sm:$0xff]  }
   0x3   :  { %212 = vmatprep.subr.bf16.mxu0 %v481_v0  ;;  %430 = vmatprep.subr.bf16.mxu1 %v481_v0  ;;  %v465_v6 = vld [vmem:[%s689_s0 + $0x44] ss:$8 sps:$4 sm:$0xff]   ;;  %v455_v10 = vld [vmem:[%s688_s1 + $0x38] sm:$0xff]   ;;  %v457_v12 = vld [vmem:[%s689_s0] ss:$8 sps:$4 sm:$0xff]  }
   0x4   :  { %421 = vmatprep.mubr.msk.bf16.mxu0 %vm185_vm0, %v459_v5  ;;  %v452_v7 = vld [vmem:[%s688_s1 + $0x20] sm:$0xff]   ;;  %425 = vmatprep.mubr.msk.bf16.mxu1 %vm185_vm0, %v465_v6  ;;  %v453_v8 = vld [vmem:[%s688_s1 + $0x28] sm:$0xff]   ;;  %v460_v14 = vld [vmem:[%s689_s0 + $0x14] ss:$8 sps:$4 sm:$0xff]  }
   0x5   :  { %v456_v11 = vld [vmem:[%s688_s1 + $0x40] sm:$0xff]   ;;  %v469_v15 = vld [vmem:[%s689_s0 + $0x54] ss:$8 sps:$4 sm:$0xff]   ;;  %v462_v16 = vld [vmem:[%s689_s0 + $0x10] ss:$8 sps:$4 sm:$0xff]  }
   0x6   :  { %213 = vmatpush1.bf16.msra.mxu0 %v449_v2  ;;  %439 = vmatpush1.bf16.msra.mxu1 %v449_v2  ;;  %v463_v13 = vld [vmem:[%s689_s0 + $0x40] ss:$8 sps:$4 sm:$0xff]   ;;  %v471_v17 = vld [vmem:[%s689_s0 + $0x50] ss:$8 sps:$4 sm:$0xff]   ;;  %v466_v18 = vld [vmem:[%s689_s0 + $0x24] ss:$8 sps:$4 sm:$0xff]  }
   0x7   :  { %214 = vmatprep.subr.bf16.mxu0 %v481_v0  ;;  %431 = vmatprep.subr.bf16.mxu1 %v481_v0  ;;  %v475_v19 = vld [vmem:[%s689_s0 + $0x64] ss:$8 sps:$4 sm:$0xff]   ;;  %v468_v20 = vld [vmem:[%s689_s0 + $0x20] ss:$8 sps:$4 sm:$0xff]   ;;  %v472_v22 = vld [vmem:[%s689_s0 + $0x34] ss:$8 sps:$4 sm:$0xff]  }
   0x8   :  { %v477_v21 = vld [vmem:[%s689_s0 + $0x60] ss:$8 sps:$4 sm:$0xff]   ;;  %v478_v23 = vld [vmem:[%s689_s0 + $0x74] ss:$8 sps:$4 sm:$0xff]   ;;  %v474_v24 = vld [vmem:[%s689_s0 + $0x30] ss:$8 sps:$4 sm:$0xff]  }
   0x9   :  { %v480_v25 = vld [vmem:[%s689_s0 + $0x70] ss:$8 sps:$4 sm:$0xff]   ;;  %v598_v26 = vld [vmem:[%s690_s2] ss:$0 sm:$0xff] }
   0xa   :  { %215 = vmatpush1.bf16.msra.mxu0 %v450_v3  ;;  %440 = vmatpush1.bf16.msra.mxu1 %v450_v3 }
   0xb   :  { %216 = vmatprep.subr.bf16.mxu0 %v481_v0  ;;  %432 = vmatprep.subr.bf16.mxu1 %v481_v0 }
   0xe   :  { %217 = vmatpush1.bf16.msra.mxu0 %v451_v4  ;;  %441 = vmatpush1.bf16.msra.mxu1 %v451_v4 }
   0xf   :  { %218 = vmatprep.subr.bf16.mxu0 %v481_v0  ;;  %433 = vmatprep.subr.bf16.mxu1 %v481_v0 }
  0x12   :  { %219 = vmatpush1.bf16.msra.mxu0 %v452_v7  ;;  %442 = vmatpush1.bf16.msra.mxu1 %v452_v7 }
  0x13   :  { %220 = vmatprep.subr.bf16.mxu0 %v481_v0  ;;  %434 = vmatprep.subr.bf16.mxu1 %v481_v0 }
  0x16   :  { %221 = vmatpush1.bf16.msra.mxu0 %v453_v8  ;;  %443 = vmatpush1.bf16.msra.mxu1 %v453_v8 }
  0x17   :  { %222 = vmatprep.subr.bf16.mxu0 %v481_v0  ;;  %435 = vmatprep.subr.bf16.mxu1 %v481_v0 }
  0x1a   :  { %223 = vmatpush1.bf16.msra.mxu0 %v454_v9  ;;  %444 = vmatpush1.bf16.msra.mxu1 %v454_v9 }
  0x1b   :  { %224 = vmatprep.subr.bf16.mxu0 %v481_v0  ;;  %436 = vmatprep.subr.bf16.mxu1 %v481_v0 }
  0x1e   :  { %225 = vmatpush1.bf16.msra.mxu0 %v455_v10  ;;  %445 = vmatpush1.bf16.msra.mxu1 %v455_v10 }
  0x1f   :  { %226 = vmatprep.subr.bf16.mxu0 %v481_v0  ;;  %437 = vmatprep.subr.bf16.mxu1 %v481_v0 }
  0x22   :  { %227 = vmatpush1.bf16.msra.mxu0 %v456_v11  ;;  %446 = vmatpush1.bf16.msra.mxu1 %v456_v11 }
  0x25   :  { %243 = vmatmul.mubr.bf16.vlgmr.msra.gmra.mrb[0].mxu0 %v457_v12  ;;  %275 = vmatmul.mubr.bf16.vlgmr.msra.gmra.mrb[0].mxu1 %v463_v13 }
  0x26   :  { %422 = vmatprep.mubr.msk.bf16.mxu0 %vm185_vm0, %v460_v14  ;;  %426 = vmatprep.mubr.msk.bf16.mxu1 %vm185_vm0, %v469_v15 }
  0x2d   :  { %251 = vmatmul.mubr.bf16.gmra.mrb[4].mxu0 %v462_v16  ;;  %283 = vmatmul.mubr.bf16.gmra.mrb[4].mxu1 %v471_v17 }
  0x2e   :  { %423 = vmatprep.mubr.msk.bf16.mxu0 %vm185_vm0, %v466_v18  ;;  %427 = vmatprep.mubr.msk.bf16.mxu1 %vm185_vm0, %v475_v19 }
  0x35   :  { %259 = vmatmul.mubr.bf16.gmra.mrb[8].mxu0 %v468_v20  ;;  %291 = vmatmul.mubr.bf16.gmra.mrb[8].mxu1 %v477_v21 }
  0x36   :  { %424 = vmatprep.mubr.msk.bf16.mxu0 %vm185_vm0, %v472_v22  ;;  %428 = vmatprep.mubr.msk.bf16.mxu1 %vm185_vm0, %v478_v23 }
  0x3d   :  { %267 = vmatmul.mubr.bf16.gmra.mrb[12].mxu0 %v474_v24  ;;  %299 = vmatmul.mubr.bf16.gmra.mrb[12].mxu1 %v480_v25 }
  0xf8   :  { %v244_v27 = vpop.f32.mrb[0].mxu0  ;;  %v276_v28 = vpop.f32.mrb[0].mxu1 }
  0xf9   :  { %v245_v29 = vadd.f32 %v598_v26, %v244_v27  ;;  %v246_v30 = vpop.f32.mrb[1].mxu0  ;;  %v602_v31 = vadd.f32 %v598_v26, %v276_v28  ;;  %v278_v32 = vpop.f32.mrb[1].mxu1 }
  0xfa   :  { %v247_v33 = vpop.f32.mrb[2].mxu0  ;;  %v279_v34 = vpop.f32.mrb[2].mxu1 }
  0xfb   :  { %307 = vst [vmem:[%s691_s3] sm:$0xff] %v245_v29  ;;  %v248_v35 = vadd.f32 %v598_v26, %v247_v33  ;;  %v249_v36 = vpop.f32.mrb[3].mxu0  ;;  %315 = vst [vmem:[%s691_s3 + $0x40] sm:$0xff] %v602_v31  ;;  %v613_v37 = vadd.f32 %v598_v26, %v279_v34  ;;  %v281_v38 = vpop.f32.mrb[3].mxu1  ;;  %v344_v39 = vmul.f32 %v245_v29, %v245_v29 }
  0xfc   :  { %v352_v34 = vmul.f32 %v602_v31, %v602_v31 }
  0xfd   :  { %308 = vst [vmem:[%s691_s3 + $0x8] sm:$0xff] %v248_v35  ;;  %v323_v40 = vadd.f32 %v248_v35, %v245_v29  ;;  %v345_v41 = vmul.f32 %v248_v35, %v248_v35  ;;  %316 = vst [vmem:[%s691_s3 + $0x48] sm:$0xff] %v613_v37 }
  0xff   :  { %v360_v42 = vadd.f32 %v345_v41, %v344_v39 }
 0x100   :  { %v252_v43 = vpop.f32.mrb[4].mxu0  ;;  %v284_v44 = vpop.f32.mrb[4].mxu1 }
 0x101   :  { %v253_v45 = vadd.f32 %v598_v26, %v252_v43  ;;  %v254_v46 = vpop.f32.mrb[5].mxu0  ;;  %v624_v47 = vadd.f32 %v598_v26, %v284_v44  ;;  %v286_v48 = vpop.f32.mrb[5].mxu1 }
 0x102   :  { %v255_v49 = vpop.f32.mrb[6].mxu0  ;;  %v287_v50 = vpop.f32.mrb[6].mxu1 }
 0x103   :  { %309 = vst [vmem:[%s691_s3 + $0x10] sm:$0xff] %v253_v45  ;;  %v324_v51 = vadd.f32 %v323_v40, %v253_v45  ;;  %v346_v52 = vmul.f32 %v253_v45, %v253_v45  ;;  %v256_v53 = vadd.f32 %v598_v26, %v255_v49  ;;  %v257_v54 = vpop.f32.mrb[7].mxu0  ;;  %317 = vst [vmem:[%s691_s3 + $0x50] sm:$0xff] %v624_v47  ;;  %v289_v55 = vpop.f32.mrb[7].mxu1 }
 0x104   :  { %v288_v56 = vadd.f32 %v598_v26, %v287_v50  ;;  %v354_v40 = vmul.f32 %v624_v47, %v624_v47 }
 0x105   :  { %v361_v57 = vadd.f32 %v360_v42, %v346_v52  ;;  %310 = vst [vmem:[%s691_s3 + $0x18] sm:$0xff] %v256_v53  ;;  %v325_v58 = vadd.f32 %v324_v51, %v256_v53  ;;  %v347_v59 = vmul.f32 %v256_v53, %v256_v53 }
 0x106   :  { %318 = vst [vmem:[%s691_s3 + $0x58] sm:$0xff] %v288_v56  ;;  %v355_v43 = vmul.f32 %v288_v56, %v288_v56 }
 0x107   :  { %v362_v60 = vadd.f32 %v361_v57, %v347_v59 }
 0x108   :  { %v260_v61 = vpop.f32.mrb[8].mxu0  ;;  %v292_v62 = vpop.f32.mrb[8].mxu1 }
 0x109   :  { %v261_v63 = vadd.f32 %v598_v26, %v260_v61  ;;  %v262_v0 = vpop.f32.mrb[9].mxu0  ;;  %v293_v1 = vadd.f32 %v598_v26, %v292_v62  ;;  %v294_v2 = vpop.f32.mrb[9].mxu1 }
 0x10a   :  { %v263_v3 = vpop.f32.mrb[10].mxu0  ;;  %v295_v4 = vpop.f32.mrb[10].mxu1 }
 0x10b   :  { %311 = vst [vmem:[%s691_s3 + $0x20] sm:$0xff] %v261_v63  ;;  %v326_v5 = vadd.f32 %v325_v58, %v261_v63  ;;  %v348_v6 = vmul.f32 %v261_v63, %v261_v63  ;;  %v264_v7 = vadd.f32 %v598_v26, %v263_v3  ;;  %v265_v8 = vpop.f32.mrb[11].mxu0  ;;  %319 = vst [vmem:[%s691_s3 + $0x60] sm:$0xff] %v293_v1  ;;  %v297_v9 = vpop.f32.mrb[11].mxu1 }
 0x10c   :  { %v296_v10 = vadd.f32 %v598_v26, %v295_v4  ;;  %v356_v48 = vmul.f32 %v293_v1, %v293_v1 }
 0x10d   :  { %v363_v11 = vadd.f32 %v362_v60, %v348_v6  ;;  %312 = vst [vmem:[%s691_s3 + $0x28] sm:$0xff] %v264_v7  ;;  %v327_v12 = vadd.f32 %v326_v5, %v264_v7  ;;  %v349_v13 = vmul.f32 %v264_v7, %v264_v7 }
 0x10e   :  { %320 = vst [vmem:[%s691_s3 + $0x68] sm:$0xff] %v296_v10  ;;  %v357_v51 = vmul.f32 %v296_v10, %v296_v10 }
 0x10f   :  { %v364_v14 = vadd.f32 %v363_v11, %v349_v13 }
 0x110   :  { %v268_v15 = vpop.f32.mrb[12].mxu0  ;;  %v300_v16 = vpop.f32.mrb[12].mxu1 }
 0x111   :  { %v269_v17 = vadd.f32 %v598_v26, %v268_v15  ;;  %v270_v18 = vpop.f32.mrb[13].mxu0  ;;  %v301_v19 = vadd.f32 %v598_v26, %v300_v16  ;;  %v302_v20 = vpop.f32.mrb[13].mxu1 }
 0x112   :  { %v271_v21 = vpop.f32.mrb[14].mxu0  ;;  %v303_v22 = vpop.f32.mrb[14].mxu1 }
 0x113   :  { %313 = vst [vmem:[%s691_s3 + $0x30] sm:$0xff] %v269_v17  ;;  %v328_v23 = vadd.f32 %v327_v12, %v269_v17  ;;  %v350_v24 = vmul.f32 %v269_v17, %v269_v17  ;;  %v272_v25 = vadd.f32 %v598_v26, %v271_v21  ;;  %v273_v27 = vpop.f32.mrb[15].mxu0  ;;  %321 = vst [vmem:[%s691_s3 + $0x70] sm:$0xff] %v301_v19  ;;  %v305_v28 = vpop.f32.mrb[15].mxu1 }
 0x114   :  { %v304_v29 = vadd.f32 %v598_v26, %v303_v22  ;;  %v353_v26 = vmul.f32 %v613_v37, %v613_v37  ;;  %v358_v52 = vmul.f32 %v301_v19, %v301_v19 }
 0x115   :  { %v365_v30 = vadd.f32 %v364_v14, %v350_v24  ;;  %314 = vst [vmem:[%s691_s3 + $0x38] sm:$0xff] %v272_v25  ;;  %v329_v32 = vadd.f32 %v328_v23, %v272_v25  ;;  %v351_v33 = vmul.f32 %v272_v25, %v272_v25 }
 0x116   :  { %322 = vst [vmem:[%s691_s3 + $0x78] sm:$0xff] %v304_v29  ;;  %v359_v57 = vmul.f32 %v304_v29, %v304_v29 }
 0x117   :  { %v330_v35 = vadd.f32 %v329_v32, %v602_v31  ;;  %v366_v36 = vadd.f32 %v365_v30, %v351_v33 }
 0x119   :  { %v331_v38 = vadd.f32 %v330_v35, %v613_v37  ;;  %v367_v39 = vadd.f32 %v366_v36, %v352_v34 }
 0x11b   :  { %v368_v41 = vadd.f32 %v367_v39, %v353_v26  ;;  %v332_v42 = vadd.f32 %v331_v38, %v624_v47 }
 0x11d   :  { %v333_v44 = vadd.f32 %v332_v42, %v288_v56  ;;  %v369_v45 = vadd.f32 %v368_v41, %v354_v40 }
 0x11f   :  { %v334_v46 = vadd.f32 %v333_v44, %v293_v1  ;;  %v370_v49 = vadd.f32 %v369_v45, %v355_v43 }
 0x121   :  { %v371_v31 = vadd.f32 %v370_v49, %v356_v48  ;;  %v335_v50 = vadd.f32 %v334_v46, %v296_v10 }
 0x123   :  { %v372_v53 = vadd.f32 %v371_v31, %v357_v51  ;;  %v336_v54 = vadd.f32 %v335_v50, %v301_v19 }
 0x125   :  { %v373_v37 = vadd.f32 %v372_v53, %v358_v52  ;;  %v337_v55 = vadd.f32 %v336_v54, %v304_v29 }
 0x127   :  { %v338_v58 = vrot.slane %v337_v55, 4  ;;  %v374_v59 = vadd.f32 %v373_v37, %v359_v57 }
 0x129   :  { %v339_v60 = vadd.f32 %v338_v58, %v337_v55  ;;  %v375_v61 = vrot.slane %v374_v59, 4 }
 0x12b   :  { %v340_v47 = vrot.slane %v339_v60, 2  ;;  %v376_v62 = vadd.f32 %v375_v61, %v374_v59 }
 0x12d   :  { %v341_v56 = vadd.f32 %v340_v47, %v339_v60  ;;  %v377_v63 = vrot.slane %v376_v62, 2 }
 0x12f   :  { %v342_v0 = vrot.slane %v341_v56, 1  ;;  %v378_v1 = vadd.f32 %v377_v63, %v376_v62 }
 0x131   :  { %v343_v2 = vadd.f32 %v342_v0, %v341_v56  ;;  %v379_v3 = vrot.slane %v378_v1, 1 }
 0x133   :  { %v380_v4 = vadd.f32 %v379_v3, %v378_v1  ;;  %381 = vst [vmem:[%s692_s4] sm:$0xff] %v343_v2 }
 0x135   :  { %382 = vst [vmem:[%s693_s5] sm:$0xff] %v380_v4 }

// kernel: projective_generator_forward.15
= control target key start
LH: loop header
LB: loop body
LE: loop exit
PB: predicated region body
PF: predicated region fallthrough
CT: control target
= control target key end

     0   :  { %vm207_vm0 = vcmask 261120   ;;  %s568_s1 = inlined_call_operand.vmem [shape: bf16[288,128], index: 1, kind: input, shape index: {}]   ;;  %s569_s0 = inlined_call_operand.vmem [shape: bf16[32,288], index: 0, kind: input, shape index: {}]   ;;  %s570_s2 = inlined_call_operand.vmem [shape: f32[1,128], index: 2, kind: input, shape index: {}]   ;;  %s571_s3 = inlined_call_operand.vmem [shape: f32[32,128], index: 3, kind: output, shape index: {0}]   ;;  %s572_s4 = inlined_call_operand.vmem [shape: f32[1,8,128], index: 4, kind: output, shape index: {1}]   ;;  %s573_s5 = inlined_call_operand.vmem [shape: f32[1,8,128], index: 5, kind: output, shape index: {2}]  }
   0x1   :  { %v419_v0 = vld [vmem:[%s568_s1 + $0x40] sm:$0xff]   ;;  %v421_v2 = vld [vmem:[%s568_s1 + $0x48] sm:$0xff]   ;;  %v423_v4 = vld [vmem:[%s568_s1 + $0x50] sm:$0xff]  }
   0x2   :  { %v420_v1 = vld [vmem:[%s568_s1] sm:$0xff]   ;;  %379 = vmatprep.subr.bf16.mxu0 %v419_v0  ;;  %v422_v3 = vld [vmem:[%s568_s1 + $0x8] sm:$0xff]   ;;  %v424_v5 = vld [vmem:[%s568_s1 + $0x10] sm:$0xff]  }
   0x3   :  { %380 = vmatpush3.bf16.msra.mxu0 %v420_v1  ;;  %v425_v6 = vld [vmem:[%s568_s1 + $0x58] sm:$0xff]   ;;  %v427_v8 = vld [vmem:[%s568_s1 + $0x60] sm:$0xff]   ;;  %v429_v11 = vld [vmem:[%s568_s1 + $0x68] sm:$0xff]  }
   0x4   :  { %381 = vmatprep.subr.bf16.mxu0 %v421_v2  ;;  %v426_v7 = vld [vmem:[%s568_s1 + $0x18] sm:$0xff]   ;;  %v428_v9 = vld [vmem:[%s568_s1 + $0x20] sm:$0xff]   ;;  %v430_v12 = vld [vmem:[%s568_s1 + $0x28] sm:$0xff]  }
   0x5   :  { %v434_v10 = vld [vmem:[%s568_s1 + $0x80] sm:$0xff]   ;;  %v431_v13 = vld [vmem:[%s568_s1 + $0x70] sm:$0xff]   ;;  %v439_v15 = vld [vmem:[%s568_s1 + $0x88] sm:$0xff]  }
   0x6   :  { %411 = vmatprep.subr.bf16.mxu1 %v434_v10  ;;  %v438_v14 = vld [vmem:[%s569_s0 + $0x4] ss:$12 sps:$4 sm:$0xff]   ;;  %v440_v16 = vld [vmem:[%s569_s0 + $0x8] ss:$12 sps:$4 sm:$0xff]   ;;  %v441_v17 = vld [vmem:[%s569_s0 + $0x20] ss:$12 sps:$4 sm:$0xff]  }
   0x7   :  { %382 = vmatpush3.bf16.msra.mxu0 %v422_v3  ;;  %412 = vmatpush3.bf16.msra.mxu1 %v434_v10  ;;  %v432_v18 = vld [vmem:[%s568_s1 + $0x30] sm:$0xff]   ;;  %v433_v19 = vld [vmem:[%s568_s1 + $0x78] sm:$0xff]   ;;  %v436_v21 = vld [vmem:[%s569_s0] ss:$12 sps:$4 sm:$0xff]  }
   0x8   :  { %383 = vmatprep.subr.bf16.mxu0 %v423_v4  ;;  %246 = vmatprep.mubr.bf16.mxu0 %v438_v14  ;;  %v435_v20 = vld [vmem:[%s568_s1 + $0x38] sm:$0xff]   ;;  %v352_v30 = vld [vmem:[%s570_s2] ss:$0 sm:$0xff] }
   0x9   :  { %413 = vmatprep.subr.bf16.mxu1 %v439_v15  ;;  %415 = vmatprep.mubr.msk.bf16.mxu1 %vm207_vm0, %v440_v16  ;;  %v442_v22 = vld [vmem:[%s569_s0 + $0x1c] ss:$12 sps:$4 sm:$0xff]   ;;  %v444_v23 = vld [vmem:[%s569_s0 + $0x18] ss:$12 sps:$4 sm:$0xff]  }
   0xb   :  { %384 = vmatpush3.bf16.msra.mxu0 %v424_v5  ;;  %414 = vmatpush3.bf16.msra.mxu1 %v439_v15 }
   0xc   :  { %385 = vmatprep.subr.bf16.mxu0 %v425_v6 }
   0xe   :  { %416 = vmatmul.mubr.msk.bf16.vlgmr.msra.gmra.mrb[0].mxu1 %vm207_vm0, %v441_v17 }
   0xf   :  { %386 = vmatpush3.bf16.msra.mxu0 %v426_v7 }
  0x10   :  { %387 = vmatprep.subr.bf16.mxu0 %v427_v8 }
  0x13   :  { %388 = vmatpush3.bf16.msra.mxu0 %v428_v9 }
  0x14   :  { %389 = vmatprep.subr.bf16.mxu0 %v429_v11 }
  0x17   :  { %390 = vmatpush3.bf16.msra.mxu0 %v430_v12 }
  0x18   :  { %391 = vmatprep.subr.bf16.mxu0 %v431_v13 }
  0x1b   :  { %392 = vmatpush3.bf16.msra.mxu0 %v432_v18 }
  0x1c   :  { %393 = vmatprep.subr.bf16.mxu0 %v433_v19 }
  0x1f   :  { %394 = vmatpush3.bf16.msra.mxu0 %v435_v20 }
  0x22   :  { %247 = vmatmul.mubr.bf16.vlgmr.msra.gmra.mrb[0].mxu0 %v436_v21 }
  0x23   :  { %254 = vmatprep.mubr.bf16.mxu0 %v442_v22 }
  0x2a   :  { %255 = vmatmul.mubr.bf16.gmra.mrb[4].mxu0 %v444_v23 }
  0xe1   :  { %v417_v24 = vpop.f32.mrb[0].mxu1 }
  0xe2   :  { %v297_v25 = vpop.f32.mrb[1].mxu1 }
  0xe3   :  { %v418_v26 = vpop.f32.mrb[2].mxu1 }
  0xe4   :  { %v300_v27 = vpop.f32.mrb[3].mxu1 }
  0xf5   :  { %v395_v28 = vpop.f32.mrb[0].mxu0 }
  0xf6   :  { %v396_v29 = vpop.f32.mrb[1].mxu0 }
  0xf7   :  { %v397_v31 = vadd.f32 %v396_v29, %v395_v28  ;;  %v398_v32 = vpop.f32.mrb[2].mxu0 }
  0xf8   :  { %v399_v33 = vpop.f32.mrb[3].mxu0 }
  0xf9   :  { %v400_v34 = vadd.f32 %v399_v33, %v398_v32  ;;  %v249_v35 = vadd.f32 %v397_v31, %v352_v30 }
  0xfb   :  { %v298_v36 = vadd.f32 %v297_v25, %v249_v35  ;;  %v252_v37 = vadd.f32 %v400_v34, %v352_v30 }
  0xfd   :  { %312 = vst [vmem:[%s571_s3] sm:$0xff] %v298_v36  ;;  %v301_v38 = vadd.f32 %v300_v27, %v252_v37  ;;  %v401_v39 = vpop.f32.mrb[4].mxu0  ;;  %v325_v41 = vmul.f32 %v298_v36, %v298_v36 }
  0xfe   :  { %v402_v40 = vpop.f32.mrb[5].mxu0 }
  0xff   :  { %313 = vst [vmem:[%s571_s3 + $0x8] sm:$0xff] %v301_v38  ;;  %v316_v42 = vadd.f32 %v301_v38, %v298_v36  ;;  %v326_v43 = vmul.f32 %v301_v38, %v301_v38  ;;  %v403_v44 = vadd.f32 %v402_v40, %v401_v39  ;;  %v404_v45 = vpop.f32.mrb[6].mxu0 }
 0x100   :  { %v405_v46 = vpop.f32.mrb[7].mxu0 }
 0x101   :  { %v329_v47 = vadd.f32 %v326_v43, %v325_v41  ;;  %v257_v48 = vadd.f32 %v403_v44, %v352_v30  ;;  %v406_v49 = vadd.f32 %v405_v46, %v404_v45 }
 0x103   :  { %v306_v50 = vadd.f32 %v417_v24, %v257_v48  ;;  %v260_v51 = vadd.f32 %v406_v49, %v352_v30 }
 0x105   :  { %314 = vst [vmem:[%s571_s3 + $0x10] sm:$0xff] %v306_v50  ;;  %v317_v52 = vadd.f32 %v316_v42, %v306_v50  ;;  %v327_v53 = vmul.f32 %v306_v50, %v306_v50  ;;  %v309_v54 = vadd.f32 %v418_v26, %v260_v51 }
 0x107   :  { %v330_v55 = vadd.f32 %v329_v47, %v327_v53  ;;  %315 = vst [vmem:[%s571_s3 + $0x18] sm:$0xff] %v309_v54  ;;  %v318_v56 = vadd.f32 %v317_v52, %v309_v54  ;;  %v328_v57 = vmul.f32 %v309_v54, %v309_v54 }
 0x109   :  { %v319_v58 = vrot.slane %v318_v56, 4  ;;  %v331_v59 = vadd.f32 %v330_v55, %v328_v57 }
 0x10b   :  { %v320_v60 = vadd.f32 %v319_v58, %v318_v56  ;;  %v332_v61 = vrot.slane %v331_v59, 4 }
 0x10d   :  { %v321_v62 = vrot.slane %v320_v60, 2  ;;  %v333_v63 = vadd.f32 %v332_v61, %v331_v59 }
 0x10f   :  { %v322_v0 = vadd.f32 %v321_v62, %v320_v60  ;;  %v334_v1 = vrot.slane %v333_v63, 2 }
 0x111   :  { %v323_v2 = vrot.slane %v322_v0, 1  ;;  %v335_v3 = vadd.f32 %v334_v1, %v333_v63 }
 0x113   :  { %v324_v4 = vadd.f32 %v323_v2, %v322_v0  ;;  %v336_v5 = vrot.slane %v335_v3, 1 }
 0x115   :  { %v337_v6 = vadd.f32 %v336_v5, %v335_v3  ;;  %338 = vst [vmem:[%s572_s4] sm:$0xff] %v324_v4 }
 0x117   :  { %339 = vst [vmem:[%s573_s5] sm:$0xff] %v337_v6 }

// kernel: projective_generator_forward.16
= control target key start
LH: loop header
LB: loop body
LE: loop exit
PB: predicated region body
PF: predicated region fallthrough
CT: control target
= control target key end

     0   :  { %vm375_vm0 = vcmask 523264   ;;  %s931_s1 = inlined_call_operand.vmem [shape: bf16[576,128], index: 1, kind: input, shape index: {}]   ;;  %s932_s0 = inlined_call_operand.vmem [shape: bf16[32,576], index: 0, kind: input, shape index: {}]   ;;  %s933_s2 = inlined_call_operand.vmem [shape: f32[1,128], index: 2, kind: input, shape index: {}]   ;;  %s934_s3 = inlined_call_operand.vmem [shape: f32[32,128], index: 3, kind: output, shape index: {0}]   ;;  %s935_s4 = inlined_call_operand.vmem [shape: f32[1,8,128], index: 4, kind: output, shape index: {1}]   ;;  %s936_s5 = inlined_call_operand.vmem [shape: f32[1,8,128], index: 5, kind: output, shape index: {2}]  }
   0x1   :  { %v692_v0 = vld [vmem:[%s931_s1 + $0x40] sm:$0xff]   ;;  %v696_v4 = vld [vmem:[%s931_s1 + $0x48] sm:$0xff]   ;;  %v700_v8 = vld [vmem:[%s931_s1 + $0x50] sm:$0xff]  }
   0x2   :  { %v693_v1 = vld [vmem:[%s931_s1] sm:$0xff]   ;;  %618 = vmatprep.subr.bf16.mxu0 %v692_v0  ;;  %v697_v5 = vld [vmem:[%s931_s1 + $0x8] sm:$0xff]   ;;  %v701_v9 = vld [vmem:[%s931_s1 + $0x10] sm:$0xff]  }
   0x3   :  { %v694_v2 = vld [vmem:[%s931_s1 + $0xc0] sm:$0xff]   ;;  %619 = vmatpush3.bf16.msra.mxu0 %v693_v1  ;;  %v698_v6 = vld [vmem:[%s931_s1 + $0xc8] sm:$0xff]   ;;  %v702_v10 = vld [vmem:[%s931_s1 + $0xd0] sm:$0xff]  }
   0x4   :  { %v695_v3 = vld [vmem:[%s931_s1 + $0x80] sm:$0xff]   ;;  %646 = vmatprep.subr.bf16.mxu1 %v694_v2  ;;  %620 = vmatprep.subr.bf16.mxu0 %v696_v4  ;;  %v699_v7 = vld [vmem:[%s931_s1 + $0x88] sm:$0xff]   ;;  %v703_v11 = vld [vmem:[%s931_s1 + $0x90] sm:$0xff]  }
   0x5   :  { %647 = vmatpush3.bf16.msra.mxu1 %v695_v3  ;;  %v704_v12 = vld [vmem:[%s931_s1 + $0x58] sm:$0xff]   ;;  %v708_v16 = vld [vmem:[%s931_s1 + $0x60] sm:$0xff]   ;;  %v712_v20 = vld [vmem:[%s931_s1 + $0x68] sm:$0xff]  }
   0x6   :  { %648 = vmatprep.subr.bf16.mxu1 %v698_v6  ;;  %v705_v13 = vld [vmem:[%s931_s1 + $0x18] sm:$0xff]   ;;  %v709_v17 = vld [vmem:[%s931_s1 + $0x20] sm:$0xff]   ;;  %v713_v21 = vld [vmem:[%s931_s1 + $0x28] sm:$0xff]  }
   0x7   :  { %621 = vmatpush3.bf16.msra.mxu0 %v697_v5  ;;  %v706_v14 = vld [vmem:[%s931_s1 + $0xd8] sm:$0xff]   ;;  %v710_v18 = vld [vmem:[%s931_s1 + $0xe0] sm:$0xff]   ;;  %v714_v22 = vld [vmem:[%s931_s1 + $0xe8] sm:$0xff]  }
   0x8   :  { %622 = vmatprep.subr.bf16.mxu0 %v700_v8  ;;  %v707_v15 = vld [vmem:[%s931_s1 + $0x98] sm:$0xff]   ;;  %v711_v19 = vld [vmem:[%s931_s1 + $0xa0] sm:$0xff]   ;;  %v715_v23 = vld [vmem:[%s931_s1 + $0xa8] sm:$0xff]  }
   0x9   :  { %649 = vmatpush3.bf16.msra.mxu1 %v699_v7  ;;  %v716_v24 = vld [vmem:[%s931_s1 + $0x70] sm:$0xff]   ;;  %v720_v28 = vld [vmem:[%s931_s1 + $0x78] sm:$0xff]   ;;  %v727_v34 = vld [vmem:[%s931_s1 + $0x100] sm:$0xff]  }
   0xa   :  { %650 = vmatprep.subr.bf16.mxu1 %v702_v10  ;;  %v717_v25 = vld [vmem:[%s931_s1 + $0x30] sm:$0xff]   ;;  %v721_v29 = vld [vmem:[%s931_s1 + $0x38] sm:$0xff]   ;;  %v730_v36 = vld [vmem:[%s932_s0 + $0xc] ss:$20 sps:$4 sm:$0xff]  }
   0xb   :  { %623 = vmatpush3.bf16.msra.mxu0 %v701_v9  ;;  %v718_v26 = vld [vmem:[%s931_s1 + $0xf0] sm:$0xff]   ;;  %v722_v30 = vld [vmem:[%s931_s1 + $0xf8] sm:$0xff]   ;;  %v731_v37 = vld [vmem:[%s931_s1 + $0x108] sm:$0xff]   ;;  %463 = vmatprep.mubr.bf16.mxu1 %v730_v36 }
   0xc   :  { %624 = vmatprep.subr.bf16.mxu0 %v704_v12  ;;  %v719_v27 = vld [vmem:[%s931_s1 + $0xb0] sm:$0xff]   ;;  %v725_v32 = vld [vmem:[%s932_s0 + $0x4] ss:$20 sps:$4 sm:$0xff]   ;;  %v728_v35 = vld [vmem:[%s932_s0 + $0x8] ss:$20 sps:$4 sm:$0xff]  }
   0xd   :  { %651 = vmatpush3.bf16.msra.mxu1 %v703_v11  ;;  %v723_v31 = vld [vmem:[%s932_s0] ss:$20 sps:$4 sm:$0xff]   ;;  %v726_v33 = vld [vmem:[%s931_s1 + $0xb8] sm:$0xff]   ;;  %414 = vmatprep.mubr.bf16.mxu0 %v725_v32  ;;  %v738_v42 = vld [vmem:[%s932_s0 + $0x30] ss:$20 sps:$4 sm:$0xff]  }
   0xe   :  { %652 = vmatprep.subr.bf16.mxu1 %v706_v14  ;;  %v732_v38 = vld [vmem:[%s932_s0 + $0x2c] ss:$20 sps:$4 sm:$0xff]   ;;  %v734_v39 = vld [vmem:[%s932_s0 + $0x28] ss:$20 sps:$4 sm:$0xff]   ;;  %v735_v40 = vld [vmem:[%s931_s1 + $0x110] sm:$0xff]  }
   0xf   :  { %625 = vmatpush3.bf16.msra.mxu0 %v705_v13  ;;  %v736_v41 = vld [vmem:[%s932_s0 + $0x34] ss:$20 sps:$4 sm:$0xff]   ;;  %v739_v43 = vld [vmem:[%s931_s1 + $0x118] sm:$0xff]   ;;  %v740_v44 = vld [vmem:[%s932_s0 + $0x10] ss:$20 sps:$4 sm:$0xff]  }
  0x10   :  { %626 = vmatprep.subr.bf16.mxu0 %v708_v16  ;;  %v741_v45 = vld [vmem:[%s932_s0 + $0x38] ss:$20 sps:$4 sm:$0xff]   ;;  %v569_v47 = vld [vmem:[%s933_s2] ss:$0 sm:$0xff] }
  0x11   :  { %653 = vmatpush3.bf16.msra.mxu1 %v707_v15 }
  0x12   :  { %654 = vmatprep.subr.bf16.mxu1 %v710_v18 }
  0x13   :  { %627 = vmatpush3.bf16.msra.mxu0 %v709_v17 }
  0x14   :  { %628 = vmatprep.subr.bf16.mxu0 %v712_v20 }
  0x15   :  { %655 = vmatpush3.bf16.msra.mxu1 %v711_v19 }
  0x16   :  { %656 = vmatprep.subr.bf16.mxu1 %v714_v22 }
  0x17   :  { %629 = vmatpush3.bf16.msra.mxu0 %v713_v21 }
  0x18   :  { %630 = vmatprep.subr.bf16.mxu0 %v716_v24 }
  0x19   :  { %657 = vmatpush3.bf16.msra.mxu1 %v715_v23 }
  0x1a   :  { %658 = vmatprep.subr.bf16.mxu1 %v718_v26 }
  0x1b   :  { %631 = vmatpush3.bf16.msra.mxu0 %v717_v25 }
  0x1c   :  { %632 = vmatprep.subr.bf16.mxu0 %v720_v28 }
  0x1d   :  { %659 = vmatpush3.bf16.msra.mxu1 %v719_v27 }
  0x1e   :  { %660 = vmatprep.subr.bf16.mxu1 %v722_v30 }
  0x1f   :  { %633 = vmatpush3.bf16.msra.mxu0 %v721_v29 }
  0x20   :  { %680 = vmatprep.subr.bf16.mxu0 %v727_v34 }
  0x21   :  { %661 = vmatpush3.bf16.msra.mxu1 %v726_v33 }
  0x22   :  { %415 = vmatmul.mubr.bf16.vlgmr.msra.gmra.mrb[0].mxu0 %v723_v31 }
  0x23   :  { %681 = vmatpush3.bf16.msra.mxu0 %v727_v34  ;;  %422 = vmatprep.mubr.bf16.mxu0 %v732_v38 }
  0x24   :  { %464 = vmatmul.mubr.bf16.vlgmr.msra.gmra.mrb[0].mxu1 %v728_v35  ;;  %682 = vmatprep.subr.bf16.mxu0 %v731_v37 }
  0x25   :  { %471 = vmatprep.mubr.bf16.mxu1 %v736_v41 }
  0x27   :  { %683 = vmatpush3.bf16.msra.mxu0 %v731_v37 }
  0x28   :  { %684 = vmatprep.subr.bf16.mxu0 %v735_v40 }
  0x2a   :  { %423 = vmatmul.mubr.bf16.gmra.mrb[4].mxu0 %v734_v39 }
  0x2b   :  { %688 = vmatprep.mubr.msk.bf16.mxu0 %vm375_vm0, %v740_v44  ;;  %685 = vmatpush3.bf16.msra.mxu0 %v735_v40 }
  0x2c   :  { %472 = vmatmul.mubr.bf16.gmra.mrb[4].mxu1 %v738_v42  ;;  %686 = vmatprep.subr.bf16.mxu0 %v739_v43 }
  0x2f   :  { %687 = vmatpush3.bf16.msra.mxu0 %v739_v43 }
  0x32   :  { %689 = vmatmul.mubr.msk.bf16.vlgmr.msra.gmra.mrb[8].mxu0 %vm375_vm0, %v741_v45 }
  0xf5   :  { %v634_v46 = vpop.f32.mrb[0].mxu0 }
  0xf6   :  { %v635_v48 = vpop.f32.mrb[1].mxu0 }
  0xf7   :  { %v636_v49 = vadd.f32 %v635_v48, %v634_v46  ;;  %v637_v50 = vpop.f32.mrb[2].mxu0  ;;  %v662_v51 = vpop.f32.mrb[0].mxu1 }
  0xf8   :  { %v638_v52 = vpop.f32.mrb[3].mxu0  ;;  %v663_v55 = vpop.f32.mrb[1].mxu1 }
  0xf9   :  { %v417_v53 = vadd.f32 %v636_v49, %v569_v47  ;;  %v639_v54 = vadd.f32 %v638_v52, %v637_v50  ;;  %v664_v56 = vadd.f32 %v663_v55, %v662_v51  ;;  %v665_v57 = vpop.f32.mrb[2].mxu1 }
  0xfa   :  { %v666_v59 = vpop.f32.mrb[3].mxu1 }
  0xfb   :  { %v420_v58 = vadd.f32 %v639_v54, %v569_v47  ;;  %v667_v60 = vadd.f32 %v666_v59, %v665_v57  ;;  %v466_v61 = vadd.f32 %v664_v56, %v417_v53 }
  0xfd   :  { %v640_v62 = vpop.f32.mrb[4].mxu0  ;;  %v469_v0 = vadd.f32 %v667_v60, %v420_v58 }
  0xfe   :  { %v641_v63 = vpop.f32.mrb[5].mxu0 }
  0xff   :  { %v642_v1 = vadd.f32 %v641_v63, %v640_v62  ;;  %v643_v2 = vpop.f32.mrb[6].mxu0  ;;  %v668_v3 = vpop.f32.mrb[4].mxu1 }
 0x100   :  { %v644_v4 = vpop.f32.mrb[7].mxu0  ;;  %v669_v7 = vpop.f32.mrb[5].mxu1 }
 0x101   :  { %v425_v5 = vadd.f32 %v642_v1, %v569_v47  ;;  %v645_v6 = vadd.f32 %v644_v4, %v643_v2  ;;  %v670_v8 = vadd.f32 %v669_v7, %v668_v3  ;;  %v671_v9 = vpop.f32.mrb[6].mxu1 }
 0x102   :  { %v672_v11 = vpop.f32.mrb[7].mxu1 }
 0x103   :  { %v428_v10 = vadd.f32 %v645_v6, %v569_v47  ;;  %v673_v12 = vadd.f32 %v672_v11, %v671_v9  ;;  %v474_v13 = vadd.f32 %v670_v8, %v425_v5 }
 0x105   :  { %v690_v14 = vpop.f32.mrb[8].mxu0  ;;  %v477_v15 = vadd.f32 %v673_v12, %v428_v10 }
 0x106   :  { %v523_v16 = vadd.f32 %v690_v14, %v474_v13  ;;  %v514_v17 = vpop.f32.mrb[9].mxu0 }
 0x107   :  { %v515_v18 = vadd.f32 %v514_v17, %v466_v61  ;;  %v691_v19 = vpop.f32.mrb[10].mxu0 }
 0x108   :  { %531 = vst [vmem:[%s934_s3 + $0x10] sm:$0xff] %v523_v16  ;;  %v526_v20 = vadd.f32 %v691_v19, %v477_v15  ;;  %v517_v21 = vpop.f32.mrb[11].mxu0  ;;  %v544_v26 = vmul.f32 %v523_v16, %v523_v16 }
 0x109   :  { %529 = vst [vmem:[%s934_s3] sm:$0xff] %v515_v18  ;;  %v518_v22 = vadd.f32 %v517_v21, %v469_v0  ;;  %v542_v23 = vmul.f32 %v515_v18, %v515_v18 }
 0x10a   :  { %532 = vst [vmem:[%s934_s3 + $0x18] sm:$0xff] %v526_v20  ;;  %v545_v29 = vmul.f32 %v526_v20, %v526_v20 }
 0x10b   :  { %530 = vst [vmem:[%s934_s3 + $0x8] sm:$0xff] %v518_v22  ;;  %v533_v24 = vadd.f32 %v518_v22, %v515_v18  ;;  %v543_v25 = vmul.f32 %v518_v22, %v518_v22 }
 0x10d   :  { %v534_v27 = vadd.f32 %v533_v24, %v523_v16  ;;  %v546_v28 = vadd.f32 %v543_v25, %v542_v23 }
 0x10f   :  { %v535_v30 = vadd.f32 %v534_v27, %v526_v20  ;;  %v547_v31 = vadd.f32 %v546_v28, %v544_v26 }
 0x111   :  { %v536_v32 = vrot.slane %v535_v30, 4  ;;  %v548_v33 = vadd.f32 %v547_v31, %v545_v29 }
 0x113   :  { %v537_v34 = vadd.f32 %v536_v32, %v535_v30  ;;  %v549_v35 = vrot.slane %v548_v33, 4 }
 0x115   :  { %v538_v36 = vrot.slane %v537_v34, 2  ;;  %v550_v37 = vadd.f32 %v549_v35, %v548_v33 }
 0x117   :  { %v539_v38 = vadd.f32 %v538_v36, %v537_v34  ;;  %v551_v39 = vrot.slane %v550_v37, 2 }
 0x119   :  { %v540_v40 = vrot.slane %v539_v38, 1  ;;  %v552_v41 = vadd.f32 %v551_v39, %v550_v37 }
 0x11b   :  { %v541_v42 = vadd.f32 %v540_v40, %v539_v38  ;;  %v553_v43 = vrot.slane %v552_v41, 1 }
 0x11d   :  { %v554_v44 = vadd.f32 %v553_v43, %v552_v41  ;;  %555 = vst [vmem:[%s935_s4] sm:$0xff] %v541_v42 }
 0x11f   :  { %556 = vst [vmem:[%s936_s5] sm:$0xff] %v554_v44 }

// kernel: projective_generator_forward.23
= control target key start
LH: loop header
LB: loop body
LE: loop exit
PB: predicated region body
PF: predicated region fallthrough
CT: control target
= control target key end

     0   :  { %vm321_vm0 = vcmask 261120   ;;  %s1090_s1 = inlined_call_operand.vmem [shape: bf16[288,128], index: 1, kind: input, shape index: {}]   ;;  %s1091_s0 = inlined_call_operand.vmem [shape: bf16[128,288], index: 0, kind: input, shape index: {}]   ;;  %s1092_s2 = inlined_call_operand.vmem [shape: f32[1,128], index: 2, kind: input, shape index: {}]   ;;  %s1093_s3 = inlined_call_operand.vmem [shape: f32[128,128], index: 3, kind: output, shape index: {0}]   ;;  %s1094_s4 = inlined_call_operand.vmem [shape: f32[1,8,128], index: 4, kind: output, shape index: {1}]   ;;  %s1095_s5 = inlined_call_operand.vmem [shape: f32[1,8,128], index: 5, kind: output, shape index: {2}]  }
   0x1   :  { %v789_v0 = vld [vmem:[%s1090_s1 + $0x40] sm:$0xff]   ;;  %v791_v2 = vld [vmem:[%s1090_s1 + $0x48] sm:$0xff]   ;;  %v793_v4 = vld [vmem:[%s1090_s1 + $0x50] sm:$0xff]  }
   0x2   :  { %v790_v1 = vld [vmem:[%s1090_s1] sm:$0xff]   ;;  %679 = vmatprep.subr.bf16.mxu0 %v789_v0  ;;  %773 = vmatprep.subr.bf16.mxu1 %v789_v0  ;;  %v792_v3 = vld [vmem:[%s1090_s1 + $0x8] sm:$0xff]   ;;  %v794_v5 = vld [vmem:[%s1090_s1 + $0x10] sm:$0xff]  }
   0x3   :  { %680 = vmatpush3.bf16.msra.mxu0 %v790_v1  ;;  %781 = vmatpush3.bf16.msra.mxu1 %v790_v1  ;;  %v795_v6 = vld [vmem:[%s1090_s1 + $0x58] sm:$0xff]   ;;  %v797_v8 = vld [vmem:[%s1090_s1 + $0x60] sm:$0xff]   ;;  %v799_v10 = vld [vmem:[%s1090_s1 + $0x68] sm:$0xff]  }
   0x4   :  { %681 = vmatprep.subr.bf16.mxu0 %v791_v2  ;;  %774 = vmatprep.subr.bf16.mxu1 %v791_v2  ;;  %v796_v7 = vld [vmem:[%s1090_s1 + $0x18] sm:$0xff]   ;;  %v798_v9 = vld [vmem:[%s1090_s1 + $0x20] sm:$0xff]   ;;  %v800_v13 = vld [vmem:[%s1090_s1 + $0x28] sm:$0xff]  }
   0x5   :  { %v807_v11 = vld [vmem:[%s1091_s0 + $0x4] ss:$12 sps:$4 sm:$0xff]   ;;  %v810_v12 = vld [vmem:[%s1091_s0 + $0x94] ss:$12 sps:$4 sm:$0xff]   ;;  %v803_v16 = vld [vmem:[%s1090_s1 + $0x78] sm:$0xff]  }
   0x6   :  { %v801_v14 = vld [vmem:[%s1090_s1 + $0x70] sm:$0xff]   ;;  %378 = vmatprep.mubr.bf16.mxu0 %v807_v11  ;;  %426 = vmatprep.mubr.bf16.mxu1 %v810_v12  ;;  %v804_v17 = vld [vmem:[%s1090_s1 + $0x38] sm:$0xff]   ;;  %v805_v18 = vld [vmem:[%s1091_s0] ss:$12 sps:$4 sm:$0xff]  }
   0x7   :  { %682 = vmatpush3.bf16.msra.mxu0 %v792_v3  ;;  %782 = vmatpush3.bf16.msra.mxu1 %v792_v3  ;;  %v802_v15 = vld [vmem:[%s1090_s1 + $0x30] sm:$0xff]   ;;  %v815_v19 = vld [vmem:[%s1090_s1 + $0x80] sm:$0xff]   ;;  %v811_v21 = vld [vmem:[%s1091_s0 + $0x1c] ss:$12 sps:$4 sm:$0xff]  }
   0x8   :  { %683 = vmatprep.subr.bf16.mxu0 %v793_v4  ;;  %775 = vmatprep.subr.bf16.mxu1 %v793_v4  ;;  %v808_v20 = vld [vmem:[%s1091_s0 + $0x90] ss:$12 sps:$4 sm:$0xff]   ;;  %v813_v22 = vld [vmem:[%s1091_s0 + $0xac] ss:$12 sps:$4 sm:$0xff]   ;;  %v817_v25 = vld [vmem:[%s1091_s0 + $0xa8] ss:$12 sps:$4 sm:$0xff]  }
   0x9   :  { %v818_v23 = vld [vmem:[%s1090_s1 + $0x88] sm:$0xff]   ;;  %v816_v24 = vld [vmem:[%s1091_s0 + $0x18] ss:$12 sps:$4 sm:$0xff]   ;;  %v819_v26 = vld [vmem:[%s1091_s0 + $0x34] ss:$12 sps:$4 sm:$0xff]  }
   0xa   :  { %v821_v27 = vld [vmem:[%s1091_s0 + $0x8] ss:$12 sps:$4 sm:$0xff]   ;;  %v822_v28 = vld [vmem:[%s1091_s0 + $0x30] ss:$12 sps:$4 sm:$0xff]   ;;  %v823_v29 = vld [vmem:[%s1091_s0 + $0x20] ss:$12 sps:$4 sm:$0xff]  }
   0xb   :  { %684 = vmatpush3.bf16.msra.mxu0 %v794_v5  ;;  %783 = vmatpush3.bf16.msra.mxu1 %v794_v5  ;;  %v824_v30 = vld [vmem:[%s1091_s0 + $0x4c] ss:$12 sps:$4 sm:$0xff]   ;;  %v827_v32 = vld [vmem:[%s1091_s0 + $0x48] ss:$12 sps:$4 sm:$0xff]   ;;  %v828_v33 = vld [vmem:[%s1091_s0 + $0x50] ss:$12 sps:$4 sm:$0xff]  }
   0xc   :  { %685 = vmatprep.subr.bf16.mxu0 %v795_v6  ;;  %776 = vmatprep.subr.bf16.mxu1 %v795_v6  ;;  %v826_v31 = vld [vmem:[%s1091_s0 + $0x38] ss:$12 sps:$4 sm:$0xff]   ;;  %v831_v35 = vld [vmem:[%s1091_s0 + $0x68] ss:$12 sps:$4 sm:$0xff]   ;;  %v832_v36 = vld [vmem:[%s1091_s0 + $0x60] ss:$12 sps:$4 sm:$0xff]  }
   0xd   :  { %v829_v34 = vld [vmem:[%s1091_s0 + $0x64] ss:$12 sps:$4 sm:$0xff]   ;;  %v833_v37 = vld [vmem:[%s1091_s0 + $0x80] ss:$12 sps:$4 sm:$0xff]   ;;  %v834_v38 = vld [vmem:[%s1091_s0 + $0x7c] ss:$12 sps:$4 sm:$0xff]  }
   0xe   :  { %v836_v39 = vld [vmem:[%s1091_s0 + $0x98] ss:$12 sps:$4 sm:$0xff]   ;;  %v838_v41 = vld [vmem:[%s1091_s0 + $0xb0] ss:$12 sps:$4 sm:$0xff]   ;;  %v1014_v2 = vld [vmem:[%s1092_s2] ss:$0 sm:$0xff] }
   0xf   :  { %686 = vmatpush3.bf16.msra.mxu0 %v796_v7  ;;  %784 = vmatpush3.bf16.msra.mxu1 %v796_v7  ;;  %v837_v40 = vld [vmem:[%s1091_s0 + $0x78] ss:$12 sps:$4 sm:$0xff]  }
  0x10   :  { %687 = vmatprep.subr.bf16.mxu0 %v797_v8  ;;  %777 = vmatprep.subr.bf16.mxu1 %v797_v8 }
  0x13   :  { %688 = vmatpush3.bf16.msra.mxu0 %v798_v9  ;;  %785 = vmatpush3.bf16.msra.mxu1 %v798_v9 }
  0x14   :  { %689 = vmatprep.subr.bf16.mxu0 %v799_v10  ;;  %778 = vmatprep.subr.bf16.mxu1 %v799_v10 }
  0x17   :  { %690 = vmatpush3.bf16.msra.mxu0 %v800_v13  ;;  %786 = vmatpush3.bf16.msra.mxu1 %v800_v13 }
  0x18   :  { %691 = vmatprep.subr.bf16.mxu0 %v801_v14  ;;  %779 = vmatprep.subr.bf16.mxu1 %v801_v14 }
  0x1b   :  { %692 = vmatpush3.bf16.msra.mxu0 %v802_v15  ;;  %787 = vmatpush3.bf16.msra.mxu1 %v802_v15 }
  0x1c   :  { %693 = vmatprep.subr.bf16.mxu0 %v803_v16  ;;  %780 = vmatprep.subr.bf16.mxu1 %v803_v16 }
  0x1f   :  { %694 = vmatpush3.bf16.msra.mxu0 %v804_v17  ;;  %788 = vmatpush3.bf16.msra.mxu1 %v804_v17 }
  0x20   :  { %753 = vmatprep.subr.bf16.mxu1 %v815_v19 }
  0x22   :  { %379 = vmatmul.mubr.bf16.vlgmr.msra.gmra.mrb[0].mxu0 %v805_v18  ;;  %427 = vmatmul.mubr.bf16.vlgmr.msra.gmra.mrb[0].mxu1 %v808_v20 }
  0x23   :  { %386 = vmatprep.mubr.bf16.mxu0 %v811_v21  ;;  %434 = vmatprep.mubr.bf16.mxu1 %v813_v22 }
  0x24   :  { %754 = vmatpush3.bf16.msra.mxu1 %v815_v19 }
  0x25   :  { %755 = vmatprep.subr.bf16.mxu1 %v818_v23 }
  0x28   :  { %756 = vmatpush3.bf16.msra.mxu1 %v818_v23 }
  0x2a   :  { %387 = vmatmul.mubr.bf16.gmra.mrb[4].mxu0 %v816_v24  ;;  %435 = vmatmul.mubr.bf16.gmra.mrb[4].mxu1 %v817_v25 }
  0x2b   :  { %394 = vmatprep.mubr.bf16.mxu0 %v819_v26  ;;  %757 = vmatprep.mubr.msk.bf16.mxu1 %vm321_vm0, %v821_v27 }
  0x32   :  { %395 = vmatmul.mubr.bf16.gmra.mrb[8].mxu0 %v822_v28  ;;  %758 = vmatmul.mubr.msk.bf16.vlgmr.msra.gmra.mrb[8].mxu1 %vm321_vm0, %v823_v29 }
  0x33   :  { %402 = vmatprep.mubr.bf16.mxu0 %v824_v30  ;;  %761 = vmatprep.mubr.msk.bf16.mxu1 %vm321_vm0, %v826_v31 }
  0x3a   :  { %403 = vmatmul.mubr.bf16.gmra.mrb[12].mxu0 %v827_v32  ;;  %762 = vmatmul.mubr.msk.bf16.gmra.mrb[12].mxu1 %vm321_vm0, %v828_v33 }
  0x3b   :  { %410 = vmatprep.mubr.bf16.mxu0 %v829_v34  ;;  %765 = vmatprep.mubr.msk.bf16.mxu1 %vm321_vm0, %v831_v35 }
  0x42   :  { %411 = vmatmul.mubr.bf16.gmra.mrb[16].mxu0 %v832_v36  ;;  %766 = vmatmul.mubr.msk.bf16.gmra.mrb[16].mxu1 %vm321_vm0, %v833_v37 }
  0x43   :  { %418 = vmatprep.mubr.bf16.mxu0 %v834_v38  ;;  %769 = vmatprep.mubr.msk.bf16.mxu1 %vm321_vm0, %v836_v39 }
  0x4a   :  { %419 = vmatmul.mubr.bf16.gmra.mrb[20].mxu0 %v837_v40  ;;  %770 = vmatmul.mubr.msk.bf16.gmra.mrb[20].mxu1 %vm321_vm0, %v838_v41 }
  0xf5   :  { %v695_v42 = vpop.f32.mrb[0].mxu0  ;;  %v731_v43 = vpop.f32.mrb[0].mxu1 }
  0xf6   :  { %v696_v44 = vpop.f32.mrb[1].mxu0  ;;  %v732_v45 = vpop.f32.mrb[1].mxu1 }
  0xf7   :  { %v697_v46 = vadd.f32 %v696_v44, %v695_v42  ;;  %v698_v47 = vpop.f32.mrb[2].mxu0  ;;  %v1003_v48 = vadd.f32 %v732_v45, %v731_v43  ;;  %v734_v49 = vpop.f32.mrb[2].mxu1 }
  0xf8   :  { %v699_v50 = vpop.f32.mrb[3].mxu0  ;;  %v735_v51 = vpop.f32.mrb[3].mxu1 }
  0xf9   :  { %v700_v52 = vadd.f32 %v699_v50, %v698_v47  ;;  %v1005_v53 = vadd.f32 %v735_v51, %v734_v49  ;;  %v381_v6 = vadd.f32 %v697_v46, %v1014_v2 }
  0xfb   :  { %v384_v15 = vadd.f32 %v700_v52, %v1014_v2 }
  0xfd   :  { %v701_v54 = vpop.f32.mrb[4].mxu0  ;;  %v737_v55 = vpop.f32.mrb[4].mxu1 }
  0xfe   :  { %v702_v56 = vpop.f32.mrb[5].mxu0  ;;  %v738_v57 = vpop.f32.mrb[5].mxu1 }
  0xff   :  { %v703_v58 = vadd.f32 %v702_v56, %v701_v54  ;;  %v704_v59 = vpop.f32.mrb[6].mxu0  ;;  %v1007_v60 = vadd.f32 %v738_v57, %v737_v55  ;;  %v740_v61 = vpop.f32.mrb[6].mxu1 }
 0x100   :  { %v705_v62 = vpop.f32.mrb[7].mxu0  ;;  %v741_v63 = vpop.f32.mrb[7].mxu1 }
 0x101   :  { %v706_v0 = vadd.f32 %v705_v62, %v704_v59  ;;  %v1009_v1 = vadd.f32 %v741_v63, %v740_v61  ;;  %v389_v3 = vadd.f32 %v703_v58, %v1014_v2 }
 0x103   :  { %v392_v10 = vadd.f32 %v706_v0, %v1014_v2 }
 0x105   :  { %v707_v4 = vpop.f32.mrb[8].mxu0  ;;  %v759_v5 = vpop.f32.mrb[8].mxu1 }
 0x106   :  { %v486_v7 = vadd.f32 %v759_v5, %v389_v3  ;;  %v708_v8 = vpop.f32.mrb[9].mxu0  ;;  %v477_v9 = vpop.f32.mrb[9].mxu1 }
 0x107   :  { %v709_v11 = vadd.f32 %v708_v8, %v707_v4  ;;  %v478_v12 = vadd.f32 %v477_v9, %v381_v6  ;;  %v710_v13 = vpop.f32.mrb[10].mxu0  ;;  %v760_v14 = vpop.f32.mrb[10].mxu1 }
 0x108   :  { %542 = vst [vmem:[%s1093_s3 + $0x10] sm:$0xff] %v486_v7  ;;  %v489_v16 = vadd.f32 %v760_v14, %v392_v10  ;;  %v711_v17 = vpop.f32.mrb[11].mxu0  ;;  %v480_v18 = vpop.f32.mrb[11].mxu1  ;;  %v579_v24 = vmul.f32 %v486_v7, %v486_v7 }
 0x109   :  { %540 = vst [vmem:[%s1093_s3] sm:$0xff] %v478_v12  ;;  %v712_v19 = vadd.f32 %v711_v17, %v710_v13  ;;  %v481_v20 = vadd.f32 %v480_v18, %v384_v15  ;;  %v577_v21 = vmul.f32 %v478_v12, %v478_v12  ;;  %v397_v29 = vadd.f32 %v709_v11, %v1014_v2 }
 0x10a   :  { %543 = vst [vmem:[%s1093_s3 + $0x18] sm:$0xff] %v489_v16  ;;  %v580_v30 = vmul.f32 %v489_v16, %v489_v16  ;;  %v437_v15 = vadd.f32 %v1007_v60, %v1014_v2  ;;  %v432_v60 = vadd.f32 %v1005_v53, %v1014_v2 }
 0x10b   :  { %541 = vst [vmem:[%s1093_s3 + $0x8] sm:$0xff] %v481_v20  ;;  %v556_v22 = vadd.f32 %v481_v20, %v478_v12  ;;  %v578_v23 = vmul.f32 %v481_v20, %v481_v20  ;;  %v400_v40 = vadd.f32 %v712_v19, %v1014_v2 }
 0x10d   :  { %v557_v25 = vadd.f32 %v556_v22, %v486_v7  ;;  %v593_v26 = vadd.f32 %v578_v23, %v577_v21  ;;  %v713_v27 = vpop.f32.mrb[12].mxu0  ;;  %v763_v28 = vpop.f32.mrb[12].mxu1  ;;  %v429_v23 = vadd.f32 %v1003_v48, %v1014_v2 }
 0x10e   :  { %v714_v31 = vpop.f32.mrb[13].mxu0  ;;  %v493_v32 = vpop.f32.mrb[13].mxu1 }
 0x10f   :  { %v594_v33 = vadd.f32 %v593_v26, %v579_v24  ;;  %v715_v34 = vadd.f32 %v714_v31, %v713_v27  ;;  %v494_v35 = vadd.f32 %v493_v32, %v397_v29  ;;  %v558_v36 = vadd.f32 %v557_v25, %v489_v16  ;;  %v716_v37 = vpop.f32.mrb[14].mxu0  ;;  %v764_v38 = vpop.f32.mrb[14].mxu1 }
 0x110   :  { %v717_v39 = vpop.f32.mrb[15].mxu0  ;;  %v496_v41 = vpop.f32.mrb[15].mxu1  ;;  %v440_v25 = vadd.f32 %v1009_v1, %v1014_v2 }
 0x111   :  { %v405_v42 = vadd.f32 %v715_v34, %v1014_v2  ;;  %544 = vst [vmem:[%s1093_s3 + $0x20] sm:$0xff] %v494_v35  ;;  %v559_v43 = vadd.f32 %v558_v36, %v494_v35  ;;  %v581_v44 = vmul.f32 %v494_v35, %v494_v35  ;;  %v595_v45 = vadd.f32 %v594_v33, %v580_v30 }
 0x112   :  { %v718_v46 = vadd.f32 %v717_v39, %v716_v37  ;;  %v497_v47 = vadd.f32 %v496_v41, %v400_v40 }
 0x113   :  { %v502_v49 = vadd.f32 %v763_v28, %v405_v42  ;;  %v596_v50 = vadd.f32 %v595_v45, %v581_v44 }
 0x114   :  { %v408_v51 = vadd.f32 %v718_v46, %v1014_v2  ;;  %545 = vst [vmem:[%s1093_s3 + $0x28] sm:$0xff] %v497_v47  ;;  %v560_v52 = vadd.f32 %v559_v43, %v497_v47  ;;  %v582_v54 = vmul.f32 %v497_v47, %v497_v47 }
 0x115   :  { %546 = vst [vmem:[%s1093_s3 + $0x30] sm:$0xff] %v502_v49  ;;  %v583_v55 = vmul.f32 %v502_v49, %v502_v49  ;;  %v719_v56 = vpop.f32.mrb[16].mxu0  ;;  %v767_v57 = vpop.f32.mrb[16].mxu1 }
 0x116   :  { %v505_v58 = vadd.f32 %v764_v38, %v408_v51  ;;  %v561_v59 = vadd.f32 %v560_v52, %v502_v49  ;;  %v597_v61 = vadd.f32 %v596_v50, %v582_v54  ;;  %v720_v62 = vpop.f32.mrb[17].mxu0  ;;  %v509_v63 = vpop.f32.mrb[17].mxu1 }
 0x117   :  { %v721_v0 = vadd.f32 %v720_v62, %v719_v56  ;;  %v722_v3 = vpop.f32.mrb[18].mxu0  ;;  %v768_v4 = vpop.f32.mrb[18].mxu1 }
 0x118   :  { %547 = vst [vmem:[%s1093_s3 + $0x38] sm:$0xff] %v505_v58  ;;  %v584_v5 = vmul.f32 %v505_v58, %v505_v58  ;;  %v598_v6 = vadd.f32 %v597_v61, %v583_v55  ;;  %v723_v7 = vpop.f32.mrb[19].mxu0  ;;  %v562_v8 = vadd.f32 %v561_v59, %v505_v58  ;;  %v512_v9 = vpop.f32.mrb[19].mxu1 }
 0x119   :  { %v724_v10 = vadd.f32 %v723_v7, %v722_v3  ;;  %v413_v11 = vadd.f32 %v721_v0, %v1014_v2 }
 0x11a   :  { %v599_v12 = vadd.f32 %v598_v6, %v584_v5 }
 0x11b   :  { %v510_v13 = vadd.f32 %v509_v63, %v413_v11  ;;  %v416_v14 = vadd.f32 %v724_v10, %v1014_v2 }
 0x11d   :  { %548 = vst [vmem:[%s1093_s3 + $0x40] sm:$0xff] %v510_v13  ;;  %v563_v16 = vadd.f32 %v562_v8, %v510_v13  ;;  %v585_v17 = vmul.f32 %v510_v13, %v510_v13  ;;  %v513_v18 = vadd.f32 %v512_v9, %v416_v14  ;;  %v725_v19 = vpop.f32.mrb[20].mxu0  ;;  %v771_v20 = vpop.f32.mrb[20].mxu1 }
 0x11e   :  { %v534_v21 = vadd.f32 %v771_v20, %v437_v15  ;;  %v726_v22 = vpop.f32.mrb[21].mxu0  ;;  %v525_v24 = vpop.f32.mrb[21].mxu1 }
 0x11f   :  { %v600_v26 = vadd.f32 %v599_v12, %v585_v17  ;;  %549 = vst [vmem:[%s1093_s3 + $0x48] sm:$0xff] %v513_v18  ;;  %v564_v27 = vadd.f32 %v563_v16, %v513_v18  ;;  %v586_v28 = vmul.f32 %v513_v18, %v513_v18  ;;  %v727_v29 = vadd.f32 %v726_v22, %v725_v19  ;;  %v728_v30 = vpop.f32.mrb[22].mxu0  ;;  %v772_v31 = vpop.f32.mrb[22].mxu1 }
 0x120   :  { %554 = vst [vmem:[%s1093_s3 + $0x70] sm:$0xff] %v534_v21  ;;  %v526_v48 = vadd.f32 %v525_v24, %v429_v23  ;;  %v537_v32 = vadd.f32 %v772_v31, %v440_v25  ;;  %v729_v1 = vpop.f32.mrb[23].mxu0  ;;  %v528_v33 = vpop.f32.mrb[23].mxu1  ;;  %v591_v51 = vmul.f32 %v534_v21, %v534_v21 }
 0x121   :  { %v601_v34 = vadd.f32 %v600_v26, %v586_v28  ;;  %v421_v53 = vadd.f32 %v727_v29, %v1014_v2  ;;  %v730_v35 = vadd.f32 %v729_v1, %v728_v30  ;;  %v529_v36 = vadd.f32 %v528_v33, %v432_v60 }
 0x122   :  { %552 = vst [vmem:[%s1093_s3 + $0x60] sm:$0xff] %v526_v48  ;;  %555 = vst [vmem:[%s1093_s3 + $0x78] sm:$0xff] %v537_v32  ;;  %v589_v45 = vmul.f32 %v526_v48, %v526_v48  ;;  %v592_v55 = vmul.f32 %v537_v32, %v537_v32 }
 0x123   :  { %v518_v37 = vadd.f32 %v767_v57, %v421_v53  ;;  %v424_v38 = vadd.f32 %v730_v35, %v1014_v2  ;;  %553 = vst [vmem:[%s1093_s3 + $0x68] sm:$0xff] %v529_v36  ;;  %v590_v49 = vmul.f32 %v529_v36, %v529_v36 }
 0x125   :  { %550 = vst [vmem:[%s1093_s3 + $0x50] sm:$0xff] %v518_v37  ;;  %v565_v39 = vadd.f32 %v564_v27, %v518_v37  ;;  %v587_v40 = vmul.f32 %v518_v37, %v518_v37  ;;  %v521_v41 = vadd.f32 %v768_v4, %v424_v38 }
 0x127   :  { %v602_v42 = vadd.f32 %v601_v34, %v587_v40  ;;  %551 = vst [vmem:[%s1093_s3 + $0x58] sm:$0xff] %v521_v41  ;;  %v588_v43 = vmul.f32 %v521_v41, %v521_v41  ;;  %v566_v44 = vadd.f32 %v565_v39, %v521_v41 }
 0x129   :  { %v567_v2 = vadd.f32 %v566_v44, %v526_v48  ;;  %v603_v46 = vadd.f32 %v602_v42, %v588_v43 }
 0x12b   :  { %v568_v47 = vadd.f32 %v567_v2, %v529_v36  ;;  %v604_v50 = vadd.f32 %v603_v46, %v589_v45 }
 0x12d   :  { %v569_v52 = vadd.f32 %v568_v47, %v534_v21  ;;  %v605_v54 = vadd.f32 %v604_v50, %v590_v49 }
 0x12f   :  { %v570_v56 = vadd.f32 %v569_v52, %v537_v32  ;;  %v606_v57 = vadd.f32 %v605_v54, %v591_v51 }
 0x131   :  { %v571_v58 = vrot.slane %v570_v56, 4  ;;  %v607_v59 = vadd.f32 %v606_v57, %v592_v55 }
 0x133   :  { %v572_v61 = vadd.f32 %v571_v58, %v570_v56  ;;  %v608_v62 = vrot.slane %v607_v59, 4 }
 0x135   :  { %v573_v63 = vrot.slane %v572_v61, 2  ;;  %v609_v0 = vadd.f32 %v608_v62, %v607_v59 }
 0x137   :  { %v574_v3 = vadd.f32 %v573_v63, %v572_v61  ;;  %v610_v4 = vrot.slane %v609_v0, 2 }
 0x139   :  { %v575_v5 = vrot.slane %v574_v3, 1  ;;  %v611_v6 = vadd.f32 %v610_v4, %v609_v0 }
 0x13b   :  { %v576_v7 = vadd.f32 %v575_v5, %v574_v3  ;;  %v612_v8 = vrot.slane %v611_v6, 1 }
 0x13d   :  { %v613_v9 = vadd.f32 %v612_v8, %v611_v6  ;;  %614 = vst [vmem:[%s1094_s4] sm:$0xff] %v576_v7 }
 0x13f   :  { %615 = vst [vmem:[%s1095_s5] sm:$0xff] %v613_v9 }

// kernel: projective_generator_forward.24
= control target key start
LH: loop header
LB: loop body
LE: loop exit
PB: predicated region body
PF: predicated region fallthrough
CT: control target
= control target key end

     0   :  { %11 = vsyncpa [#allocation3], 0  ;;  %s4016_s0 = inlined_call_operand.vmem [shape: bf16[512,784], index: 0, kind: input, shape index: {}]   ;;  %s4017_s1 = inlined_call_operand.vmem [shape: bf16[784,128], index: 1, kind: input, shape index: {}]   ;;  %s4018_s2 = inlined_call_operand.vmem [shape: f32[1,128], index: 2, kind: input, shape index: {}]   ;;  %s4019_s3 = inlined_call_operand.vmem [shape: f32[512,128], index: 3, kind: output, shape index: {0}]   ;;  %s4020_s4 = inlined_call_operand.hbm [shape: f32[2,8,128], index: 4, kind: output, shape index: {1}]   ;;  %s4021_s5 = inlined_call_operand.hbm [shape: f32[2,8,128], index: 5, kind: output, shape index: {2}]  }
   0x1   :  { %13 = vsyncpa [#allocation3 + $0x1], 0 }
   0x2   :  { %14 = vsyncpa [#allocation5], 0 }
   0x3   :  { %16 = vsyncpa [#allocation5 + $0x1], 0  ;;  %s3309_s18 = smov 0   ;;  %s3311_s19 = smov 0  }
   0x4   :  { %s3313_s20 = smov 0   ;;  %s3315_s21 = smov 0  }
   0x5 LB: > { %s3330_s22 = sadd.s32 4294967295, %s3275_s21   ;;  %s2330_s23 = sadd.s32 4294967294, %s3275_s21   ;;  %s3275_s21 = sphi %s3315_s21, %s4027_s21   ;;  %s3271_s20 = sphi %s3313_s20, %s4026_s20   ;;  %s3267_s19 = sphi %s3311_s19, %s4025_s19   ;;  %s3263_s18 = sphi %s3309_s18, %s4024_s18  }
   0x6   : > { %s3334_s24 = sadd.s32 1, %s3275_s21   ;;  %s123_s25 = sadd.s32 1, %s3271_s20 }
   0x7   : > { %s120_s26 = ssub.s32 %s3275_s21, %s3334_s24  ;;  %p133_p0 = scmp.ne.s32.totalorder %s3271_s20, %s3267_s19 }
   0x8   : > { %p121_p1 = scmp.eq.s32.totalorder %s120_s26, 0  ;;  %p134_p2 = scmp.eq.s32.totalorder %s3330_s22, 1 }
   0x9   : > { %p139_p3 = scmp.ne.s32.totalorder %s3267_s19, %s3263_s18  ;;  %p140_p4 = scmp.eq.s32.totalorder %s2330_s23, 1 }
   0xa   : > { %s3345_s27 = scalar_select %p121_p1, %s3271_s20, %s123_s25  }
   0xb   : > { %p3347_p5 = por %p134_p2, %p133_p0  ;;  %p3351_p6 = por %p140_p4, %p139_p3 }
   0xc   : > { %p2333_p7 = scmp.ge.s32.totalorder %s3275_s21, 1  ;;  %p200_p8 = scmp.lt.s32.totalorder %s3275_s21, 3 }
   0xe   : > { %p201_p9 = pnand %p2333_p7, %p200_p8 }
   0xf   : > { %v2972_v0 = vld [vmem:[%s4017_s1 + $0x40] sm:$0xff] (!%p201_p9)   ;;  %s2336_s7 = sshll.u32 (!%p201_p9), %s3330_s22, 5  ;;  %v2974_v2 = vld [vmem:[%s4017_s1 + $0x48] sm:$0xff] (!%p201_p9)   ;;  %v2976_v4 = vld [vmem:[%s4017_s1 + $0x50] sm:$0xff] (!%p201_p9)   ;;  %vm1340_vm0 = vcmask (!%p201_p9), 130048   ;;  %s2520_s15 = sshll.u32 (!%p201_p9), %s3330_s22, 7 }
  0x10   : > { %204 = sbr.rel (%p201_p9) target bundleno = 537 (0x219), region = 32  ;;  %v2973_v1 = vld [vmem:[%s4017_s1] sm:$0xff] (!%p201_p9)   ;;  %2524 = vmatprep.subr.bf16.mxu0 (!%p201_p9), %v2972_v0  ;;  %2911 = vmatprep.subr.bf16.mxu1 (!%p201_p9), %v2972_v0  ;;  %p240_p10 = scmp.lt.s32.totalorder (!%p201_p9), %s2336_s7, 63  ;;  %v2975_v3 = vld [vmem:[%s4017_s1 + $0x8] sm:$0xff] (!%p201_p9)   ;;  %v2977_v5 = vld [vmem:[%s4017_s1 + $0x10] sm:$0xff] (!%p201_p9)  }
  0x11   : > { %2525 = vmatpush3.bf16.msra.mxu0 (!%p201_p9), %v2973_v1  ;;  %2919 = vmatpush3.bf16.msra.mxu1 (!%p201_p9), %v2973_v1  ;;  %v2978_v6 = vld [vmem:[%s4017_s1 + $0x58] sm:$0xff] (!%p201_p9)   ;;  %v2980_v8 = vld [vmem:[%s4017_s1 + $0x60] sm:$0xff] (!%p201_p9)   ;;  %v2982_v10 = vld [vmem:[%s4017_s1 + $0x68] sm:$0xff] (!%p201_p9)   ;;  %s3943_s6 = scalar_lea.hbm (!%p201_p9), %s4020_s4, %s2520_s15  ;;  %s3950_s8 = scalar_lea.hbm (!%p201_p9), %s4021_s5, %s2520_s15 }
  0x12   : > { %2526 = vmatprep.subr.bf16.mxu0 (!%p201_p9), %v2974_v2  ;;  %2912 = vmatprep.subr.bf16.mxu1 (!%p201_p9), %v2974_v2  ;;  %v2979_v7 = vld [vmem:[%s4017_s1 + $0x18] sm:$0xff] (!%p201_p9)   ;;  %v2981_v9 = vld [vmem:[%s4017_s1 + $0x20] sm:$0xff] (!%p201_p9)   ;;  %v2983_v13 = vld [vmem:[%s4017_s1 + $0x28] sm:$0xff] (!%p201_p9)   ;;  %s3277_s11 = smov (!%p201_p9), [#allocation2]  }
  0x13   : > { %v2984_v14 = vld [vmem:[%s4017_s1 + $0x70] sm:$0xff] (!%p201_p9)   ;;  %v2986_v16 = vld [vmem:[%s4017_s1 + $0x78] sm:$0xff] (!%p201_p9)   ;;  %v2994_v18 = vld [vmem:[%s4017_s1 + $0xc0] sm:$0xff] (!%p201_p9)  }
  0x14   : > { %v2985_v15 = vld [vmem:[%s4017_s1 + $0x30] sm:$0xff] (!%p201_p9)   ;;  %v2987_v17 = vld [vmem:[%s4017_s1 + $0x38] sm:$0xff] (!%p201_p9)   ;;  %v2995_v21 = vld [vmem:[%s4017_s1 + $0x140] sm:$0xff] (!%p201_p9)  }
  0x15   : > { %2527 = vmatpush3.bf16.msra.mxu0 (!%p201_p9), %v2975_v3  ;;  %2920 = vmatpush3.bf16.msra.mxu1 (!%p201_p9), %v2975_v3  ;;  %v2996_v22 = vld [vmem:[%s4017_s1 + $0x80] sm:$0xff] (!%p201_p9)   ;;  %v2998_v24 = vld [vmem:[%s4017_s1 + $0xc8] sm:$0xff] (!%p201_p9)   ;;  %v3006_v32 = vld [vmem:[%s4017_s1 + $0xd0] sm:$0xff] (!%p201_p9)  }
  0x16   : > { %2528 = vmatprep.subr.bf16.mxu0 (!%p201_p9), %v2976_v4  ;;  %2913 = vmatprep.subr.bf16.mxu1 (!%p201_p9), %v2976_v4  ;;  %v2997_v23 = vld [vmem:[%s4017_s1 + $0x100] sm:$0xff] (!%p201_p9)   ;;  %v3009_v27 = vld [vmem:[%s4017_s1 + $0x148] sm:$0xff] (!%p201_p9)   ;;  %v3007_v33 = vld [vmem:[%s4017_s1 + $0x90] sm:$0xff] (!%p201_p9)  }
  0x17   : > { %s4029_s7 = smov (!%p240_p10, %s2336_s7), 63  ;;  %v2999_v28 = vld [vmem:[%s4017_s1 + $0x88] sm:$0xff]   ;;  %v3008_v34 = vld [vmem:[%s4017_s1 + $0xd8] sm:$0xff]   ;;  %v3018_v38 = vld [vmem:[%s4017_s1 + $0xe0] sm:$0xff]  }
  0x18   : > { %s2927_s26 = smul.u32 28, %s4029_s7  ;;  %v3011_v29 = vld [vmem:[%s4017_s1 + $0x108] sm:$0xff]   ;;  %v3010_v37 = vld [vmem:[%s4017_s1 + $0x98] sm:$0xff]   ;;  %v3029_v41 = vld [vmem:[%s4017_s1 + $0x150] sm:$0xff]   ;;  %s2339_s9 = sshll.u32 %s4029_s7, 3 }
  0x19   : > { %2529 = vmatpush3.bf16.msra.mxu0 %v2977_v5  ;;  %2921 = vmatpush3.bf16.msra.mxu1 %v2977_v5  ;;  %v3019_v42 = vld [vmem:[%s4017_s1 + $0xa0] sm:$0xff]   ;;  %v3020_v43 = vld [vmem:[%s4017_s1 + $0xe8] sm:$0xff]   ;;  %v3031_v44 = vld [vmem:[%s4017_s1 + $0x110] sm:$0xff]   ;;  %s3848_s13 = scalar_lea.vmem %s4019_s3, %s2339_s9  ;;  %s3933_s7 = sand.u32 1, %s3267_s19  }
  0x1a   : > { %2530 = vmatprep.subr.bf16.mxu0 %v2978_v6  ;;  %2914 = vmatprep.subr.bf16.mxu1 %v2978_v6  ;;  %s3391_s12 = scalar_lea.vmem %s4016_s0, %s2927_s26  ;;  %v3021_v47 = vld [vmem:[%s4017_s1 + $0xa8] sm:$0xff]   ;;  %v3028_v50 = vld [vmem:[%s4017_s1 + $0xf0] sm:$0xff]   ;;  %v3041_v52 = vld [vmem:[%s4017_s1 + $0x158] sm:$0xff]   ;;  %s2334_s14 = sshll.u32 %s3933_s7, 3 }
  0x1b   : > { %v2990_v11 = vld [vmem:[%s3391_s12 + $0x4] ss:$28 sps:$4 sm:$0xff]   ;;  %v3000_v25 = vld [vmem:[%s3391_s12 + $0x3c] ss:$28 sps:$4 sm:$0xff]   ;;  %v3012_v35 = vld [vmem:[%s3391_s12 + $0x74] ss:$28 sps:$4 sm:$0xff]  }
  0x1c   : > { %v2993_v12 = vld [vmem:[%s3391_s12 + $0x2a4] ss:$28 sps:$4 sm:$0xff]   ;;  %1421 = vmatprep.mubr.bf16.mxu0 %v2990_v11  ;;  %v3002_v26 = vld [vmem:[%s3391_s12 + $0x2dc] ss:$28 sps:$4 sm:$0xff]   ;;  %v3014_v36 = vld [vmem:[%s3391_s12 + $0x314] ss:$28 sps:$4 sm:$0xff]  }
  0x1d   : > { %2531 = vmatpush3.bf16.msra.mxu0 %v2979_v7  ;;  %2922 = vmatpush3.bf16.msra.mxu1 %v2979_v7  ;;  %v2988_v19 = vld [vmem:[%s3391_s12] ss:$28 sps:$4 sm:$0xff]   ;;  %v3004_v30 = vld [vmem:[%s3391_s12 + $0x38] ss:$28 sps:$4 sm:$0xff]   ;;  %v3016_v39 = vld [vmem:[%s3391_s12 + $0x70] ss:$28 sps:$4 sm:$0xff]  }
  0x1e   : > { %2532 = vmatprep.subr.bf16.mxu0 %v2980_v8  ;;  %2915 = vmatprep.subr.bf16.mxu1 %v2980_v8  ;;  %v2991_v20 = vld [vmem:[%s3391_s12 + $0x2a0] ss:$28 sps:$4 sm:$0xff]   ;;  %v3005_v31 = vld [vmem:[%s3391_s12 + $0x2d8] ss:$28 sps:$4 sm:$0xff]   ;;  %v3017_v40 = vld [vmem:[%s3391_s12 + $0x310] ss:$28 sps:$4 sm:$0xff]  }
  0x1f   : > { %1517 = vmatprep.mubr.bf16.mxu1 %v2993_v12  ;;  %v3022_v45 = vld [vmem:[%s3391_s12 + $0xac] ss:$28 sps:$4 sm:$0xff]   ;;  %v3030_v51 = vld [vmem:[%s4017_s1 + $0xb0] sm:$0xff]   ;;  %v3042_v53 = vld [vmem:[%s4017_s1 + $0x118] sm:$0xff]   ;;  %s231_s16 = scalar_lea.vmem [#allocation2], %s2334_s14  ;;  %s3937_s23 = scalar_lea.vmem [#allocation4], %s2334_s14 }
  0x20   : > { %v3024_v46 = vld [vmem:[%s3391_s12 + $0x34c] ss:$28 sps:$4 sm:$0xff]   ;;  %v3034_v54 = vld [vmem:[%s3391_s12 + $0xe4] ss:$28 sps:$4 sm:$0xff]   ;;  %v3032_v55 = vld [vmem:[%s4017_s1 + $0xf8] sm:$0xff]   ;;  %s2201_s17 = sshll.u32 %s231_s16, 4  ;;  %s3945_s17 = int_to_ptr.vmem [resolvable:$true] %s2201_s17 }
  0x21   : > { %2533 = vmatpush3.bf16.msra.mxu0 %v2981_v9  ;;  %2923 = vmatpush3.bf16.msra.mxu1 %v2981_v9  ;;  %v3026_v48 = vld [vmem:[%s3391_s12 + $0xa8] ss:$28 sps:$4 sm:$0xff]   ;;  %v3033_v57 = vld [vmem:[%s4017_s1 + $0xb8] sm:$0xff]   ;;  %v3049_v5 = vld [vmem:[%s3391_s12 + $0x154] ss:$28 sps:$4 sm:$0xff]   ;;  %s2214_s25 = sshll.u32 %s3937_s23, 4  ;;  %s3952_s25 = int_to_ptr.vmem [resolvable:$true] %s2214_s25 }
  0x22   : > { %2534 = vmatprep.subr.bf16.mxu0 %v2982_v10  ;;  %2916 = vmatprep.subr.bf16.mxu1 %v2982_v10  ;;  %v3027_v49 = vld [vmem:[%s3391_s12 + $0x348] ss:$28 sps:$4 sm:$0xff]   ;;  %v3039_v62 = vld [vmem:[%s3391_s12 + $0xe0] ss:$28 sps:$4 sm:$0xff]   ;;  %v3047_v3 = vld [vmem:[%s3391_s12 + $0x118] ss:$28 sps:$4 sm:$0xff]  }
  0x23   : > { %v3038_v56 = vld [vmem:[%s3391_s12 + $0xc] ss:$28 sps:$4 sm:$0xff]   ;;  %v3040_v58 = vld [vmem:[%s4017_s1 + $0x180] sm:$0xff]   ;;  %v3043_v63 = vld [vmem:[%s3391_s12 + $0x11c] ss:$28 sps:$4 sm:$0xff]   ;;  %s2179_s9 = scalar_lea.sflag [#allocation3], %s3933_s7 }
  0x24   : > { %v3036_v59 = vld [vmem:[%s3391_s12 + $0x8] ss:$28 sps:$4 sm:$0xff]   ;;  %v3048_v4 = vld [vmem:[%s3391_s12 + $0x40] ss:$28 sps:$4 sm:$0xff]   ;;  %v3077_v7 = vld [vmem:[%s4017_s1 + $0x170] sm:$0xff]   ;;  %s3181_s10 = scalar_lea.vmem %s3945_s17, 128 }
  0x25   : > { %2535 = vmatpush3.bf16.msra.mxu0 %v2983_v13  ;;  %2924 = vmatpush3.bf16.msra.mxu1 %v2983_v13  ;;  %v3055_v60 = vld [vmem:[%s4017_s1 + $0x160] sm:$0xff]   ;;  %v3063_v1 = vld [vmem:[%s4017_s1 + $0x168] sm:$0xff]   ;;  %v3051_v6 = vld [vmem:[%s3391_s12 + $0x7c] ss:$28 sps:$4 sm:$0xff]   ;;  %p3182_p11 = scmp.ne.s32.totalorder %s3945_s17, %s3181_s10 }
  0x26   : > { %2536 = vmatprep.subr.bf16.mxu0 %v2984_v14  ;;  %2917 = vmatprep.subr.bf16.mxu1 %v2984_v14  ;;  %v3056_v61 = vld [vmem:[%s4017_s1 + $0x120] sm:$0xff]   ;;  %v3064_v2 = vld [vmem:[%s4017_s1 + $0x128] sm:$0xff]   ;;  %v3078_v8 = vld [vmem:[%s4017_s1 + $0x130] sm:$0xff]  }
  0x27   : > { %v3045_v0 = vld [vmem:[%s3391_s12 + $0x44] ss:$28 sps:$4 sm:$0xff]   ;;  %v3053_v9 = vld [vmem:[%s3391_s12 + $0x150] ss:$28 sps:$4 sm:$0xff]   ;;  %v3054_v10 = vld [vmem:[%s3391_s12 + $0x78] ss:$28 sps:$4 sm:$0xff]   ;;  %p3183_p12 = pnand %p3182_p11, %p3347_p5 }
  0x28   : > { %v3057_v11 = vld [vmem:[%s3391_s12 + $0x18c] ss:$28 sps:$4 sm:$0xff]   ;;  %v3085_v12 = vld [vmem:[%s4017_s1 + $0x178] sm:$0xff]   ;;  %v3059_v14 = vld [vmem:[%s3391_s12 + $0xb4] ss:$28 sps:$4 sm:$0xff]  }
  0x29   : > { %2537 = vmatpush3.bf16.msra.mxu0 %v2985_v15  ;;  %2925 = vmatpush3.bf16.msra.mxu1 %v2985_v15  ;;  %v3086_v13 = vld [vmem:[%s4017_s1 + $0x138] sm:$0xff]   ;;  %v3061_v15 = vld [vmem:[%s3391_s12 + $0x188] ss:$28 sps:$4 sm:$0xff]   ;;  %p3184_p13 = pneg %p3183_p12 }
  0x2a   : > { %2538 = vmatprep.subr.bf16.mxu0 %v2986_v16  ;;  %2918 = vmatprep.subr.bf16.mxu1 %v2986_v16  ;;  %v3062_v16 = vld [vmem:[%s3391_s12 + $0xb0] ss:$28 sps:$4 sm:$0xff]  }
  0x2d   : > { %2539 = vmatpush3.bf16.msra.mxu0 %v2987_v17  ;;  %2926 = vmatpush3.bf16.msra.mxu1 %v2987_v17  ;;  %v3065_v17 = vld [vmem:[%s3391_s12 + $0x1c4] ss:$28 sps:$4 sm:$0xff]  }
  0x2e   : > { %2636 = vmatprep.subr.bf16.mxu1 %v2994_v18  ;;  %2748 = vmatprep.subr.bf16.mxu0 %v2995_v21  ;;  %v3067_v18 = vld [vmem:[%s3391_s12 + $0xec] ss:$28 sps:$4 sm:$0xff]   ;;  %v3071_v21 = vld [vmem:[%s3391_s12 + $0x1fc] ss:$28 sps:$4 sm:$0xff]  }
  0x30   : > { %1422 = vmatmul.mubr.bf16.vlgmr.msra.gmra.mrb[0].mxu0 %v2988_v19  ;;  %1518 = vmatmul.mubr.bf16.vlgmr.msra.gmra.mrb[0].mxu1 %v2991_v20  ;;  %v3069_v19 = vld [vmem:[%s3391_s12 + $0x1c0] ss:$28 sps:$4 sm:$0xff]   ;;  %v3070_v20 = vld [vmem:[%s3391_s12 + $0xe8] ss:$28 sps:$4 sm:$0xff]  }
  0x31   : > { %2637 = vmatpush3.bf16.msra.mxu1 %v2996_v22  ;;  %2749 = vmatpush3.bf16.msra.mxu0 %v2997_v23  ;;  %v3073_v22 = vld [vmem:[%s3391_s12 + $0x124] ss:$28 sps:$4 sm:$0xff]   ;;  %v3075_v23 = vld [vmem:[%s3391_s12 + $0x1f8] ss:$28 sps:$4 sm:$0xff]  }
  0x32   : > { %2638 = vmatprep.subr.bf16.mxu1 %v2998_v24  ;;  %1429 = vmatprep.mubr.bf16.mxu0 %v3000_v25  ;;  %v3076_v24 = vld [vmem:[%s3391_s12 + $0x120] ss:$28 sps:$4 sm:$0xff]   ;;  %v3079_v25 = vld [vmem:[%s3391_s12 + $0x234] ss:$28 sps:$4 sm:$0xff]  }
  0x33   : > { %1525 = vmatprep.mubr.bf16.mxu1 %v3002_v26  ;;  %2750 = vmatprep.subr.bf16.mxu0 %v3009_v27  ;;  %v3081_v26 = vld [vmem:[%s3391_s12 + $0x15c] ss:$28 sps:$4 sm:$0xff]   ;;  %v3083_v27 = vld [vmem:[%s3391_s12 + $0x230] ss:$28 sps:$4 sm:$0xff]  }
  0x35   : > { %2639 = vmatpush3.bf16.msra.mxu1 %v2999_v28  ;;  %2751 = vmatpush3.bf16.msra.mxu0 %v3011_v29  ;;  %v3084_v28 = vld [vmem:[%s3391_s12 + $0x158] ss:$28 sps:$4 sm:$0xff]   ;;  %v3087_v29 = vld [vmem:[%s3391_s12 + $0x26c] ss:$28 sps:$4 sm:$0xff]  }
  0x36   : > { %2640 = vmatprep.subr.bf16.mxu1 %v3006_v32  ;;  %2752 = vmatprep.subr.bf16.mxu0 %v3029_v41  ;;  %v3092_v32 = vld [vmem:[%s3391_s12 + $0x190] ss:$28 sps:$4 sm:$0xff]   ;;  %v3105_v41 = vld [vmem:[%s3391_s12 + $0x23c] ss:$28 sps:$4 sm:$0xff]  }
  0x38   : > { %1430 = vmatmul.mubr.bf16.gmra.mrb[4].mxu0 %v3004_v30  ;;  %1526 = vmatmul.mubr.bf16.gmra.mrb[4].mxu1 %v3005_v31  ;;  %v3089_v30 = vld [vmem:[%s3391_s12 + $0x194] ss:$28 sps:$4 sm:$0xff]   ;;  %v3091_v31 = vld [vmem:[%s3391_s12 + $0x268] ss:$28 sps:$4 sm:$0xff]  }
  0x39   : > { %2641 = vmatpush3.bf16.msra.mxu1 %v3007_v33  ;;  %1437 = vmatprep.mubr.bf16.mxu0 %v3012_v35  ;;  %v3093_v33 = vld [vmem:[%s3391_s12 + $0x1cc] ss:$28 sps:$4 sm:$0xff]  }
  0x3a   : > { %2642 = vmatprep.subr.bf16.mxu1 %v3008_v34  ;;  %1533 = vmatprep.mubr.bf16.mxu1 %v3014_v36  ;;  %v3097_v34 = vld [vmem:[%s3391_s12 + $0x14] ss:$28 sps:$4 sm:$0xff]   ;;  %v3098_v36 = vld [vmem:[%s3391_s12 + $0x1c8] ss:$28 sps:$4 sm:$0xff]  }
  0x3b   : > { %2753 = vmatpush3.bf16.msra.mxu0 %v3031_v44  ;;  %v3095_v35 = vld [vmem:[%s3391_s12 + $0x10] ss:$28 sps:$4 sm:$0xff]   ;;  %v3110_v44 = vld [vmem:[%s3391_s12 + $0x80] ss:$28 sps:$4 sm:$0xff]  }
  0x3c   : > { %2754 = vmatprep.subr.bf16.mxu0 %v3041_v52  ;;  %v3122_v52 = vld [vmem:[%s3391_s12 + $0xf0] ss:$28 sps:$4 sm:$0xff]  }
  0x3d   : > { %2643 = vmatpush3.bf16.msra.mxu1 %v3010_v37  ;;  %v3099_v37 = vld [vmem:[%s3391_s12 + $0x204] ss:$28 sps:$4 sm:$0xff]  }
  0x3e   : > { %2644 = vmatprep.subr.bf16.mxu1 %v3018_v38  ;;  %v3101_v38 = vld [vmem:[%s3391_s12 + $0x4c] ss:$28 sps:$4 sm:$0xff]  }
  0x3f   : > { %2755 = vmatpush3.bf16.msra.mxu0 %v3042_v53  ;;  %v3123_v53 = vld [vmem:[%s3391_s12 + $0x2e4] ss:$28 sps:$4 sm:$0xff]  }
  0x40   : > { %1438 = vmatmul.mubr.bf16.gmra.mrb[8].mxu0 %v3016_v39  ;;  %1534 = vmatmul.mubr.bf16.gmra.mrb[8].mxu1 %v3017_v40  ;;  %v3103_v39 = vld [vmem:[%s3391_s12 + $0x200] ss:$28 sps:$4 sm:$0xff]   ;;  %v3104_v40 = vld [vmem:[%s3391_s12 + $0x48] ss:$28 sps:$4 sm:$0xff]  }
  0x41   : > { %2645 = vmatpush3.bf16.msra.mxu1 %v3019_v42  ;;  %1445 = vmatprep.mubr.bf16.mxu0 %v3022_v45  ;;  %v3107_v42 = vld [vmem:[%s3391_s12 + $0x84] ss:$28 sps:$4 sm:$0xff]   ;;  %v3111_v45 = vld [vmem:[%s3391_s12 + $0x274] ss:$28 sps:$4 sm:$0xff]  }
  0x42   : > { %2646 = vmatprep.subr.bf16.mxu1 %v3020_v43  ;;  %1541 = vmatprep.mubr.bf16.mxu1 %v3024_v46  ;;  %v3109_v43 = vld [vmem:[%s3391_s12 + $0x238] ss:$28 sps:$4 sm:$0xff]  }
  0x43   : > { %2756 = vmatprep.subr.bf16.mxu0 %v3055_v60  ;;  %v3113_v46 = vld [vmem:[%s3391_s12 + $0xbc] ss:$28 sps:$4 sm:$0xff]  }
  0x44   : > { %2757 = vmatpush3.bf16.msra.mxu0 %v3056_v61  ;;  %v3134_v60 = vld [vmem:[%s3391_s12 + $0x160] ss:$28 sps:$4 sm:$0xff]   ;;  %v3135_v61 = vld [vmem:[%s3391_s12 + $0x354] ss:$28 sps:$4 sm:$0xff]  }
  0x45   : > { %2647 = vmatpush3.bf16.msra.mxu1 %v3021_v47  ;;  %2758 = vmatprep.subr.bf16.mxu0 %v3063_v1  ;;  %v3115_v47 = vld [vmem:[%s3391_s12 + $0x270] ss:$28 sps:$4 sm:$0xff]  }
  0x46   : > { %2648 = vmatprep.subr.bf16.mxu1 %v3028_v50  ;;  %v3119_v50 = vld [vmem:[%s3391_s12 + $0xf4] ss:$28 sps:$4 sm:$0xff]  }
  0x47   : > { %v3141_v1 = vld [vmem:[%s3391_s12 + $0x1d4] ss:$28 sps:$4 sm:$0xff]  }
  0x48   : > { %1446 = vmatmul.mubr.bf16.gmra.mrb[12].mxu0 %v3026_v48  ;;  %1542 = vmatmul.mubr.bf16.gmra.mrb[12].mxu1 %v3027_v49  ;;  %v3116_v48 = vld [vmem:[%s3391_s12 + $0xb8] ss:$28 sps:$4 sm:$0xff]   ;;  %v3117_v49 = vld [vmem:[%s3391_s12 + $0x2ac] ss:$28 sps:$4 sm:$0xff]  }
  0x49   : > { %2649 = vmatpush3.bf16.msra.mxu1 %v3030_v51  ;;  %1453 = vmatprep.mubr.bf16.mxu0 %v3034_v54  ;;  %v3121_v51 = vld [vmem:[%s3391_s12 + $0x2a8] ss:$28 sps:$4 sm:$0xff]  }
  0x4a   : > { %2650 = vmatprep.subr.bf16.mxu1 %v3032_v55  ;;  %1582 = vmatprep.mubr.bf16.mxu1 %v3038_v56  ;;  %v3125_v54 = vld [vmem:[%s3391_s12 + $0x12c] ss:$28 sps:$4 sm:$0xff]   ;;  %v3127_v55 = vld [vmem:[%s3391_s12 + $0x2e0] ss:$28 sps:$4 sm:$0xff]  }
  0x4b   : > { %2759 = vmatpush3.bf16.msra.mxu0 %v3064_v2  ;;  %v3128_v56 = vld [vmem:[%s3391_s12 + $0x128] ss:$28 sps:$4 sm:$0xff]   ;;  %v3143_v2 = vld [vmem:[%s3391_s12 + $0x18] ss:$28 sps:$4 sm:$0xff]  }
  0x4c   : > { %2760 = vmatprep.subr.bf16.mxu0 %v3077_v7  ;;  %v3149_v7 = vld [vmem:[%s3391_s12 + $0x208] ss:$28 sps:$4 sm:$0xff]  }
  0x4d   : > { %2651 = vmatpush3.bf16.msra.mxu1 %v3033_v57  ;;  %v3129_v57 = vld [vmem:[%s3391_s12 + $0x31c] ss:$28 sps:$4 sm:$0xff]  }
  0x4e   : > { %2877 = vmatprep.subr.bf16.mxu1 %v3040_v58 }
  0x4f   : > { %2761 = vmatpush3.bf16.msra.mxu0 %v3078_v8  ;;  %v3150_v8 = vld [vmem:[%s3391_s12 + $0xc0] ss:$28 sps:$4 sm:$0xff]  }
  0x50   : > { %1454 = vmatmul.mubr.bf16.gmra.mrb[16].mxu0 %v3039_v62  ;;  %1583 = vmatmul.mubr.bf16.vlgmr.msra.gmra.mrb[16].mxu1 %v3036_v59  ;;  %v3133_v59 = vld [vmem:[%s3391_s12 + $0x318] ss:$28 sps:$4 sm:$0xff]  }
  0x51   : > { %2878 = vmatpush3.bf16.msra.mxu1 %v3040_v58  ;;  %1461 = vmatprep.mubr.bf16.mxu0 %v3043_v63  ;;  %v3131_v58 = vld [vmem:[%s3391_s12 + $0x164] ss:$28 sps:$4 sm:$0xff]   ;;  %v3137_v62 = vld [vmem:[%s3391_s12 + $0x19c] ss:$28 sps:$4 sm:$0xff]   ;;  %v3139_v63 = vld [vmem:[%s3391_s12 + $0x350] ss:$28 sps:$4 sm:$0xff]  }
  0x52   : > { %1590 = vmatprep.mubr.bf16.mxu1 %v3045_v0  ;;  %2762 = vmatprep.subr.bf16.mxu0 %v3085_v12  ;;  %v3140_v0 = vld [vmem:[%s3391_s12 + $0x198] ss:$28 sps:$4 sm:$0xff]   ;;  %v3155_v12 = vld [vmem:[%s3391_s12 + $0x130] ss:$28 sps:$4 sm:$0xff]  }
  0x53   : > { %2763 = vmatpush3.bf16.msra.mxu0 %v3086_v13  ;;  %v3156_v13 = vld [vmem:[%s3391_s12 + $0x27c] ss:$28 sps:$4 sm:$0xff]  }
  0x58   : > { %1462 = vmatmul.mubr.bf16.gmra.mrb[20].mxu0 %v3047_v3  ;;  %1591 = vmatmul.mubr.bf16.gmra.mrb[20].mxu1 %v3048_v4  ;;  %v3144_v3 = vld [vmem:[%s3391_s12 + $0x1d0] ss:$28 sps:$4 sm:$0xff]  }
  0x59   : > { %1469 = vmatprep.mubr.bf16.mxu0 %v3049_v5  ;;  %1598 = vmatprep.mubr.bf16.mxu1 %v3051_v6  ;;  %v3145_v4 = vld [vmem:[%s3391_s12 + $0x50] ss:$28 sps:$4 sm:$0xff]   ;;  %v3148_v6 = vld [vmem:[%s3391_s12 + $0x88] ss:$28 sps:$4 sm:$0xff]  }
  0x5a   : > { %v3146_v5 = vld [vmem:[%s3391_s12 + $0x20c] ss:$28 sps:$4 sm:$0xff]  }
  0x60   : > { %1470 = vmatmul.mubr.bf16.gmra.mrb[24].mxu0 %v3053_v9  ;;  %1599 = vmatmul.mubr.bf16.gmra.mrb[24].mxu1 %v3054_v10  ;;  %v3151_v9 = vld [vmem:[%s3391_s12 + $0x244] ss:$28 sps:$4 sm:$0xff]   ;;  %v3153_v10 = vld [vmem:[%s3391_s12 + $0xf8] ss:$28 sps:$4 sm:$0xff]  }
  0x61   : > { %1477 = vmatprep.mubr.bf16.mxu0 %v3057_v11  ;;  %1606 = vmatprep.mubr.bf16.mxu1 %v3059_v14  ;;  %v3154_v11 = vld [vmem:[%s3391_s12 + $0x240] ss:$28 sps:$4 sm:$0xff]   ;;  %v3158_v14 = vld [vmem:[%s3391_s12 + $0x168] ss:$28 sps:$4 sm:$0xff]  }
  0x68   : > { %1478 = vmatmul.mubr.bf16.gmra.mrb[28].mxu0 %v3061_v15  ;;  %1607 = vmatmul.mubr.bf16.gmra.mrb[28].mxu1 %v3062_v16  ;;  %v3159_v15 = vld [vmem:[%s3391_s12 + $0x278] ss:$28 sps:$4 sm:$0xff]   ;;  %v3160_v16 = vld [vmem:[%s3391_s12 + $0x1a0] ss:$28 sps:$4 sm:$0xff]  }
  0x69   : > { %1485 = vmatprep.mubr.bf16.mxu0 %v3065_v17  ;;  %1614 = vmatprep.mubr.bf16.mxu1 %v3067_v18  ;;  %v3161_v17 = vld [vmem:[%s3391_s12 + $0x2b4] ss:$28 sps:$4 sm:$0xff]  }
  0x6a   : > { %v3163_v18 = vld [vmem:[%s3391_s12 + $0x1d8] ss:$28 sps:$4 sm:$0xff]  }
  0x70   : > { %1486 = vmatmul.mubr.bf16.gmra.mrb[32].mxu0 %v3069_v19  ;;  %1615 = vmatmul.mubr.bf16.gmra.mrb[32].mxu1 %v3070_v20  ;;  %v3164_v19 = vld [vmem:[%s3391_s12 + $0x2b0] ss:$28 sps:$4 sm:$0xff]  }
  0x71   : > { %1493 = vmatprep.mubr.bf16.mxu0 %v3071_v21  ;;  %1622 = vmatprep.mubr.bf16.mxu1 %v3073_v22  ;;  %v3165_v20 = vld [vmem:[%s3391_s12 + $0x210] ss:$28 sps:$4 sm:$0xff]   ;;  %v3168_v22 = vld [vmem:[%s3391_s12 + $0x248] ss:$28 sps:$4 sm:$0xff]  }
  0x72   : > { %v3166_v21 = vld [vmem:[%s3391_s12 + $0x2ec] ss:$28 sps:$4 sm:$0xff]  }
  0x78   : > { %1494 = vmatmul.mubr.bf16.gmra.mrb[36].mxu0 %v3075_v23  ;;  %1623 = vmatmul.mubr.bf16.gmra.mrb[36].mxu1 %v3076_v24  ;;  %v3169_v23 = vld [vmem:[%s3391_s12 + $0x2e8] ss:$28 sps:$4 sm:$0xff]   ;;  %v3170_v24 = vld [vmem:[%s3391_s12 + $0x280] ss:$28 sps:$4 sm:$0xff]  }
  0x79   : > { %1501 = vmatprep.mubr.bf16.mxu0 %v3079_v25  ;;  %1630 = vmatprep.mubr.bf16.mxu1 %v3081_v26  ;;  %v3171_v25 = vld [vmem:[%s3391_s12 + $0x324] ss:$28 sps:$4 sm:$0xff]   ;;  %v3173_v26 = vld [vmem:[%s3391_s12 + $0x2b8] ss:$28 sps:$4 sm:$0xff]  }
  0x80   : > { %1502 = vmatmul.mubr.bf16.gmra.mrb[40].mxu0 %v3083_v27  ;;  %1631 = vmatmul.mubr.bf16.gmra.mrb[40].mxu1 %v3084_v28  ;;  %v3174_v27 = vld [vmem:[%s3391_s12 + $0x320] ss:$28 sps:$4 sm:$0xff]   ;;  %v3175_v28 = vld [vmem:[%s3391_s12 + $0x2f0] ss:$28 sps:$4 sm:$0xff]  }
  0x81   : > { %1509 = vmatprep.mubr.bf16.mxu0 %v3087_v29  ;;  %1638 = vmatprep.mubr.bf16.mxu1 %v3089_v30  ;;  %v3176_v29 = vld [vmem:[%s3391_s12 + $0x35c] ss:$28 sps:$4 sm:$0xff]   ;;  %v3178_v30 = vld [vmem:[%s3391_s12 + $0x328] ss:$28 sps:$4 sm:$0xff]  }
  0x88   : > { %1510 = vmatmul.mubr.bf16.gmra.mrb[44].mxu0 %v3091_v31  ;;  %1639 = vmatmul.mubr.bf16.gmra.mrb[44].mxu1 %v3092_v32 }
  0x89   : > { %1646 = vmatprep.mubr.bf16.mxu1 %v3093_v33  ;;  %1743 = vmatprep.mubr.bf16.mxu0 %v3097_v34 }
  0x90   : > { %1647 = vmatmul.mubr.bf16.gmra.mrb[48].mxu1 %v3098_v36  ;;  %1744 = vmatmul.mubr.bf16.vlgmr.msra.gmra.mrb[48].mxu0 %v3095_v35  ;;  %v3179_v35 = vld [vmem:[%s3391_s12 + $0x358] ss:$28 sps:$4 sm:$0xff]   ;;  %v3180_v36 = vld [vmem:[%s3391_s12 + $0x360] ss:$28 sps:$4 sm:$0xff]  }
  0x91   : > { %1654 = vmatprep.mubr.bf16.mxu1 %v3099_v37  ;;  %1751 = vmatprep.mubr.bf16.mxu0 %v3101_v38 }
  0x98   : > { %1655 = vmatmul.mubr.bf16.gmra.mrb[52].mxu1 %v3103_v39  ;;  %1752 = vmatmul.mubr.bf16.gmra.mrb[52].mxu0 %v3104_v40 }
  0x99   : > { %1662 = vmatprep.mubr.bf16.mxu1 %v3105_v41  ;;  %1759 = vmatprep.mubr.bf16.mxu0 %v3107_v42 }
  0xa0   : > { %1663 = vmatmul.mubr.bf16.gmra.mrb[56].mxu1 %v3109_v43  ;;  %1760 = vmatmul.mubr.bf16.gmra.mrb[56].mxu0 %v3110_v44 }
  0xa1   : > { %1670 = vmatprep.mubr.bf16.mxu1 %v3111_v45  ;;  %1767 = vmatprep.mubr.bf16.mxu0 %v3113_v46 }
  0xa8   : > { %1671 = vmatmul.mubr.bf16.gmra.mrb[60].mxu1 %v3115_v47  ;;  %1768 = vmatmul.mubr.bf16.gmra.mrb[60].mxu0 %v3116_v48 }
  0xa9   : > { %1678 = vmatprep.mubr.bf16.mxu1 %v3117_v49  ;;  %1775 = vmatprep.mubr.bf16.mxu0 %v3119_v50 }
  0xb0   : > { %1679 = vmatmul.mubr.bf16.gmra.mrb[64].mxu1 %v3121_v51  ;;  %1776 = vmatmul.mubr.bf16.gmra.mrb[64].mxu0 %v3122_v52 }
  0xb1   : > { %1686 = vmatprep.mubr.bf16.mxu1 %v3123_v53  ;;  %1783 = vmatprep.mubr.bf16.mxu0 %v3125_v54 }
  0xb8   : > { %1687 = vmatmul.mubr.bf16.gmra.mrb[68].mxu1 %v3127_v55  ;;  %1784 = vmatmul.mubr.bf16.gmra.mrb[68].mxu0 %v3128_v56 }
  0xb9   : > { %1694 = vmatprep.mubr.bf16.mxu1 %v3129_v57  ;;  %1791 = vmatprep.mubr.bf16.mxu0 %v3131_v58 }
  0xc0   : > { %1695 = vmatmul.mubr.bf16.gmra.mrb[72].mxu1 %v3133_v59  ;;  %1792 = vmatmul.mubr.bf16.gmra.mrb[72].mxu0 %v3134_v60 }
  0xc1   : > { %1702 = vmatprep.mubr.bf16.mxu1 %v3135_v61  ;;  %1799 = vmatprep.mubr.bf16.mxu0 %v3137_v62 }
  0xc8   : > { %1703 = vmatmul.mubr.bf16.gmra.mrb[76].mxu1 %v3139_v63  ;;  %1800 = vmatmul.mubr.bf16.gmra.mrb[76].mxu0 %v3140_v0 }
  0xc9   : > { %1807 = vmatprep.mubr.bf16.mxu0 %v3141_v1  ;;  %2879 = vmatprep.mubr.msk.bf16.mxu1 %vm1340_vm0, %v3143_v2 }
  0xd0   : > { %1808 = vmatmul.mubr.bf16.gmra.mrb[80].mxu0 %v3144_v3  ;;  %2880 = vmatmul.mubr.msk.bf16.vlgmr.msra.gmra.mrb[80].mxu1 %vm1340_vm0, %v3145_v4 }
  0xd1   : > { %1815 = vmatprep.mubr.bf16.mxu0 %v3146_v5  ;;  %2883 = vmatprep.mubr.msk.bf16.mxu1 %vm1340_vm0, %v3148_v6 }
  0xd8   : > { %1816 = vmatmul.mubr.bf16.gmra.mrb[84].mxu0 %v3149_v7  ;;  %2884 = vmatmul.mubr.msk.bf16.gmra.mrb[84].mxu1 %vm1340_vm0, %v3150_v8 }
  0xd9   : > { %1823 = vmatprep.mubr.bf16.mxu0 %v3151_v9  ;;  %2887 = vmatprep.mubr.msk.bf16.mxu1 %vm1340_vm0, %v3153_v10 }
  0xe0   : > { %1824 = vmatmul.mubr.bf16.gmra.mrb[88].mxu0 %v3154_v11  ;;  %2888 = vmatmul.mubr.msk.bf16.gmra.mrb[88].mxu1 %vm1340_vm0, %v3155_v12 }
  0xe1   : > { %1831 = vmatprep.mubr.bf16.mxu0 %v3156_v13  ;;  %2891 = vmatprep.mubr.msk.bf16.mxu1 %vm1340_vm0, %v3158_v14 }
  0xe8   : > { %1832 = vmatmul.mubr.bf16.gmra.mrb[92].mxu0 %v3159_v15  ;;  %2892 = vmatmul.mubr.msk.bf16.gmra.mrb[92].mxu1 %vm1340_vm0, %v3160_v16 }
  0xe9   : > { %1839 = vmatprep.mubr.bf16.mxu0 %v3161_v17  ;;  %2895 = vmatprep.mubr.msk.bf16.mxu1 %vm1340_vm0, %v3163_v18  ;;  %v3660_v17 = vld [vmem:[%s4018_s2] ss:$0 sm:$0xff] }
  0xf0   : > { %1840 = vmatmul.mubr.bf16.gmra.mrb[96].mxu0 %v3164_v19  ;;  %2896 = vmatmul.mubr.msk.bf16.gmra.mrb[96].mxu1 %vm1340_vm0, %v3165_v20 }
  0xf1   : > { %1847 = vmatprep.mubr.bf16.mxu0 %v3166_v21  ;;  %2899 = vmatprep.mubr.msk.bf16.mxu1 %vm1340_vm0, %v3168_v22 }
  0xf8   : > { %1848 = vmatmul.mubr.bf16.gmra.mrb[100].mxu0 %v3169_v23  ;;  %2900 = vmatmul.mubr.msk.bf16.gmra.mrb[100].mxu1 %vm1340_vm0, %v3170_v24 }
  0xf9   : > { %1855 = vmatprep.mubr.bf16.mxu0 %v3171_v25  ;;  %2903 = vmatprep.mubr.msk.bf16.mxu1 %vm1340_vm0, %v3173_v26 }
 0x100   : > { %1856 = vmatmul.mubr.bf16.gmra.mrb[104].mxu0 %v3174_v27  ;;  %2904 = vmatmul.mubr.msk.bf16.gmra.mrb[104].mxu1 %vm1340_vm0, %v3175_v28 }
 0x101   : > { %1863 = vmatprep.mubr.bf16.mxu0 %v3176_v29  ;;  %2907 = vmatprep.mubr.msk.bf16.mxu1 %vm1340_vm0, %v3178_v30 }
 0x103   : > { %v2540_v31 = vpop.f32.mrb[0].mxu0  ;;  %v2612_v32 = vpop.f32.mrb[0].mxu1 }
 0x104   : > { %v2541_v33 = vpop.f32.mrb[1].mxu0  ;;  %v2613_v34 = vpop.f32.mrb[1].mxu1 }
 0x105   : > { %v2542_v37 = vadd.f32 %v2541_v33, %v2540_v31  ;;  %v3640_v38 = vadd.f32 %v2613_v34, %v2612_v32  ;;  %v2543_v39 = vpop.f32.mrb[2].mxu0  ;;  %v2615_v40 = vpop.f32.mrb[2].mxu1 }
 0x106   : > { %v2544_v41 = vpop.f32.mrb[3].mxu0  ;;  %v2616_v42 = vpop.f32.mrb[3].mxu1 }
 0x107   : > { %v2545_v43 = vadd.f32 %v2544_v41, %v2543_v39  ;;  %v3642_v44 = vadd.f32 %v2616_v42, %v2615_v40  ;;  %v1424_v22 = vadd.f32 %v2542_v37, %v3660_v17 }
 0x108   : > { %1864 = vmatmul.mubr.bf16.gmra.mrb[108].mxu0 %v3179_v35  ;;  %2908 = vmatmul.mubr.msk.bf16.gmra.mrb[108].mxu1 %vm1340_vm0, %v3180_v36 }
 0x109   : > { %v1427_v29 = vadd.f32 %v2545_v43, %v3660_v17 }
 0x10b   : > { %v2546_v45 = vpop.f32.mrb[4].mxu0  ;;  %v2618_v46 = vpop.f32.mrb[4].mxu1 }
 0x10c   : > { %v2547_v47 = vpop.f32.mrb[5].mxu0  ;;  %v2619_v48 = vpop.f32.mrb[5].mxu1 }
 0x10d   : > { %v2548_v49 = vadd.f32 %v2547_v47, %v2546_v45  ;;  %v3645_v50 = vadd.f32 %v2619_v48, %v2618_v46  ;;  %v2549_v51 = vpop.f32.mrb[6].mxu0  ;;  %v2621_v52 = vpop.f32.mrb[6].mxu1 }
 0x10e   : > { %v2550_v53 = vpop.f32.mrb[7].mxu0  ;;  %v2622_v54 = vpop.f32.mrb[7].mxu1 }
 0x10f   : > { %v2551_v55 = vadd.f32 %v2550_v53, %v2549_v51  ;;  %v3647_v56 = vadd.f32 %v2622_v54, %v2621_v52  ;;  %v1432_v37 = vadd.f32 %v2548_v49, %v3660_v17 }
 0x111   : > { %v1435_v43 = vadd.f32 %v2551_v55, %v3660_v17 }
 0x113   : > { %v2552_v57 = vpop.f32.mrb[8].mxu0  ;;  %v2624_v58 = vpop.f32.mrb[8].mxu1 }
 0x114   : > { %v2553_v59 = vpop.f32.mrb[9].mxu0  ;;  %v2625_v60 = vpop.f32.mrb[9].mxu1 }
 0x115   : > { %v2554_v61 = vadd.f32 %v2553_v59, %v2552_v57  ;;  %v3649_v62 = vadd.f32 %v2625_v60, %v2624_v58  ;;  %v2555_v63 = vpop.f32.mrb[10].mxu0  ;;  %v2627_v0 = vpop.f32.mrb[10].mxu1 }
 0x116   : > { %v2556_v1 = vpop.f32.mrb[11].mxu0  ;;  %v2628_v2 = vpop.f32.mrb[11].mxu1 }
 0x117   : > { %v2557_v3 = vadd.f32 %v2556_v1, %v2555_v63  ;;  %v3651_v4 = vadd.f32 %v2628_v2, %v2627_v0  ;;  %v1440_v49 = vadd.f32 %v2554_v61, %v3660_v17 }
 0x119   : > { %v1443_v55 = vadd.f32 %v2557_v3, %v3660_v17 }
 0x11b   : > { %v2558_v5 = vpop.f32.mrb[12].mxu0  ;;  %v2630_v6 = vpop.f32.mrb[12].mxu1 }
 0x11c   : > { %v2559_v7 = vpop.f32.mrb[13].mxu0  ;;  %v2631_v8 = vpop.f32.mrb[13].mxu1 }
 0x11d   : > { %v2560_v9 = vadd.f32 %v2559_v7, %v2558_v5  ;;  %v3653_v10 = vadd.f32 %v2631_v8, %v2630_v6  ;;  %v2561_v11 = vpop.f32.mrb[14].mxu0  ;;  %v2633_v12 = vpop.f32.mrb[14].mxu1 }
 0x11e   : > { %v2562_v13 = vpop.f32.mrb[15].mxu0  ;;  %v2634_v14 = vpop.f32.mrb[15].mxu1 }
 0x11f   : > { %v2563_v15 = vadd.f32 %v2562_v13, %v2561_v11  ;;  %v3655_v16 = vadd.f32 %v2634_v14, %v2633_v12  ;;  %v1448_v61 = vadd.f32 %v2560_v9, %v3660_v17 }
 0x121   : > { %v1451_v3 = vadd.f32 %v2563_v15, %v3660_v17 }
 0x123   : > { %v2564_v18 = vpop.f32.mrb[16].mxu0  ;;  %v2652_v19 = vpop.f32.mrb[16].mxu1 }
 0x124   : > { %v2565_v20 = vpop.f32.mrb[17].mxu0  ;;  %v2653_v21 = vpop.f32.mrb[17].mxu1 }
 0x125   : > { %v3663_v23 = vadd.f32 %v2565_v20, %v2564_v18  ;;  %v2654_v24 = vadd.f32 %v2653_v21, %v2652_v19  ;;  %v2567_v25 = vpop.f32.mrb[18].mxu0  ;;  %v2655_v26 = vpop.f32.mrb[18].mxu1 }
 0x126   : > { %v2568_v27 = vpop.f32.mrb[19].mxu0  ;;  %v2656_v28 = vpop.f32.mrb[19].mxu1 }
 0x127   : > { %v3666_v30 = vadd.f32 %v2654_v24, %v1424_v22  ;;  %v2569_v31 = vadd.f32 %v2568_v27, %v2567_v25  ;;  %v2657_v32 = vadd.f32 %v2656_v28, %v2655_v26  ;;  %v1456_v9 = vadd.f32 %v3663_v23, %v3660_v17 }
 0x129   : > { %v3668_v33 = vadd.f32 %v2657_v32, %v1427_v29 }
 0x12b   : > { %v2570_v34 = vpop.f32.mrb[20].mxu0  ;;  %v2658_v35 = vpop.f32.mrb[20].mxu1 }
 0x12c   : > { %v2571_v36 = vpop.f32.mrb[21].mxu0  ;;  %v2659_v39 = vpop.f32.mrb[21].mxu1 }
 0x12d   : > { %v3671_v40 = vadd.f32 %v2571_v36, %v2570_v34  ;;  %v2660_v41 = vadd.f32 %v2659_v39, %v2658_v35  ;;  %v2573_v42 = vpop.f32.mrb[22].mxu0  ;;  %v2661_v45 = vpop.f32.mrb[22].mxu1 }
 0x12e   : > { %v2574_v46 = vpop.f32.mrb[23].mxu0  ;;  %v2662_v47 = vpop.f32.mrb[23].mxu1 }
 0x12f   : > { %v3674_v48 = vadd.f32 %v2660_v41, %v1432_v37  ;;  %v2575_v51 = vadd.f32 %v2574_v46, %v2573_v42  ;;  %v2663_v52 = vadd.f32 %v2662_v47, %v2661_v45  ;;  %v1459_v46 = vadd.f32 %v2569_v31, %v3660_v17 }
 0x130   : > { %v1464_v23 = vadd.f32 %v3671_v40, %v3660_v17 }
 0x131   : > { %v3676_v53 = vadd.f32 %v2663_v52, %v1435_v43 }
 0x133   : > { %v2576_v54 = vpop.f32.mrb[24].mxu0  ;;  %v2664_v57 = vpop.f32.mrb[24].mxu1 }
 0x134   : > { %v2577_v58 = vpop.f32.mrb[25].mxu0  ;;  %v2665_v59 = vpop.f32.mrb[25].mxu1 }
 0x135   : > { %v3679_v60 = vadd.f32 %v2577_v58, %v2576_v54  ;;  %v2666_v63 = vadd.f32 %v2665_v59, %v2664_v57  ;;  %v2579_v0 = vpop.f32.mrb[26].mxu0  ;;  %v2667_v1 = vpop.f32.mrb[26].mxu1 }
 0x136   : > { %v2580_v2 = vpop.f32.mrb[27].mxu0  ;;  %v2668_v5 = vpop.f32.mrb[27].mxu1 }
 0x137   : > { %v3682_v6 = vadd.f32 %v2666_v63, %v1440_v49  ;;  %v2581_v7 = vadd.f32 %v2580_v2, %v2579_v0  ;;  %v2669_v8 = vadd.f32 %v2668_v5, %v2667_v1  ;;  %v1472_v40 = vadd.f32 %v3679_v60, %v3660_v17 }
 0x139   : > { %v3684_v11 = vadd.f32 %v2669_v8, %v1443_v55  ;;  %v1467_v55 = vadd.f32 %v2575_v51, %v3660_v17 }
 0x13b   : > { %v2582_v12 = vpop.f32.mrb[28].mxu0  ;;  %v2670_v13 = vpop.f32.mrb[28].mxu1 }
 0x13c   : > { %v2583_v14 = vpop.f32.mrb[29].mxu0  ;;  %v2671_v18 = vpop.f32.mrb[29].mxu1 }
 0x13d   : > { %v3687_v19 = vadd.f32 %v2583_v14, %v2582_v12  ;;  %v2672_v20 = vadd.f32 %v2671_v18, %v2670_v13  ;;  %v2585_v21 = vpop.f32.mrb[30].mxu0  ;;  %v2673_v22 = vpop.f32.mrb[30].mxu1 }
 0x13e   : > { %v2586_v24 = vpop.f32.mrb[31].mxu0  ;;  %v2674_v25 = vpop.f32.mrb[31].mxu1 }
 0x13f   : > { %v3690_v26 = vadd.f32 %v2672_v20, %v1448_v61  ;;  %v2587_v27 = vadd.f32 %v2586_v24, %v2585_v21  ;;  %v2675_v28 = vadd.f32 %v2674_v25, %v2673_v22 }
 0x141   : > { %v3692_v29 = vadd.f32 %v2675_v28, %v1451_v3 }
 0x143   : > { %v2588_v32 = vpop.f32.mrb[32].mxu0  ;;  %v2676_v34 = vpop.f32.mrb[32].mxu1 }
 0x144   : > { %v2589_v35 = vpop.f32.mrb[33].mxu0  ;;  %v2677_v36 = vpop.f32.mrb[33].mxu1 }
 0x145   : > { %v3696_v39 = vadd.f32 %v2589_v35, %v2588_v32  ;;  %v2678_v37 = vadd.f32 %v2677_v36, %v2676_v34  ;;  %v2591_v41 = vpop.f32.mrb[34].mxu0  ;;  %v2679_v42 = vpop.f32.mrb[34].mxu1  ;;  %v1475_v32 = vadd.f32 %v2581_v7, %v3660_v17 }
 0x146   : > { %v2592_v45 = vpop.f32.mrb[35].mxu0  ;;  %v2680_v15 = vpop.f32.mrb[35].mxu1 }
 0x147   : > { %v3699_v47 = vadd.f32 %v2678_v37, %v1456_v9  ;;  %v2593_v43 = vadd.f32 %v2592_v45, %v2591_v41  ;;  %v2681_v52 = vadd.f32 %v2680_v15, %v2679_v42  ;;  %v1480_v45 = vadd.f32 %v3687_v19, %v3660_v17 }
 0x149   : > { %v3701_v54 = vadd.f32 %v2681_v52, %v1459_v46 }
 0x14b   : > { %v2594_v57 = vpop.f32.mrb[36].mxu0  ;;  %v2682_v58 = vpop.f32.mrb[36].mxu1 }
 0x14c   : > { %v2595_v59 = vpop.f32.mrb[37].mxu0  ;;  %v2683_v49 = vpop.f32.mrb[37].mxu1 }
 0x14d   : > { %v3705_v63 = vadd.f32 %v2595_v59, %v2594_v57  ;;  %v2684_v0 = vadd.f32 %v2683_v49, %v2682_v58  ;;  %v2597_v1 = vpop.f32.mrb[38].mxu0  ;;  %v2685_v2 = vpop.f32.mrb[38].mxu1  ;;  %v1483_v59 = vadd.f32 %v2587_v27, %v3660_v17  ;;  %v1491_v27 = vadd.f32 %v2593_v43, %v3660_v17 }
 0x14e   : > { %v2598_v5 = vpop.f32.mrb[39].mxu0  ;;  %v2686_v31 = vpop.f32.mrb[39].mxu1 }
 0x14f   : > { %v3708_v8 = vadd.f32 %v2684_v0, %v1464_v23  ;;  %v2599_v12 = vadd.f32 %v2598_v5, %v2597_v1  ;;  %v2687_v13 = vadd.f32 %v2686_v31, %v2685_v2  ;;  %v1496_v43 = vadd.f32 %v3705_v63, %v3660_v17 }
 0x151   : > { %v3710_v14 = vadd.f32 %v2687_v13, %v1467_v55  ;;  %v1488_v55 = vadd.f32 %v3696_v39, %v3660_v17 }
 0x153   : > { %v2600_v18 = vpop.f32.mrb[40].mxu0  ;;  %v2688_v61 = vpop.f32.mrb[40].mxu1 }
 0x154   : > { %v2601_v20 = vpop.f32.mrb[41].mxu0  ;;  %v2689_v21 = vpop.f32.mrb[41].mxu1 }
 0x155   : > { %v3714_v22 = vadd.f32 %v2601_v20, %v2600_v18  ;;  %v2690_v24 = vadd.f32 %v2689_v21, %v2688_v61  ;;  %v2603_v25 = vpop.f32.mrb[42].mxu0  ;;  %v2691_v3 = vpop.f32.mrb[42].mxu1 }
 0x156   : > { %v2604_v28 = vpop.f32.mrb[43].mxu0  ;;  %v2692_v51 = vpop.f32.mrb[43].mxu1 }
 0x157   : > { %v3717_v34 = vadd.f32 %v2690_v24, %v1472_v40  ;;  %v3719_v35 = vadd.f32 %v2604_v28, %v2603_v25  ;;  %v2693_v36 = vadd.f32 %v2692_v51, %v2691_v3 }
 0x159   : > { %v3721_v9 = vadd.f32 %v2693_v36, %v1475_v32 }
 0x15b   : > { %v2606_v37 = vpop.f32.mrb[44].mxu0  ;;  %v2694_v41 = vpop.f32.mrb[44].mxu1 }
 0x15c   : > { %v2607_v42 = vpop.f32.mrb[45].mxu0  ;;  %v2695_v60 = vpop.f32.mrb[45].mxu1 }
 0x15d   : > { %v3725_v15 = vadd.f32 %v2607_v42, %v2606_v37  ;;  %v2696_v46 = vadd.f32 %v2695_v60, %v2694_v41  ;;  %v2609_v52 = vpop.f32.mrb[46].mxu0  ;;  %v2697_v57 = vpop.f32.mrb[46].mxu1 }
 0x15e   : > { %v2610_v7 = vpop.f32.mrb[47].mxu0  ;;  %v2698_v58 = vpop.f32.mrb[47].mxu1 }
 0x15f   : > { %v3728_v49 = vadd.f32 %v2696_v46, %v1480_v45  ;;  %v3730_v23 = vadd.f32 %v2610_v7, %v2609_v52  ;;  %v2699_v0 = vadd.f32 %v2698_v58, %v2697_v57  ;;  %v1499_v52 = vadd.f32 %v2599_v12, %v3660_v17 }
 0x160   : > { %v1504_v12 = vadd.f32 %v3714_v22, %v3660_v17 }
 0x161   : > { %v3732_v1 = vadd.f32 %v2699_v0, %v1483_v59 }
 0x163   : > { %v2700_v2 = vpop.f32.mrb[48].mxu1  ;;  %v2764_v5 = vpop.f32.mrb[48].mxu0 }
 0x164   : > { %v2701_v31 = vpop.f32.mrb[49].mxu1  ;;  %v2765_v19 = vpop.f32.mrb[49].mxu0 }
 0x165   : > { %v2702_v13 = vadd.f32 %v2701_v31, %v2700_v2  ;;  %v2766_v18 = vadd.f32 %v2765_v19, %v2764_v5  ;;  %v2703_v61 = vpop.f32.mrb[50].mxu1  ;;  %v2767_v20 = vpop.f32.mrb[50].mxu0 }
 0x166   : > { %v2704_v21 = vpop.f32.mrb[51].mxu1  ;;  %v2768_v40 = vpop.f32.mrb[51].mxu0 }
 0x167   : > { %v3737_v24 = vadd.f32 %v2702_v13, %v1488_v55  ;;  %v2705_v25 = vadd.f32 %v2704_v21, %v2703_v61  ;;  %v2769_v3 = vadd.f32 %v2768_v40, %v2767_v20  ;;  %v3740_v28 = vadd.f32 %v2766_v18, %v3666_v30 }
 0x169   : > { %v3742_v51 = vadd.f32 %v2705_v25, %v1491_v27  ;;  %v3745_v32 = vadd.f32 %v2769_v3, %v3668_v33 }
 0x16b   : > { %v2706_v39 = vpop.f32.mrb[52].mxu1  ;;  %v2770_v36 = vpop.f32.mrb[52].mxu0 }
 0x16c   : > { %v2707_v37 = vpop.f32.mrb[53].mxu1  ;;  %v2771_v41 = vpop.f32.mrb[53].mxu0 }
 0x16d   : > { %v2708_v42 = vadd.f32 %v2707_v37, %v2706_v39  ;;  %v2772_v60 = vadd.f32 %v2771_v41, %v2770_v36  ;;  %v2709_v45 = vpop.f32.mrb[54].mxu1  ;;  %v2773_v46 = vpop.f32.mrb[54].mxu0 }
 0x16e   : > { %v2710_v30 = vpop.f32.mrb[55].mxu1  ;;  %v2774_v57 = vpop.f32.mrb[55].mxu0 }
 0x16f   : > { %v3750_v7 = vadd.f32 %v2708_v42, %v1496_v43  ;;  %v2711_v58 = vadd.f32 %v2710_v30, %v2709_v45  ;;  %v2775_v33 = vadd.f32 %v2774_v57, %v2773_v46  ;;  %v3753_v59 = vadd.f32 %v2772_v60, %v3674_v48 }
 0x170   : > { %v1507_v48 = vadd.f32 %v3719_v35, %v3660_v17  ;;  %v1512_v35 = vadd.f32 %v3725_v15, %v3660_v17 }
 0x171   : > { %v3755_v0 = vadd.f32 %v2711_v58, %v1499_v52  ;;  %v3758_v2 = vadd.f32 %v2775_v33, %v3676_v53 }
 0x173   : > { %v2712_v63 = vpop.f32.mrb[56].mxu1  ;;  %v2776_v5 = vpop.f32.mrb[56].mxu0 }
 0x174   : > { %v2713_v31 = vpop.f32.mrb[57].mxu1  ;;  %v2777_v19 = vpop.f32.mrb[57].mxu0 }
 0x175   : > { %v2714_v55 = vadd.f32 %v2713_v31, %v2712_v63  ;;  %v2778_v13 = vadd.f32 %v2777_v19, %v2776_v5  ;;  %v2715_v18 = vpop.f32.mrb[58].mxu1  ;;  %v2779_v61 = vpop.f32.mrb[58].mxu0 }
 0x176   : > { %v2716_v20 = vpop.f32.mrb[59].mxu1  ;;  %v2780_v27 = vpop.f32.mrb[59].mxu0 }
 0x177   : > { %v3764_v21 = vadd.f32 %v2714_v55, %v1504_v12  ;;  %v2717_v53 = vadd.f32 %v2716_v20, %v2715_v18  ;;  %v2781_v40 = vadd.f32 %v2780_v27, %v2779_v61  ;;  %v3767_v25 = vadd.f32 %v2778_v13, %v3682_v6 }
 0x178   : > { %v1515_v6 = vadd.f32 %v3730_v23, %v3660_v17  ;;  %v1520_v23 = vadd.f32 %v3640_v38, %v3660_v17 }
 0x179   : > { %v3769_v3 = vadd.f32 %v2717_v53, %v1507_v48  ;;  %v3772_v22 = vadd.f32 %v2781_v40, %v3684_v11 }
 0x17b   : > { %v2718_v39 = vpop.f32.mrb[60].mxu1  ;;  %v2782_v36 = vpop.f32.mrb[60].mxu0 }
 0x17c   : > { %v2719_v37 = vpop.f32.mrb[61].mxu1  ;;  %v2783_v41 = vpop.f32.mrb[61].mxu0 }
 0x17d   : > { %v2720_v43 = vadd.f32 %v2719_v37, %v2718_v39  ;;  %v2784_v42 = vadd.f32 %v2783_v41, %v2782_v36  ;;  %v2721_v60 = vpop.f32.mrb[62].mxu1  ;;  %v2785_v45 = vpop.f32.mrb[62].mxu0 }
 0x17e   : > { %v2722_v46 = vpop.f32.mrb[63].mxu1  ;;  %v2786_v52 = vpop.f32.mrb[63].mxu0 }
 0x17f   : > { %v3778_v30 = vadd.f32 %v2720_v43, %v1512_v35  ;;  %v2723_v11 = vadd.f32 %v2722_v46, %v2721_v60  ;;  %v2787_v57 = vadd.f32 %v2786_v52, %v2785_v45  ;;  %v3781_v58 = vadd.f32 %v2784_v42, %v3690_v26 }
 0x180   : > { %v1523_v26 = vadd.f32 %v3642_v44, %v3660_v17  ;;  %v1528_v44 = vadd.f32 %v3645_v50, %v3660_v17 }
 0x181   : > { %v3783_v33 = vadd.f32 %v2723_v11, %v1515_v6  ;;  %v3786_v15 = vadd.f32 %v2787_v57, %v3692_v29 }
 0x183   : > { %v2724_v63 = vpop.f32.mrb[64].mxu1  ;;  %v2788_v5 = vpop.f32.mrb[64].mxu0 }
 0x184   : > { %v2725_v31 = vpop.f32.mrb[65].mxu1  ;;  %v2789_v19 = vpop.f32.mrb[65].mxu0 }
 0x185   : > { %v2726_v12 = vadd.f32 %v2725_v31, %v2724_v63  ;;  %v2790_v55 = vadd.f32 %v2789_v19, %v2788_v5  ;;  %v2727_v13 = vpop.f32.mrb[66].mxu1  ;;  %v2791_v18 = vpop.f32.mrb[66].mxu0 }
 0x186   : > { %v2728_v61 = vpop.f32.mrb[67].mxu1  ;;  %v2792_v48 = vpop.f32.mrb[67].mxu0 }
 0x187   : > { %v3792_v20 = vadd.f32 %v2726_v12, %v1520_v23  ;;  %v2729_v29 = vadd.f32 %v2728_v61, %v2727_v13  ;;  %v2793_v27 = vadd.f32 %v2792_v48, %v2791_v18  ;;  %v3795_v53 = vadd.f32 %v2790_v55, %v3699_v47 }
 0x188   : > { %v1531_v47 = vadd.f32 %v3647_v56, %v3660_v17  ;;  %v1536_v56 = vadd.f32 %v3649_v62, %v3660_v17 }
 0x189   : > { %v3797_v40 = vadd.f32 %v2729_v29, %v1523_v26  ;;  %v3800_v38 = vadd.f32 %v2793_v27, %v3701_v54 }
 0x18b   : > { %v2730_v39 = vpop.f32.mrb[68].mxu1  ;;  %v2794_v36 = vpop.f32.mrb[68].mxu0 }
 0x18c   : > { %v2731_v37 = vpop.f32.mrb[69].mxu1  ;;  %v2795_v41 = vpop.f32.mrb[69].mxu0 }
 0x18d   : > { %v2732_v35 = vadd.f32 %v2731_v37, %v2730_v39  ;;  %v2796_v43 = vadd.f32 %v2795_v41, %v2794_v36  ;;  %v2733_v42 = vpop.f32.mrb[70].mxu1  ;;  %v2797_v60 = vpop.f32.mrb[70].mxu0 }
 0x18e   : > { %v2734_v45 = vpop.f32.mrb[71].mxu1  ;;  %v2798_v6 = vpop.f32.mrb[71].mxu0 }
 0x18f   : > { %v3806_v46 = vadd.f32 %v2732_v35, %v1528_v44  ;;  %v2735_v54 = vadd.f32 %v2734_v45, %v2733_v42  ;;  %v2799_v52 = vadd.f32 %v2798_v6, %v2797_v60  ;;  %v3809_v11 = vadd.f32 %v2796_v43, %v3708_v8 }
 0x190   : > { %v1539_v8 = vadd.f32 %v3651_v4, %v3660_v17  ;;  %v1544_v4 = vadd.f32 %v3653_v10, %v3660_v17 }
 0x191   : > { %v3811_v57 = vadd.f32 %v2735_v54, %v1531_v47  ;;  %v3814_v50 = vadd.f32 %v2799_v52, %v3710_v14 }
 0x193   : > { %v2736_v63 = vpop.f32.mrb[72].mxu1  ;;  %v2800_v5 = vpop.f32.mrb[72].mxu0 }
 0x194   : > { %v2737_v31 = vpop.f32.mrb[73].mxu1  ;;  %v2801_v19 = vpop.f32.mrb[73].mxu0 }
 0x195   : > { %v2738_v23 = vadd.f32 %v2737_v31, %v2736_v63  ;;  %v2802_v12 = vadd.f32 %v2801_v19, %v2800_v5  ;;  %v2739_v55 = vpop.f32.mrb[74].mxu1  ;;  %v2803_v13 = vpop.f32.mrb[74].mxu0 }
 0x196   : > { %v2740_v18 = vpop.f32.mrb[75].mxu1  ;;  %v2804_v26 = vpop.f32.mrb[75].mxu0 }
 0x197   : > { %v3820_v61 = vadd.f32 %v2738_v23, %v1536_v56  ;;  %v2741_v14 = vadd.f32 %v2740_v18, %v2739_v55  ;;  %v2805_v48 = vadd.f32 %v2804_v26, %v2803_v13  ;;  %v3823_v29 = vadd.f32 %v2802_v12, %v3717_v34 }
 0x198   : > { %v1547_v34 = vadd.f32 %v3655_v16, %v3660_v17 }
 0x199   : > { %v3825_v27 = vadd.f32 %v2741_v14, %v1539_v8  ;;  %v3828_v62 = vadd.f32 %v2805_v48, %v3721_v9 }
 0x19b   : > { %v2742_v39 = vpop.f32.mrb[76].mxu1  ;;  %v2806_v36 = vpop.f32.mrb[76].mxu0 }
 0x19c   : > { %v2743_v37 = vpop.f32.mrb[77].mxu1  ;;  %v2807_v41 = vpop.f32.mrb[77].mxu0 }
 0x19d   : > { %v2744_v44 = vadd.f32 %v2743_v37, %v2742_v39  ;;  %v2808_v35 = vadd.f32 %v2807_v41, %v2806_v36  ;;  %v2745_v43 = vpop.f32.mrb[78].mxu1  ;;  %v2809_v42 = vpop.f32.mrb[78].mxu0 }
 0x19e   : > { %v2746_v60 = vpop.f32.mrb[79].mxu1  ;;  %v2810_v47 = vpop.f32.mrb[79].mxu0 }
 0x19f   : > { %v3834_v45 = vadd.f32 %v2744_v44, %v1544_v4  ;;  %v2747_v9 = vadd.f32 %v2746_v60, %v2745_v43  ;;  %v2811_v6 = vadd.f32 %v2810_v47, %v2809_v42  ;;  %v3837_v54 = vadd.f32 %v2808_v35, %v3728_v49 }
 0x1a1   : > { %v3840_v52 = vadd.f32 %v2747_v9, %v1547_v34  ;;  %v3843_v10 = vadd.f32 %v2811_v6, %v3732_v1 }
 0x1a3   : > { %v2812_v63 = vpop.f32.mrb[80].mxu0  ;;  %v2881_v16 = vpop.f32.mrb[80].mxu1 }
 0x1a4   : > { %v1915_v17 = vadd.f32 %v2881_v16, %v3753_v59  ;;  %v2813_v49 = vpop.f32.mrb[81].mxu0  ;;  %v1906_v5 = vpop.f32.mrb[81].mxu1 }
 0x1a5   : > { %v2814_v31 = vadd.f32 %v2813_v49, %v2812_v63  ;;  %v1907_v19 = vadd.f32 %v1906_v5, %v3740_v28  ;;  %v2815_v1 = vpop.f32.mrb[82].mxu0  ;;  %v2882_v56 = vpop.f32.mrb[82].mxu1 }
 0x1a6   : > { %2035 = vst [vmem:[%s3848_s13 + $0x10] sm:$0xff] %v1915_v17  ;;  %v1918_v23 = vadd.f32 %v2882_v56, %v3758_v2  ;;  %v2816_v12 = vpop.f32.mrb[83].mxu0  ;;  %v1909_v55 = vpop.f32.mrb[83].mxu1  ;;  %v2104_v48 = vmul.f32 %v1915_v17, %v1915_v17 }
 0x1a7   : > { %2033 = vst [vmem:[%s3848_s13] sm:$0xff] %v1907_v19  ;;  %v2817_v13 = vadd.f32 %v2816_v12, %v2815_v1  ;;  %v1910_v8 = vadd.f32 %v1909_v55, %v3745_v32  ;;  %v3857_v18 = vadd.f32 %v2814_v31, %v3737_v24  ;;  %v2102_v59 = vmul.f32 %v1907_v19, %v1907_v19 }
 0x1a8   : > { %2036 = vst [vmem:[%s3848_s13 + $0x18] sm:$0xff] %v1918_v23  ;;  %v2105_v41 = vmul.f32 %v1918_v23, %v1918_v23 }
 0x1a9   : > { %2034 = vst [vmem:[%s3848_s13 + $0x8] sm:$0xff] %v1910_v8  ;;  %v2065_v26 = vadd.f32 %v1910_v8, %v1907_v19  ;;  %v2103_v14 = vmul.f32 %v1910_v8, %v1910_v8  ;;  %v3862_v28 = vadd.f32 %v2817_v13, %v3742_v51 }
 0x1ab   : > { %v2066_v2 = vadd.f32 %v2065_v26, %v1915_v17  ;;  %v2134_v39 = vadd.f32 %v2103_v14, %v2102_v59  ;;  %v2818_v36 = vpop.f32.mrb[84].mxu0  ;;  %v2885_v37 = vpop.f32.mrb[84].mxu1 }
 0x1ac   : > { %v1931_v32 = vadd.f32 %v2885_v37, %v3781_v58  ;;  %v2819_v24 = vpop.f32.mrb[85].mxu0  ;;  %v1922_v4 = vpop.f32.mrb[85].mxu1 }
 0x1ad   : > { %v2135_v44 = vadd.f32 %v2134_v39, %v2104_v48  ;;  %v2820_v35 = vadd.f32 %v2819_v24, %v2818_v36  ;;  %v1923_v43 = vadd.f32 %v1922_v4, %v3767_v25  ;;  %v2067_v42 = vadd.f32 %v2066_v2, %v1918_v23  ;;  %v2821_v51 = vpop.f32.mrb[86].mxu0  ;;  %v2886_v34 = vpop.f32.mrb[86].mxu1 }
 0x1ae   : > { %2039 = vst [vmem:[%s3848_s13 + $0x30] sm:$0xff] %v1931_v32  ;;  %v1934_v60 = vadd.f32 %v2886_v34, %v3786_v15  ;;  %v2822_v47 = vpop.f32.mrb[87].mxu0  ;;  %v1925_v9 = vpop.f32.mrb[87].mxu1  ;;  %v2108_v56 = vmul.f32 %v1931_v32, %v1931_v32 }
 0x1af   : > { %2037 = vst [vmem:[%s3848_s13 + $0x20] sm:$0xff] %v1923_v43  ;;  %v2068_v6 = vadd.f32 %v2067_v42, %v1923_v43  ;;  %v2106_v63 = vmul.f32 %v1923_v43, %v1923_v43  ;;  %v2136_v58 = vadd.f32 %v2135_v44, %v2105_v41  ;;  %v2823_v16 = vadd.f32 %v2822_v47, %v2821_v51 }
 0x1b0   : > { %2040 = vst [vmem:[%s3848_s13 + $0x38] sm:$0xff] %v1934_v60  ;;  %v1926_v17 = vadd.f32 %v1925_v9, %v3772_v22  ;;  %v3872_v49 = vadd.f32 %v2820_v35, %v3750_v7  ;;  %v2109_v26 = vmul.f32 %v1934_v60, %v1934_v60 }
 0x1b1   : > { %v2137_v25 = vadd.f32 %v2136_v58, %v2106_v63  ;;  %v3875_v5 = vadd.f32 %v2823_v16, %v3755_v0 }
 0x1b2   : > { %2038 = vst [vmem:[%s3848_s13 + $0x28] sm:$0xff] %v1926_v17  ;;  %v2069_v31 = vadd.f32 %v2068_v6, %v1926_v17  ;;  %v2107_v15 = vmul.f32 %v1926_v17, %v1926_v17 }
 0x1b3   : > { %v2824_v19 = vpop.f32.mrb[88].mxu0  ;;  %v2889_v1 = vpop.f32.mrb[88].mxu1 }
 0x1b4   : > { %v2070_v23 = vadd.f32 %v2069_v31, %v1931_v32  ;;  %v2138_v12 = vadd.f32 %v2137_v25, %v2107_v15  ;;  %v1947_v55 = vadd.f32 %v2889_v1, %v3809_v11  ;;  %v2825_v22 = vpop.f32.mrb[89].mxu0  ;;  %v1938_v13 = vpop.f32.mrb[89].mxu1 }
 0x1b5   : > { %v2826_v7 = vadd.f32 %v2825_v22, %v2824_v19  ;;  %v1939_v8 = vadd.f32 %v1938_v13, %v3795_v53  ;;  %v2827_v59 = vpop.f32.mrb[90].mxu0  ;;  %v2890_v0 = vpop.f32.mrb[90].mxu1 }
 0x1b6   : > { %v2139_v14 = vadd.f32 %v2138_v12, %v2108_v56  ;;  %2043 = vst [vmem:[%s3848_s13 + $0x50] sm:$0xff] %v1947_v55  ;;  %v2071_v48 = vadd.f32 %v2070_v23, %v1934_v60  ;;  %v1950_v2 = vadd.f32 %v2890_v0, %v3814_v50  ;;  %v2828_v39 = vpop.f32.mrb[91].mxu0  ;;  %v1941_v36 = vpop.f32.mrb[91].mxu1  ;;  %v2112_v51 = vmul.f32 %v1947_v55, %v1947_v55 }
 0x1b7   : > { %2041 = vst [vmem:[%s3848_s13 + $0x40] sm:$0xff] %v1939_v8  ;;  %v2110_v37 = vmul.f32 %v1939_v8, %v1939_v8  ;;  %v2829_v11 = vadd.f32 %v2828_v39, %v2827_v59  ;;  %v1942_v41 = vadd.f32 %v1941_v36, %v3800_v38  ;;  %v3885_v32 = vadd.f32 %v2826_v7, %v3764_v21 }
 0x1b8   : > { %v2072_v53 = vadd.f32 %v2071_v48, %v1939_v8  ;;  %v2140_v24 = vadd.f32 %v2139_v14, %v2109_v26  ;;  %2044 = vst [vmem:[%s3848_s13 + $0x58] sm:$0xff] %v1950_v2  ;;  %v2113_v58 = vmul.f32 %v1950_v2, %v1950_v2 }
 0x1b9   : > { %2042 = vst [vmem:[%s3848_s13 + $0x48] sm:$0xff] %v1942_v41  ;;  %v2111_v4 = vmul.f32 %v1942_v41, %v1942_v41  ;;  %v3890_v44 = vadd.f32 %v2829_v11, %v3769_v3 }
 0x1ba   : > { %v2141_v35 = vadd.f32 %v2140_v24, %v2110_v37  ;;  %v2073_v50 = vadd.f32 %v2072_v53, %v1942_v41 }
 0x1bb   : > { %v2830_v43 = vpop.f32.mrb[92].mxu0  ;;  %v2893_v42 = vpop.f32.mrb[92].mxu1 }
 0x1bc   : > { %v2074_v34 = vadd.f32 %v2073_v50, %v1947_v55  ;;  %v2142_v38 = vadd.f32 %v2141_v35, %v2111_v4  ;;  %v1963_v21 = vadd.f32 %v2893_v42, %v3837_v54  ;;  %v2831_v60 = vpop.f32.mrb[93].mxu0  ;;  %v1954_v47 = vpop.f32.mrb[93].mxu1 }
 0x1bd   : > { %v2832_v9 = vadd.f32 %v2831_v60, %v2830_v43  ;;  %v1955_v6 = vadd.f32 %v1954_v47, %v3823_v29  ;;  %v2833_v63 = vpop.f32.mrb[94].mxu0  ;;  %v2894_v3 = vpop.f32.mrb[94].mxu1 }
 0x1be   : > { %v2143_v16 = vadd.f32 %v2142_v38, %v2112_v51  ;;  %2047 = vst [vmem:[%s3848_s13 + $0x70] sm:$0xff] %v1963_v21  ;;  %v2075_v17 = vadd.f32 %v2074_v34, %v1950_v2  ;;  %v1966_v25 = vadd.f32 %v2894_v3, %v3843_v10  ;;  %v2834_v31 = vpop.f32.mrb[95].mxu0  ;;  %v1957_v15 = vpop.f32.mrb[95].mxu1  ;;  %v2116_v8 = vmul.f32 %v1963_v21, %v1963_v21 }
 0x1bf   : > { %2045 = vst [vmem:[%s3848_s13 + $0x60] sm:$0xff] %v1955_v6  ;;  %v2114_v19 = vmul.f32 %v1955_v6, %v1955_v6  ;;  %v2835_v54 = vadd.f32 %v2834_v31, %v2833_v63  ;;  %v1958_v1 = vadd.f32 %v1957_v15, %v3828_v62  ;;  %v1834_v56 = vadd.f32 %v2832_v9, %v3778_v30 }
 0x1c0   : > { %v2076_v29 = vadd.f32 %v2075_v17, %v1955_v6  ;;  %v2144_v23 = vadd.f32 %v2143_v16, %v2113_v58  ;;  %2048 = vst [vmem:[%s3848_s13 + $0x78] sm:$0xff] %v1966_v25 }
 0x1c1   : > { %2046 = vst [vmem:[%s3848_s13 + $0x68] sm:$0xff] %v1958_v1  ;;  %v2115_v12 = vmul.f32 %v1958_v1, %v1958_v1  ;;  %v1837_v55 = vadd.f32 %v2835_v54, %v3783_v33  ;;  %v2117_v33 = vmul.f32 %v1966_v25, %v1966_v25 }
 0x1c2   : > { %v2145_v22 = vadd.f32 %v2144_v23, %v2114_v19  ;;  %v2077_v13 = vadd.f32 %v2076_v29, %v1958_v1 }
 0x1c3   : > { %v2836_v10 = vpop.f32.mrb[96].mxu0  ;;  %v2897_v7 = vpop.f32.mrb[96].mxu1 }
 0x1c4   : > { %v2078_v59 = vadd.f32 %v2077_v13, %v1963_v21  ;;  %v2146_v0 = vadd.f32 %v2145_v22, %v2115_v12  ;;  %v1979_v62 = vadd.f32 %v2897_v7, %v3872_v49  ;;  %v2837_v26 = vpop.f32.mrb[97].mxu0  ;;  %v1970_v30 = vpop.f32.mrb[97].mxu1 }
 0x1c5   : > { %v2838_v14 = vadd.f32 %v2837_v26, %v2836_v10  ;;  %v1971_v48 = vadd.f32 %v1970_v30, %v3857_v18  ;;  %v2839_v2 = vpop.f32.mrb[98].mxu0  ;;  %v2898_v39 = vpop.f32.mrb[98].mxu1 }
 0x1c6   : > { %v2147_v36 = vadd.f32 %v2146_v0, %v2116_v8  ;;  %2051 = vst [vmem:[%s3848_s13 + $0x90] sm:$0xff] %v1979_v62  ;;  %v2079_v37 = vadd.f32 %v2078_v59, %v1966_v25  ;;  %v1982_v11 = vadd.f32 %v2898_v39, %v3875_v5  ;;  %v2840_v41 = vpop.f32.mrb[99].mxu0  ;;  %v1973_v53 = vpop.f32.mrb[99].mxu1  ;;  %v2120_v21 = vmul.f32 %v1979_v62, %v1979_v62 }
 0x1c7   : > { %2049 = vst [vmem:[%s3848_s13 + $0x80] sm:$0xff] %v1971_v48  ;;  %v2118_v24 = vmul.f32 %v1971_v48, %v1971_v48  ;;  %v2841_v49 = vadd.f32 %v2840_v41, %v2839_v2  ;;  %v1974_v4 = vadd.f32 %v1973_v53, %v3862_v28  ;;  %v1842_v35 = vadd.f32 %v2838_v14, %v3792_v20 }
 0x1c8   : > { %v2080_v18 = vadd.f32 %v2079_v37, %v1971_v48  ;;  %v2148_v50 = vadd.f32 %v2147_v36, %v2117_v33  ;;  %2052 = vst [vmem:[%s3848_s13 + $0x98] sm:$0xff] %v1982_v11 }
 0x1c9   : > { %2050 = vst [vmem:[%s3848_s13 + $0x88] sm:$0xff] %v1974_v4  ;;  %v2119_v43 = vmul.f32 %v1974_v4, %v1974_v4  ;;  %v1845_v42 = vadd.f32 %v2841_v49, %v3797_v40  ;;  %v2121_v40 = vmul.f32 %v1982_v11, %v1982_v11 }
 0x1ca   : > { %v2149_v51 = vadd.f32 %v2148_v50, %v2118_v24  ;;  %v2081_v34 = vadd.f32 %v2080_v18, %v1974_v4 }
 0x1cb   : > { %v2842_v5 = vpop.f32.mrb[100].mxu0  ;;  %v2901_v38 = vpop.f32.mrb[100].mxu1 }
 0x1cc   : > { %v2082_v60 = vadd.f32 %v2081_v34, %v1979_v62  ;;  %v2150_v47 = vadd.f32 %v2149_v51, %v2119_v43  ;;  %v1995_v9 = vadd.f32 %v2901_v38, %v1834_v56  ;;  %v2843_v28 = vpop.f32.mrb[101].mxu0  ;;  %v1986_v6 = vpop.f32.mrb[101].mxu1 }
 0x1cd   : > { %v2844_v20 = vadd.f32 %v2843_v28, %v2842_v5  ;;  %v1987_v63 = vadd.f32 %v1986_v6, %v3885_v32  ;;  %v2845_v3 = vpop.f32.mrb[102].mxu0  ;;  %v2902_v58 = vpop.f32.mrb[102].mxu1 }
 0x1ce   : > { %v2151_v16 = vadd.f32 %v2150_v47, %v2120_v21  ;;  %2055 = vst [vmem:[%s3848_s13 + $0xb0] sm:$0xff] %v1995_v9  ;;  %v2083_v17 = vadd.f32 %v2082_v60, %v1982_v11  ;;  %v1998_v25 = vadd.f32 %v2902_v58, %v1837_v55  ;;  %v2846_v31 = vpop.f32.mrb[103].mxu0  ;;  %v1989_v15 = vpop.f32.mrb[103].mxu1  ;;  %v2124_v7 = vmul.f32 %v1995_v9, %v1995_v9 }
 0x1cf   : > { %2053 = vst [vmem:[%s3848_s13 + $0xa0] sm:$0xff] %v1987_v63  ;;  %v2122_v19 = vmul.f32 %v1987_v63, %v1987_v63  ;;  %v2847_v54 = vadd.f32 %v2846_v31, %v2845_v3  ;;  %v1990_v1 = vadd.f32 %v1989_v15, %v3890_v44  ;;  %v1850_v56 = vadd.f32 %v2844_v20, %v3806_v46 }
 0x1d0   : > { %v2084_v29 = vadd.f32 %v2083_v17, %v1987_v63  ;;  %v2152_v32 = vadd.f32 %v2151_v16, %v2121_v40  ;;  %2056 = vst [vmem:[%s3848_s13 + $0xb8] sm:$0xff] %v1998_v25  ;;  %v2125_v48 = vmul.f32 %v1998_v25, %v1998_v25 }
 0x1d1   : > { %2054 = vst [vmem:[%s3848_s13 + $0xa8] sm:$0xff] %v1990_v1  ;;  %v2123_v23 = vmul.f32 %v1990_v1, %v1990_v1  ;;  %v1853_v12 = vadd.f32 %v2847_v54, %v3811_v57 }
 0x1d2   : > { %v2153_v22 = vadd.f32 %v2152_v32, %v2122_v19  ;;  %v2085_v13 = vadd.f32 %v2084_v29, %v1990_v1 }
 0x1d3   : > { %v2848_v55 = vpop.f32.mrb[104].mxu0  ;;  %v2905_v10 = vpop.f32.mrb[104].mxu1 }
 0x1d4   : > { %v2086_v8 = vadd.f32 %v2085_v13, %v1995_v9  ;;  %v2154_v59 = vadd.f32 %v2153_v22, %v2123_v23  ;;  %v2011_v0 = vadd.f32 %v2905_v10, %v1850_v56  ;;  %v2849_v44 = vpop.f32.mrb[105].mxu0  ;;  %v2002_v62 = vpop.f32.mrb[105].mxu1 }
 0x1d5   : > { %v2850_v46 = vadd.f32 %v2849_v44, %v2848_v55  ;;  %v2003_v26 = vadd.f32 %v2002_v62, %v1842_v35  ;;  %v2851_v30 = vpop.f32.mrb[106].mxu0  ;;  %v2906_v14 = vpop.f32.mrb[106].mxu1 }
 0x1d6   : > { %v2155_v57 = vadd.f32 %v2154_v59, %v2124_v7  ;;  %2059 = vst [vmem:[%s3848_s13 + $0xd0] sm:$0xff] %v2011_v0  ;;  %v2087_v2 = vadd.f32 %v2086_v8, %v1998_v25  ;;  %v2014_v39 = vadd.f32 %v2906_v14, %v1853_v12  ;;  %v2852_v33 = vpop.f32.mrb[107].mxu0  ;;  %v2005_v36 = vpop.f32.mrb[107].mxu1  ;;  %v2128_v34 = vmul.f32 %v2011_v0, %v2011_v0 }
 0x1d7   : > { %2057 = vst [vmem:[%s3848_s13 + $0xc0] sm:$0xff] %v2003_v26  ;;  %v2126_v37 = vmul.f32 %v2003_v26, %v2003_v26  ;;  %v2853_v11 = vadd.f32 %v2852_v33, %v2851_v30  ;;  %v2006_v41 = vadd.f32 %v2005_v36, %v1845_v42  ;;  %v1858_v53 = vadd.f32 %v2850_v46, %v3820_v61 }
 0x1d8   : > { %v2088_v24 = vadd.f32 %v2087_v2, %v2003_v26  ;;  %v2156_v49 = vadd.f32 %v2155_v57, %v2125_v48  ;;  %2060 = vst [vmem:[%s3848_s13 + $0xd8] sm:$0xff] %v2014_v39  ;;  %v2129_v28 = vmul.f32 %v2014_v39, %v2014_v39 }
 0x1d9   : > { %2058 = vst [vmem:[%s3848_s13 + $0xc8] sm:$0xff] %v2006_v41  ;;  %v2127_v4 = vmul.f32 %v2006_v41, %v2006_v41  ;;  %v1861_v35 = vadd.f32 %v2853_v11, %v3825_v27 }
 0x1da   : > { %v2157_v18 = vadd.f32 %v2156_v49, %v2126_v37  ;;  %v2089_v50 = vadd.f32 %v2088_v24, %v2006_v41 }
 0x1db   : > { %v2854_v43 = vpop.f32.mrb[108].mxu0  ;;  %v2909_v51 = vpop.f32.mrb[108].mxu1 }
 0x1dc   : > { %v2090_v5 = vadd.f32 %v2089_v50, %v2011_v0  ;;  %v2158_v38 = vadd.f32 %v2157_v18, %v2127_v4  ;;  %v2855_v21 = vpop.f32.mrb[109].mxu0  ;;  %v2018_v60 = vpop.f32.mrb[109].mxu1 }
 0x1dd   : > { %v2856_v42 = vadd.f32 %v2855_v21, %v2854_v43  ;;  %v2019_v47 = vadd.f32 %v2018_v60, %v1858_v53  ;;  %v2857_v61 = vpop.f32.mrb[110].mxu0  ;;  %v2910_v9 = vpop.f32.mrb[110].mxu1 }
 0x1de   : > { %v2159_v6 = vadd.f32 %v2158_v38, %v2128_v34  ;;  %v2091_v20 = vadd.f32 %v2090_v5, %v2014_v39  ;;  %v2858_v27 = vpop.f32.mrb[111].mxu0  ;;  %v2021_v63 = vpop.f32.mrb[111].mxu1 }
 0x1df   : > { %v1866_v3 = vadd.f32 %v2856_v42, %v3834_v45  ;;  %2061 = vst [vmem:[%s3848_s13 + $0xe0] sm:$0xff] %v2019_v47  ;;  %v2130_v58 = vmul.f32 %v2019_v47, %v2019_v47  ;;  %v2859_v40 = vadd.f32 %v2858_v27, %v2857_v61  ;;  %v2022_v16 = vadd.f32 %v2021_v63, %v1861_v35 }
 0x1e0   : > { %v2092_v17 = vadd.f32 %v2091_v20, %v2019_v47  ;;  %v2160_v25 = vadd.f32 %v2159_v6, %v2129_v28 }
 0x1e1   : > { %v2027_v31 = vadd.f32 %v2909_v51, %v1866_v3  ;;  %v1869_v15 = vadd.f32 %v2859_v40, %v3840_v52  ;;  %2062 = vst [vmem:[%s3848_s13 + $0xe8] sm:$0xff] %v2022_v16  ;;  %v2131_v19 = vmul.f32 %v2022_v16, %v2022_v16 }
 0x1e2   : > { %v2161_v54 = vadd.f32 %v2160_v25, %v2130_v58  ;;  %v2093_v1 = vadd.f32 %v2092_v17, %v2022_v16 }
 0x1e3   : > { %2063 = vst [vmem:[%s3848_s13 + $0xf0] sm:$0xff] %v2027_v31  ;;  %v2132_v56 = vmul.f32 %v2027_v31, %v2027_v31  ;;  %v2030_v29 = vadd.f32 %v2910_v9, %v1869_v15 }
 0x1e4   : > { %v2094_v32 = vadd.f32 %v2093_v1, %v2027_v31  ;;  %v2162_v45 = vadd.f32 %v2161_v54, %v2131_v19 }
 0x1e5   : > { %2064 = vst [vmem:[%s3848_s13 + $0xf8] sm:$0xff] %v2030_v29  ;;  %v2133_v23 = vmul.f32 %v2030_v29, %v2030_v29  ;;  %s3185_s13 = sshll.u32 %s3277_s11, 4  ;;  %s3186_s13 = int_to_ptr.vmem [resolvable:$false] %s3185_s13 }
 0x1e6   : > { %v2095_v12 = vadd.f32 %v2094_v32, %v2030_v29  ;;  %v2163_v22 = vadd.f32 %v2162_v45, %v2132_v56  ;;  %s3187_s14 = scalar_lea.vmem %s3186_s13, 256  ;;  %p3188_p0 = scmp.lt.s32.totalorder %s3945_s17, %s3186_s13 }
 0x1e7   : > { %p3189_p1 = scmp.lt.s32.totalorder %s3187_s14, %s3181_s10 }
 0x1e8   : > { %v2096_v13 = vrot.slane %v2095_v12, 4  ;;  %v2164_v55 = vadd.f32 %v2163_v22, %v2133_v23 }
 0x1e9   : > { %p3190_p2 = por %p3189_p1, %p3188_p0 }
 0x1ea   : > { %v2097_v52 = vadd.f32 %v2096_v13, %v2095_v12  ;;  %v2165_v10 = vrot.slane %v2164_v55, 4 }
 0x1eb   : > { %p3191_p3 = pnand %p3190_p2, %p3184_p13 }
 0x1ec   : > { %v2098_v7 = vrot.slane %v2097_v52, 2  ;;  %v2166_v8 = vadd.f32 %v2165_v10, %v2164_v55 }
 0x1ee   : > { %v2099_v59 = vadd.f32 %v2098_v7, %v2097_v52  ;;  %v2167_v0 = vrot.slane %v2166_v8, 2 }
 0x1f0   : > { %v2100_v44 = vrot.slane %v2099_v59, 1  ;;  %v2168_v62 = vadd.f32 %v2167_v0, %v2166_v8 }
 0x1f2   : > { %v2101_v46 = vadd.f32 %v2100_v44, %v2099_v59  ;;  %v2169_v26 = vrot.slane %v2168_v62, 1 }
 0x1f4   : > { %2171 = vst [vmem:[%s231_s16] sm:$0xff] %v2101_v46  ;;  %v2170_v30 = vadd.f32 %v2169_v26, %v2168_v62 }
 0x1f5   : > { %3194 = shalt.err (!%p3191_p3)
}
 0x1f6   : > { %s3195_s15 = scalar_lea.hbm %s3943_s6, 128  ;;  %s3199_s30 = scalar_lea.hbm %s4020_s4, 256 }
 0x1f7   : > { %p3196_p4 = scmp.ne.s32.totalorder %s3943_s6, %s3195_s15  ;;  %p3200_p9 = scmp.lt.u32.totalorder %s3943_s6, %s4020_s4 }
 0x1f8   : > { %p3201_p10 = scmp.lt.u32.totalorder %s3199_s30, %s3195_s15  ;;  %p3203_p12 = scmp.lt.u32.totalorder %s3195_s15, %s3943_s6 }
 0x1f9   : > { %p3197_p7 = pnand %p3196_p4, %p3347_p5 }
 0x1fa   : > { %p3202_p11 = por %p3201_p10, %p3200_p9 }
 0x1fb   : > { %p3198_p8 = pneg %p3197_p7 }
 0x1fc   : > { %p3204_p13 = por %p3203_p12, %p3202_p11 }
 0x1fe   : > { %p3205_p0 = pnand %p3204_p13, %p3198_p8 }
 0x200   : > { %3208 = shalt.err (!%p3205_p0)
}
 0x201   : > { %2928 = dma.vmem_to_hbm [thread:$0]  (%p3347_p5), %s3945_s17, 128, %s3943_s6, %s2179_s9   ;;  %2172 = vst [vmem:[%s3937_s23] sm:$0xff] %v2170_v30 }
 0x202   : > { %s2184_s10 = scalar_lea.sflag [#allocation5], %s3933_s7  ;;  %s3209_s11 = scalar_lea.vmem %s3952_s25, 128 }
 0x203   : > { %p3210_p1 = scmp.ne.s32.totalorder %s3952_s25, %s3209_s11  ;;  %s3278_s13 = smov [#allocation4]  }
 0x204   : > { %s3213_s14 = sshll.u32 %s3278_s13, 4  ;;  %s3214_s14 = int_to_ptr.vmem [resolvable:$false] %s3213_s14 }
 0x205   : > { %p3211_p2 = pnand %p3210_p1, %p3347_p5  ;;  %s3215_s15 = scalar_lea.vmem %s3214_s14, 256 }
 0x206   : > { %p3216_p4 = scmp.lt.s32.totalorder %s3952_s25, %s3214_s14  ;;  %p3217_p7 = scmp.lt.s32.totalorder %s3215_s15, %s3209_s11 }
 0x207   : > { %p3212_p3 = pneg %p3211_p2 }
 0x208   : > { %p3218_p8 = por %p3217_p7, %p3216_p4 }
 0x20a   : > { %p3219_p9 = pnand %p3218_p8, %p3212_p3 }
 0x20c   : > { %3222 = shalt.err (!%p3219_p9)
}
 0x20d   : > { %s3223_s7 = scalar_lea.hbm %s3950_s8, 128  ;;  %s3227_s6 = scalar_lea.hbm %s4021_s5, 256 }
 0x20e   : > { %p3224_p10 = scmp.ne.s32.totalorder %s3950_s8, %s3223_s7  ;;  %p3228_p13 = scmp.lt.u32.totalorder %s3950_s8, %s4021_s5 }
 0x20f   : > { %p3229_p0 = scmp.lt.u32.totalorder %s3227_s6, %s3223_s7  ;;  %p3231_p2 = scmp.lt.u32.totalorder %s3223_s7, %s3950_s8 }
 0x210   : > { %p3225_p11 = pnand %p3224_p10, %p3347_p5 }
 0x211   : > { %p3230_p1 = por %p3229_p0, %p3228_p13 }
 0x212   : > { %p3226_p12 = pneg %p3225_p11 }
 0x213   : > { %p3232_p3 = por %p3231_p2, %p3230_p1 }
 0x215   : > { %p3233_p4 = pnand %p3232_p3, %p3226_p12 }
 0x217   : > { %3236 = shalt.err (!%p3233_p4)
}
 0x218   : > { %2929 = dma.vmem_to_hbm [thread:$0]  (%p3347_p5), %s3952_s25, 128, %s3950_s8, %s2184_s10  }
 0x219 PF: > { %p2939_p7 = scmp.ge.s32.totalorder %s3275_s21, 2  ;;  %s2234_s26 = sand.u32 1, %s3263_s18  }
 0x21a   : > { %s2235_s30 = scalar_lea.sflag [#allocation3], %s2234_s26 }
 0x21b   : > { %p2933_p8 = pnand %p2939_p7, %p3351_p6 }
 0x21d   : > { %3254 = dma.done.wait (!%p2933_p8), %s2235_s30, 128  }
 0x21e   : > { %3256 = vsyncadd (!%p2933_p8), %s2235_s30, 4294967168  ;;  %s2244_s22 = scalar_lea.sflag [#allocation5], %s2234_s26 }
 0x21f   : > { %3258 = dma.done.wait (!%p2933_p8), %s2244_s22, 128  }
 0x220   : > { %3260 = vsyncadd (!%p2933_p8), %s2244_s22, 4294967168  ;;  %p19_p5 = scmp.ge.s32.totalorder %s3334_s24, 4   ;;  %s4024_s18 = smov %s3267_s19 }
 0x221   : > { %s4025_s19 = smov %s3271_s20  ;;  %s4026_s20 = smov %s3345_s27 }
 0x222   : > { %s4027_s21 = smov %s3334_s24  ;;  %21 = sbr.rel (!%p19_p5) target bundleno = 5 (0x5), region = 96 }
 0x229   :  { %2249 = vsyncpa [#allocation3], 1 }
 0x22a   :  { %2251 = vsyncpa [#allocation3 + $0x1], 1 }
 0x22b   :  { %2252 = vsyncpa [#allocation5], 1 }
 0x22c   :  { %2254 = vsyncpa [#allocation5 + $0x1], 1 }

// kernel: projective_generator_forward.25
= control target key start
LH: loop header
LB: loop body
LE: loop exit
PB: predicated region body
PF: predicated region fallthrough
CT: control target
= control target key end

     0   :  { %s448_s9 = smov 0   ;;  %s450_s10 = smov 0   ;;  %s506_s0 = inlined_call_operand.vmem [shape: f32[2,3,8,128], index: 0, kind: input, shape index: {}]   ;;  %s507_s1 = inlined_call_operand.vmem [shape: f32[2,12,8,128], index: 1, kind: input, shape index: {}]   ;;  %s508_s2 = inlined_call_operand.vmem [shape: f32[2,3,8,128], index: 2, kind: output, shape index: {}]  }
   0x1   :  { %s452_s11 = smov 0  }
   0x2 LB: > { %s24_s12 = sadd.s32 1, %s427_s10  ;;  %p362_p0 = scmp.ge.s32.totalorder %s431_s11, 1  ;;  %s431_s11 = sphi %s452_s11, %s12_s11   ;;  %s427_s10 = sphi %s450_s10, %s510_s10   ;;  %s423_s9 = sphi %s448_s9, %s509_s9  }
   0x3   : > { %p26_p1 = scmp.ge.s32.totalorder %s24_s12, 2  ;;  %p146_p2 = scmp.lt.s32.totalorder %s431_s11, 3 }
   0x5   : > { %s512_s12 = smov (%p26_p1, %s24_s12), 0  ;;  %p147_p3 = pnand %p362_p0, %p146_p2 }
   0x6   : > { %p182_p4 = scmp.lt.s32.totalorder (!%p147_p3), %s423_s9, 1 }
   0x7   : > { %150 = sbr.rel (%p147_p3) target bundleno = 31 (0x1f), region = 28 }
   0xe   : > { %s514_s9 = smov (!%p182_p4, %s423_s9), 1 }
   0xf   : > { %s383_s13 = smul.u32 24, %s514_s9 }
  0x10   : > { %s384_s14 = smul.u32 96, %s514_s9 }
  0x11   : > { %s189_s17 = scalar_lea.vmem %s506_s0, %s383_s13  ;;  %s205_s23 = scalar_lea.vmem %s508_s2, %s383_s13 }
  0x12   : > { %s478_s20 = scalar_lea.vmem %s507_s1, %s384_s14  ;;  %v206_v0 = vld [vmem:[%s189_s17] sm:$0xff]  ;;  %v366_v1 = vld [vmem:[%s189_s17 + $0x8] sm:$0xff]  ;;  %v367_v2 = vld [vmem:[%s189_s17 + $0x10] sm:$0xff] }
  0x13   : > { %v211_v3 = vld [vmem:[%s478_s20] sm:$0xff]  ;;  %v368_v4 = vld [vmem:[%s478_s20 + $0x8] sm:$0xff]  ;;  %v369_v5 = vld [vmem:[%s478_s20 + $0x10] sm:$0xff] }
  0x14   : > { %v212_v6 = vmul.f32 %v211_v3, %v206_v0  ;;  %v215_v7 = vmul.f32 %v368_v4, %v366_v1  ;;  %v219_v8 = vmul.f32 %v369_v5, %v367_v2  ;;  %v371_v9 = vld [vmem:[%s478_s20 + $0x20] sm:$0xff]  ;;  %v372_v10 = vld [vmem:[%s478_s20 + $0x28] sm:$0xff]  ;;  %v373_v13 = vld [vmem:[%s478_s20 + $0x30] sm:$0xff] }
  0x15   : > { %v227_v11 = vmul.f32 %v371_v9, %v206_v0  ;;  %v230_v12 = vmul.f32 %v372_v10, %v366_v1  ;;  %v376_v14 = vld [vmem:[%s478_s20 + $0x40] sm:$0xff]  ;;  %v234_v16 = vmul.f32 %v373_v13, %v367_v2  ;;  %v377_v18 = vld [vmem:[%s478_s20 + $0x48] sm:$0xff]  ;;  %v378_v19 = vld [vmem:[%s478_s20 + $0x50] sm:$0xff] }
  0x16   : > { %v216_v15 = vadd.f32 %v215_v7, %v212_v6  ;;  %v243_v17 = vmul.f32 %v376_v14, %v206_v0  ;;  %v370_v20 = vld [vmem:[%s478_s20 + $0x18] sm:$0xff]  ;;  %v246_v22 = vmul.f32 %v377_v18, %v366_v1  ;;  %v250_v23 = vmul.f32 %v378_v19, %v367_v2 }
  0x17   : > { %v231_v21 = vadd.f32 %v230_v12, %v227_v11  ;;  %v374_v25 = vld [vmem:[%s478_s20 + $0x38] sm:$0xff] }
  0x18   : > { %v220_v24 = vadd.f32 %v219_v8, %v216_v15  ;;  %v247_v27 = vadd.f32 %v246_v22, %v243_v17  ;;  %v379_v29 = vld [vmem:[%s478_s20 + $0x58] sm:$0xff] }
  0x19   : > { %v235_v26 = vadd.f32 %v234_v16, %v231_v21 }
  0x1a   : > { %v223_v28 = vadd.f32 %v370_v20, %v220_v24  ;;  %v251_v31 = vadd.f32 %v250_v23, %v247_v27 }
  0x1b   : > { %v238_v30 = vadd.f32 %v374_v25, %v235_v26 }
  0x1c   : > { %224 = vst [vmem:[%s205_s23] sm:$0xff] %v223_v28  ;;  %v254_v32 = vadd.f32 %v379_v29, %v251_v31 }
  0x1d   : > { %375 = vst [vmem:[%s205_s23 + $0x8] sm:$0xff] %v238_v30 }
  0x1e   : > { %380 = vst [vmem:[%s205_s23 + $0x10] sm:$0xff] %v254_v32 }
  0x1f PF: > { %s12_s11 = sadd.s32 1, %s431_s11   ;;  %s509_s9 = smov %s427_s10 }
  0x20   : > { %p9_p5 = scmp.ge.s32.totalorder %s12_s11, 4   ;;  %s510_s10 = smov %s512_s12 }
  0x22   :  { %11 = sbr.rel (!%p9_p5) target bundleno = 2 (0x2), region = 76 }

</bundles_post_ra>
